<compile_context>
chip_gen: v6e
topology: v6e:2x2x1
jax: 0.10.0
libtpu: 0.0.40
codegen_flags: <defaults>
</compile_context>

<pallas_src>
import jax
import jax.numpy as jnp
from jax.experimental import pallas as pl
from jax.experimental.pallas import tpu as pltpu


def _bigru_kernel(x_ref,
                  wih_fb_ref, bih_fb_ref,
                  whh_fb_ref, bhh_nf_ref, bhh_nb_ref,
                  wlin_ref, blin_ref,
                  out_ref,
                  gi_ref, rec_ref):
    T, B, I = x_ref.shape
    H = rec_ref.shape[2] // 2
    G = 3 * H

    # ---- fused input projections: both directions in one MXU matmul ----
    x2 = x_ref[...].reshape(T * B, I)                                   # bf16
    gi = jnp.dot(x2, wih_fb_ref[...],
                 preferred_element_type=jnp.float32) + bih_fb_ref[...]  # fp32
    gi_ref[...] = gi.reshape(T, B, 2 * G).astype(gi_ref.dtype)          # bf16

    # recurrent block-diagonal weight loaded once; n-gate biases broadcast once
    whh_fb = whh_fb_ref[...]                                    # (2H, 6H) bf16
    bhh_nf = jnp.broadcast_to(bhh_nf_ref[...], (B, H))
    bhh_nb = jnp.broadcast_to(bhh_nb_ref[...], (B, H))

    def gru_gates(gi_t, gh_t, h, bhh_n):
        # PyTorch gate order r, z, n.  r/z recurrent biases already folded into
        # gi_t; only the n-gate recurrent bias stays inside r * ( ... ).
        r = jax.nn.sigmoid(gi_t[:, :H] + gh_t[:, :H])
        z = jax.nn.sigmoid(gi_t[:, H:2 * H] + gh_t[:, H:2 * H])
        n = jnp.tanh(gi_t[:, 2 * H:] + r * (gh_t[:, 2 * H:] + bhh_n))
        return z * (h - n) + n            # == (1 - z) * n + z * h

    def gru_first(gi_t, bhh_n):
        # step 0 peeled: h0 == 0 -> gh == 0, no recurrent matmul needed
        r = jax.nn.sigmoid(gi_t[:, :H])
        z = jax.nn.sigmoid(gi_t[:, H:2 * H])
        n = jnp.tanh(gi_t[:, 2 * H:] + r * bhh_n)
        return n - z * n                  # == (1 - z) * n

    h_f = gru_first(gi_ref[0, :, pl.ds(0, G)].astype(jnp.float32), bhh_nf)
    h_b = gru_first(gi_ref[T - 1, :, pl.ds(G, G)].astype(jnp.float32), bhh_nb)
    rec_ref[0, :, pl.ds(0, H)] = h_f
    rec_ref[T - 1, :, pl.ds(H, H)] = h_b

    # ---- sequential recurrence: both directions share one K=2H matmul ----
    def body(t, carry):
        h_f, h_b = carry
        tb = T - 1 - t
        lhs = jnp.concatenate([h_f, h_b], axis=-1).astype(whh_fb.dtype)  # (B,2H)
        gh = jnp.dot(lhs, whh_fb, preferred_element_type=jnp.float32)    # (B,6H)
        h_f = gru_gates(gi_ref[t, :, pl.ds(0, G)].astype(jnp.float32),
                        gh[:, :G], h_f, bhh_nf)
        h_b = gru_gates(gi_ref[tb, :, pl.ds(G, G)].astype(jnp.float32),
                        gh[:, G:], h_b, bhh_nb)
        rec_ref[t, :, pl.ds(0, H)] = h_f
        rec_ref[tb, :, pl.ds(H, H)] = h_b
        return (h_f, h_b)

    _ = jax.lax.fori_loop(1, T, body, (h_f, h_b), unroll=True)

    # ---- fused head: one (T*B, 2H) @ (2H, Opad) matmul, lane-dense output ----
    rec2 = rec_ref[...].reshape(T * B, 2 * H).astype(wlin_ref.dtype)
    out = jnp.dot(rec2, wlin_ref[...],
                  preferred_element_type=jnp.float32) + blin_ref[...]
    out_ref[...] = out.reshape(T, B, -1).astype(out_ref.dtype)


def _fold_rz_bias(bih, bhh, H):
    """Fold r/z recurrent biases into the input-side bias (they sit outside the
    r*(...) term); keep the n-gate recurrent bias separate."""
    return bih + jnp.concatenate([bhh[:2 * H], jnp.zeros((H,), bhh.dtype)])


def _vmem_capacity_bytes(default=64 * 2 ** 20):
    """Generation-aware VMEM capacity (v7x: 64 MiB, v5e/v6e: 128 MiB)."""
    try:
        info = pltpu.get_tpu_info()
        return int(getattr(info, "vmem_capacity_bytes", default))
    except Exception:  # pragma: no cover - conservative fallback off-TPU
        return default


def bidirectional_gru(x, params, *, mxu_dtype=jnp.bfloat16):
    """x: (T, B, input_size) float32 -> (T, B, output_size) float32."""
    T, B, I = x.shape
    H = params["whh_f"].shape[1]
    G = 3 * H
    O = params["wlin"].shape[0]
    Opad = ((O + 127) // 128) * 128            # lane-dense output, sliced below

    # ---- plain-JAX glue: fuse / fold / pad / cast parameters ----
    wih_fb = jnp.concatenate([params["wih_f"].T, params["wih_b"].T],
                             axis=1).astype(mxu_dtype)                  # (I, 6H)
    bih_fb = jnp.concatenate(
        [_fold_rz_bias(params["bih_f"], params["bhh_f"], H),
         _fold_rz_bias(params["bih_b"], params["bhh_b"], H)])[None, :]  # (1, 6H)
    # block-diagonal recurrent weight: one K=2H dot per step drives both dirs
    whh_fb = jnp.zeros((2 * H, 2 * G), jnp.float32)
    whh_fb = whh_fb.at[:H, :G].set(params["whh_f"].T)
    whh_fb = whh_fb.at[H:, G:].set(params["whh_b"].T)
    whh_fb = whh_fb.astype(mxu_dtype)                                   # (2H,6H)
    bhh_nf = params["bhh_f"][2 * H:][None, :]                           # (1, H)
    bhh_nb = params["bhh_b"][2 * H:][None, :]                           # (1, H)
    wlin_p = jnp.zeros((2 * H, Opad), jnp.float32)
    wlin_p = wlin_p.at[:, :O].set(params["wlin"].T).astype(mxu_dtype)   # (2H,Op)
    blin_p = jnp.zeros((1, Opad), jnp.float32).at[0, :O].set(params["blin"])

    vmem = pl.BlockSpec(memory_space=pltpu.MemorySpace.VMEM)

    # rough VMEM budget (scratch + I/O, 2x headroom), clamped to chip capacity.
    scratch_bytes = 2 * T * B * 6 * H + 4 * T * B * 2 * H   # bf16 gi + fp32 rec
    io_bytes = int(x.size * 2 + wih_fb.size * 2 + bih_fb.size * 4
                   + whh_fb.size * 2 + 2 * bhh_nf.size * 4
                   + wlin_p.size * 2 + blin_p.size * 4 + T * B * Opad * 4)
    vmem_limit = int(min(0.9 * _vmem_capacity_bytes(),
                         max(32 * 2 ** 20, 2 * (scratch_bytes + io_bytes))))
    cost = pl.CostEstimate(
        flops=(2 * T * B * I * 6 * H                 # fused input projection
               + 2 * (T - 1) * B * 2 * H * 6 * H     # block-diag recurrence
               + 2 * T * B * 2 * H * Opad),          # head
        transcendentals=2 * T * 3 * B * H,           # 2 sigmoid + 1 tanh /dir/step
        bytes_accessed=io_bytes)

    out = pl.pallas_call(
        _bigru_kernel,
        out_shape=jax.ShapeDtypeStruct((T, B, Opad), jnp.float32),
        in_specs=[vmem] * 8,
        out_specs=vmem,
        scratch_shapes=[
            pltpu.VMEM((T, B, 6 * H), mxu_dtype),     # fused input projections
            pltpu.VMEM((T, B, 2 * H), jnp.float32),   # concat(fwd, bwd) states
        ],
        compiler_params=pltpu.CompilerParams(vmem_limit_bytes=vmem_limit),
        cost_estimate=cost,
    )(x.astype(mxu_dtype), wih_fb, bih_fb, whh_fb,
      bhh_nf, bhh_nb, wlin_p, blin_p)
    return out[:, :, :O]


# ---------------------------- pure-JAX reference ----------------------------
def _gru_dir_ref(x, wih, whh, bih, bhh, reverse):
    H = whh.shape[1]
    xs = x[::-1] if reverse else x

    def step(h, xt):
        gi = xt @ wih.T + bih
        gh = h @ whh.T + bhh
        r = jax.nn.sigmoid(gi[:, :H] + gh[:, :H])
        z = jax.nn.sigmoid(gi[:, H:2 * H] + gh[:, H:2 * H])
        n = jnp.tanh(gi[:, 2 * H:] + r * gh[:, 2 * H:])
        h = (1.0 - z) * n + z * h
        return h, h

    h0 = jnp.zeros((x.shape[1], H), jnp.float32)
    _, hs = jax.lax.scan(step, h0, xs)
    return hs[::-1] if reverse else hs


def model_ref(x, p):
    hf = _gru_dir_ref(x, p["wih_f"], p["whh_f"], p["bih_f"], p["bhh_f"], False)
    hb = _gru_dir_ref(x, p["wih_b"], p["whh_b"], p["bih_b"], p["bhh_b"], True)
    rec = jnp.concatenate([hf, hb], axis=-1)
    T, B, D = rec.shape
    out = rec.reshape(T * B, D) @ p["wlin"].T + p["blin"]
    return out.reshape(T, B, -1)


# --------------------------------- main --------------------------------------
def _init_params(key, input_size, hidden_size, output_size):
    H = hidden_size
    scale = 1.0 / jnp.sqrt(jnp.float32(H))
    ks = jax.random.split(key, 12)
    u = lambda k, shape: jax.random.uniform(k, shape, jnp.float32, -scale, scale)
    return {
        "wih_f": u(ks[0], (3 * H, input_size)),
        "whh_f": u(ks[1], (3 * H, H)),
        "bih_f": u(ks[2], (3 * H,)),
        "bhh_f": u(ks[3], (3 * H,)),
        "wih_b": u(ks[4], (3 * H, input_size)),
        "whh_b": u(ks[5], (3 * H, H)),
        "bih_b": u(ks[6], (3 * H,)),
        "bhh_b": u(ks[7], (3 * H,)),
        "wlin": u(ks[8], (output_size, 2 * H)),
        "blin": u(ks[9], (output_size,)),
    }


if __name__ == "__main__":
    # tile-friendly small shapes: B=8 (sublane aligned), H=128 (lane aligned)
    T, B, I, H, O = 8, 8, 16, 128, 10
    key = jax.random.PRNGKey(0)
    kx, kp = jax.random.split(key)
    x = jax.random.normal(kx, (T, B, I), jnp.float32)
    params = _init_params(kp, I, H, O)

    out = jax.block_until_ready(bidirectional_gru(x, params))
    ref = jax.block_until_ready(model_ref(x, params))

    assert out.shape == (T, B, O), out.shape
    err = float(jnp.max(jnp.abs(out - ref)))
    # bf16 MXU operands + bf16 gi storage with fp32 accumulation -> loose
    # but meaningful tolerance.
    assert err < 5e-2, err
    print("KERNEL_OK")
</pallas_src>

<mosaic_0001>
module attributes {stable_mosaic.version = 11 : i64} {
  func.func @_bigru_kernel(%arg0: memref<8x8x16xbf16, #tpu.memory_space<vmem>>, %arg1: memref<16x768xbf16, #tpu.memory_space<vmem>>, %arg2: memref<1x768xf32, #tpu.memory_space<vmem>>, %arg3: memref<256x768xbf16, #tpu.memory_space<vmem>>, %arg4: memref<1x128xf32, #tpu.memory_space<vmem>>, %arg5: memref<1x128xf32, #tpu.memory_space<vmem>>, %arg6: memref<256x128xbf16, #tpu.memory_space<vmem>>, %arg7: memref<1x128xf32, #tpu.memory_space<vmem>>, %arg8: memref<8x8x128xf32, #tpu.memory_space<vmem>>, %arg9: memref<8x8x768xbf16, #tpu.memory_space<vmem>>, %arg10: memref<8x8x256xf32, #tpu.memory_space<vmem>>) attributes {dimension_semantics = [], scalar_prefetch = 0 : i64, scratch_operands = 2 : i64, tpu.core_type = #tpu.core_type<tc>} {
    %c0 = arith.constant 0 : index
    %c0_0 = arith.constant 0 : index
    %c0_1 = arith.constant 0 : index
    %0 = vector.load %arg0[%c0, %c0_0, %c0_1] : memref<8x8x16xbf16, #tpu.memory_space<vmem>>, vector<8x8x16xbf16>
    %1 = vector.shape_cast %0 : vector<8x8x16xbf16> to vector<64x16xbf16>
    %c0_2 = arith.constant 0 : index
    %c0_3 = arith.constant 0 : index
    %2 = vector.load %arg1[%c0_2, %c0_3] : memref<16x768xbf16, #tpu.memory_space<vmem>>, vector<16x768xbf16>
    %cst = arith.constant dense<0.000000e+00> : vector<64x768xf32>
    %3 = tpu.matmul %1, %2, %cst {dimension_numbers = #tpu.dot_dimension_numbers<[1], [0], [0], [1], [0, 0, 1, 1], [], []>} : vector<64x16xbf16>, vector<16x768xbf16>, vector<64x768xf32> -> vector<64x768xf32>
    %c0_4 = arith.constant 0 : index
    %c0_5 = arith.constant 0 : index
    %4 = vector.load %arg2[%c0_4, %c0_5] : memref<1x768xf32, #tpu.memory_space<vmem>>, vector<1x768xf32>
    %5 = vector.broadcast %4 : vector<1x768xf32> to vector<64x768xf32>
    %6 = arith.addf %3, %5 : vector<64x768xf32>
    %7 = vector.shape_cast %6 : vector<64x768xf32> to vector<8x8x768xf32>
    %8 = arith.truncf %7 : vector<8x8x768xf32> to vector<8x8x768xbf16>
    %c0_6 = arith.constant 0 : index
    %c0_7 = arith.constant 0 : index
    %c0_8 = arith.constant 0 : index
    %9 = vector.load %arg9[%c0_6, %c0_7, %c0_8] : memref<8x8x768xbf16, #tpu.memory_space<vmem>>, vector<8x8x768xbf16>
    tpu.vector_store %arg9[%c0_6, %c0_7, %c0_8], %8 {strides = array<i32>} : memref<8x8x768xbf16, #tpu.memory_space<vmem>>, vector<8x8x768xbf16>,
    %c0_9 = arith.constant 0 : index
    %c0_10 = arith.constant 0 : index
    %10 = vector.load %arg3[%c0_9, %c0_10] : memref<256x768xbf16, #tpu.memory_space<vmem>>, vector<256x768xbf16>
    %c0_11 = arith.constant 0 : index
    %c0_12 = arith.constant 0 : index
    %11 = vector.load %arg4[%c0_11, %c0_12] : memref<1x128xf32, #tpu.memory_space<vmem>>, vector<1x128xf32>
    %12 = vector.shape_cast %11 : vector<1x128xf32> to vector<1x128xf32>
    %13 = vector.broadcast %12 : vector<1x128xf32> to vector<8x128xf32>
    %c0_13 = arith.constant 0 : index
    %c0_14 = arith.constant 0 : index
    %14 = vector.load %arg5[%c0_13, %c0_14] : memref<1x128xf32, #tpu.memory_space<vmem>>, vector<1x128xf32>
    %15 = vector.shape_cast %14 : vector<1x128xf32> to vector<1x128xf32>
    %16 = vector.broadcast %15 : vector<1x128xf32> to vector<8x128xf32>
    %c0_15 = arith.constant 0 : index
    %c0_16 = arith.constant 0 : index
    %c0_17 = arith.constant 0 : index
    %17 = vector.load %arg9[%c0_15, %c0_16, %c0_17] : memref<8x8x768xbf16, #tpu.memory_space<vmem>>, vector<1x8x384xbf16>
    %18 = vector.shape_cast %17 : vector<1x8x384xbf16> to vector<8x384xbf16>
    %19 = arith.extf %18 : vector<8x384xbf16> to vector<8x384xf32>
    %20 = vector.extract_strided_slice %19 {offsets = [0, 0], sizes = [8, 128], strides = [1, 1]} : vector<8x384xf32> to vector<8x128xf32>
    %21 = arith.negf %20 : vector<8x128xf32>
    %22 = math.exp %21 : vector<8x128xf32>
    %cst_18 = arith.constant 1.000000e+00 : f32
    %23 = vector.broadcast %cst_18 : f32 to vector<8x128xf32>
    %24 = arith.addf %23, %22 : vector<8x128xf32>
    %25 = arith.divf %23, %24 : vector<8x128xf32>
    %26 = vector.extract_strided_slice %19 {offsets = [0, 128], sizes = [8, 128], strides = [1, 1]} : vector<8x384xf32> to vector<8x128xf32>
    %27 = arith.negf %26 : vector<8x128xf32>
    %28 = math.exp %27 : vector<8x128xf32>
    %cst_19 = arith.constant 1.000000e+00 : f32
    %29 = vector.broadcast %cst_19 : f32 to vector<8x128xf32>
    %30 = arith.addf %29, %28 : vector<8x128xf32>
    %31 = arith.divf %29, %30 : vector<8x128xf32>
    %32 = vector.extract_strided_slice %19 {offsets = [0, 256], sizes = [8, 128], strides = [1, 1]} : vector<8x384xf32> to vector<8x128xf32>
    %33 = arith.mulf %25, %13 : vector<8x128xf32>
    %34 = arith.addf %32, %33 : vector<8x128xf32>
    %35 = math.tanh %34 : vector<8x128xf32>
    %36 = arith.mulf %31, %35 : vector<8x128xf32>
    %37 = arith.subf %35, %36 : vector<8x128xf32>
    %c7 = arith.constant 7 : index
    %c0_20 = arith.constant 0 : index
    %c384 = arith.constant 384 : index
    %38 = vector.load %arg9[%c7, %c0_20, %c384] : memref<8x8x768xbf16, #tpu.memory_space<vmem>>, vector<1x8x384xbf16>
    %39 = vector.shape_cast %38 : vector<1x8x384xbf16> to vector<8x384xbf16>
    %40 = arith.extf %39 : vector<8x384xbf16> to vector<8x384xf32>
    %41 = vector.extract_strided_slice %40 {offsets = [0, 0], sizes = [8, 128], strides = [1, 1]} : vector<8x384xf32> to vector<8x128xf32>
    %42 = arith.negf %41 : vector<8x128xf32>
    %43 = math.exp %42 : vector<8x128xf32>
    %cst_21 = arith.constant 1.000000e+00 : f32
    %44 = vector.broadcast %cst_21 : f32 to vector<8x128xf32>
    %45 = arith.addf %44, %43 : vector<8x128xf32>
    %46 = arith.divf %44, %45 : vector<8x128xf32>
    %47 = vector.extract_strided_slice %40 {offsets = [0, 128], sizes = [8, 128], strides = [1, 1]} : vector<8x384xf32> to vector<8x128xf32>
    %48 = arith.negf %47 : vector<8x128xf32>
    %49 = math.exp %48 : vector<8x128xf32>
    %cst_22 = arith.constant 1.000000e+00 : f32
    %50 = vector.broadcast %cst_22 : f32 to vector<8x128xf32>
    %51 = arith.addf %50, %49 : vector<8x128xf32>
    %52 = arith.divf %50, %51 : vector<8x128xf32>
    %53 = vector.extract_strided_slice %40 {offsets = [0, 256], sizes = [8, 128], strides = [1, 1]} : vector<8x384xf32> to vector<8x128xf32>
    %54 = arith.mulf %46, %16 : vector<8x128xf32>
    %55 = arith.addf %53, %54 : vector<8x128xf32>
    %56 = math.tanh %55 : vector<8x128xf32>
    %57 = arith.mulf %52, %56 : vector<8x128xf32>
    %58 = arith.subf %56, %57 : vector<8x128xf32>
    %c0_23 = arith.constant 0 : index
    %c0_24 = arith.constant 0 : index
    %c0_25 = arith.constant 0 : index
    %59 = vector.load %arg10[%c0_23, %c0_24, %c0_25] : memref<8x8x256xf32, #tpu.memory_space<vmem>>, vector<1x8x128xf32>
    %60 = vector.shape_cast %59 : vector<1x8x128xf32> to vector<8x128xf32>
    %61 = vector.shape_cast %37 : vector<8x128xf32> to vector<1x8x128xf32>
    tpu.vector_store %arg10[%c0_23, %c0_24, %c0_25], %61 {strides = array<i32>} : memref<8x8x256xf32, #tpu.memory_space<vmem>>, vector<1x8x128xf32>,
    %c7_26 = arith.constant 7 : index
    %c0_27 = arith.constant 0 : index
    %c128 = arith.constant 128 : index
    %62 = vector.load %arg10[%c7_26, %c0_27, %c128] : memref<8x8x256xf32, #tpu.memory_space<vmem>>, vector<1x8x128xf32>
    %63 = vector.shape_cast %62 : vector<1x8x128xf32> to vector<8x128xf32>
    %64 = vector.shape_cast %58 : vector<8x128xf32> to vector<1x8x128xf32>
    tpu.vector_store %arg10[%c7_26, %c0_27, %c128], %64 {strides = array<i32>} : memref<8x8x256xf32, #tpu.memory_space<vmem>>, vector<1x8x128xf32>,
    %c1_i32 = arith.constant 1 : i32
    %c7_i32 = arith.constant 7 : i32
    %65 = arith.subi %c7_i32, %c1_i32 : i32
    %66 = tpu.concatenate %37, %58 in 1 : vector<8x128xf32>, vector<8x128xf32> -> vector<8x256xf32>
    %67 = arith.truncf %66 : vector<8x256xf32> to vector<8x256xbf16>
    %cst_28 = arith.constant dense<0.000000e+00> : vector<8x768xf32>
    %68 = tpu.matmul %67, %10, %cst_28 {dimension_numbers = #tpu.dot_dimension_numbers<[1], [0], [0], [1], [0, 0, 1, 1], [], []>} : vector<8x256xbf16>, vector<256x768xbf16>, vector<8x768xf32> -> vector<8x768xf32>
    %69 = arith.index_cast %c1_i32 : i32 to index
    %c0_29 = arith.constant 0 : index
    %c0_30 = arith.constant 0 : index
    %70 = vector.load %arg9[%69, %c0_29, %c0_30] : memref<8x8x768xbf16, #tpu.memory_space<vmem>>, vector<1x8x384xbf16>
    %71 = vector.shape_cast %70 : vector<1x8x384xbf16> to vector<8x384xbf16>
    %72 = arith.extf %71 : vector<8x384xbf16> to vector<8x384xf32>
    %73 = vector.extract_strided_slice %68 {offsets = [0, 0], sizes = [8, 384], strides = [1, 1]} : vector<8x768xf32> to vector<8x384xf32>
    %74 = vector.extract_strided_slice %72 {offsets = [0, 0], sizes = [8, 128], strides = [1, 1]} : vector<8x384xf32> to vector<8x128xf32>
    %75 = vector.extract_strided_slice %73 {offsets = [0, 0], sizes = [8, 128], strides = [1, 1]} : vector<8x384xf32> to vector<8x128xf32>
    %76 = arith.addf %74, %75 : vector<8x128xf32>
    %77 = arith.negf %76 : vector<8x128xf32>
    %78 = math.exp %77 : vector<8x128xf32>
    %cst_31 = arith.constant 1.000000e+00 : f32
    %79 = vector.broadcast %cst_31 : f32 to vector<8x128xf32>
    %80 = arith.addf %79, %78 : vector<8x128xf32>
    %81 = arith.divf %79, %80 : vector<8x128xf32>
    %82 = vector.extract_strided_slice %72 {offsets = [0, 128], sizes = [8, 128], strides = [1, 1]} : vector<8x384xf32> to vector<8x128xf32>
    %83 = vector.extract_strided_slice %73 {offsets = [0, 128], sizes = [8, 128], strides = [1, 1]} : vector<8x384xf32> to vector<8x128xf32>
    %84 = arith.addf %82, %83 : vector<8x128xf32>
    %85 = arith.negf %84 : vector<8x128xf32>
    %86 = math.exp %85 : vector<8x128xf32>
    %cst_32 = arith.constant 1.000000e+00 : f32
    %87 = vector.broadcast %cst_32 : f32 to vector<8x128xf32>
    %88 = arith.addf %87, %86 : vector<8x128xf32>
    %89 = arith.divf %87, %88 : vector<8x128xf32>
    %90 = vector.extract_strided_slice %72 {offsets = [0, 256], sizes = [8, 128], strides = [1, 1]} : vector<8x384xf32> to vector<8x128xf32>
    %91 = vector.extract_strided_slice %73 {offsets = [0, 256], sizes = [8, 128], strides = [1, 1]} : vector<8x384xf32> to vector<8x128xf32>
    %92 = arith.addf %91, %13 : vector<8x128xf32>
    %93 = arith.mulf %81, %92 : vector<8x128xf32>
    %94 = arith.addf %90, %93 : vector<8x128xf32>
    %95 = math.tanh %94 : vector<8x128xf32>
    %96 = arith.subf %37, %95 : vector<8x128xf32>
    %97 = arith.mulf %89, %96 : vector<8x128xf32>
    %98 = arith.addf %97, %95 : vector<8x128xf32>
    %99 = arith.index_cast %65 : i32 to index
    %c0_33 = arith.constant 0 : index
    %c384_34 = arith.constant 384 : index
    %100 = vector.load %arg9[%99, %c0_33, %c384_34] : memref<8x8x768xbf16, #tpu.memory_space<vmem>>, vector<1x8x384xbf16>
    %101 = vector.shape_cast %100 : vector<1x8x384xbf16> to vector<8x384xbf16>
    %102 = arith.extf %101 : vector<8x384xbf16> to vector<8x384xf32>
    %103 = vector.extract_strided_slice %68 {offsets = [0, 384], sizes = [8, 384], strides = [1, 1]} : vector<8x768xf32> to vector<8x384xf32>
    %104 = vector.extract_strided_slice %102 {offsets = [0, 0], sizes = [8, 128], strides = [1, 1]} : vector<8x384xf32> to vector<8x128xf32>
    %105 = vector.extract_strided_slice %103 {offsets = [0, 0], sizes = [8, 128], strides = [1, 1]} : vector<8x384xf32> to vector<8x128xf32>
    %106 = arith.addf %104, %105 : vector<8x128xf32>
    %107 = arith.negf %106 : vector<8x128xf32>
    %108 = math.exp %107 : vector<8x128xf32>
    %cst_35 = arith.constant 1.000000e+00 : f32
    %109 = vector.broadcast %cst_35 : f32 to vector<8x128xf32>
    %110 = arith.addf %109, %108 : vector<8x128xf32>
    %111 = arith.divf %109, %110 : vector<8x128xf32>
    %112 = vector.extract_strided_slice %102 {offsets = [0, 128], sizes = [8, 128], strides = [1, 1]} : vector<8x384xf32> to vector<8x128xf32>
    %113 = vector.extract_strided_slice %103 {offsets = [0, 128], sizes = [8, 128], strides = [1, 1]} : vector<8x384xf32> to vector<8x128xf32>
    %114 = arith.addf %112, %113 : vector<8x128xf32>
    %115 = arith.negf %114 : vector<8x128xf32>
    %116 = math.exp %115 : vector<8x128xf32>
    %cst_36 = arith.constant 1.000000e+00 : f32
    %117 = vector.broadcast %cst_36 : f32 to vector<8x128xf32>
    %118 = arith.addf %117, %116 : vector<8x128xf32>
    %119 = arith.divf %117, %118 : vector<8x128xf32>
    %120 = vector.extract_strided_slice %102 {offsets = [0, 256], sizes = [8, 128], strides = [1, 1]} : vector<8x384xf32> to vector<8x128xf32>
    %121 = vector.extract_strided_slice %103 {offsets = [0, 256], sizes = [8, 128], strides = [1, 1]} : vector<8x384xf32> to vector<8x128xf32>
    %122 = arith.addf %121, %16 : vector<8x128xf32>
    %123 = arith.mulf %111, %122 : vector<8x128xf32>
    %124 = arith.addf %120, %123 : vector<8x128xf32>
    %125 = math.tanh %124 : vector<8x128xf32>
    %126 = arith.subf %58, %125 : vector<8x128xf32>
    %127 = arith.mulf %119, %126 : vector<8x128xf32>
    %128 = arith.addf %127, %125 : vector<8x128xf32>
    %129 = arith.index_cast %c1_i32 : i32 to index
    %c0_37 = arith.constant 0 : index
    %c0_38 = arith.constant 0 : index
    %130 = vector.load %arg10[%129, %c0_37, %c0_38] : memref<8x8x256xf32, #tpu.memory_space<vmem>>, vector<1x8x128xf32>
    %131 = vector.shape_cast %130 : vector<1x8x128xf32> to vector<8x128xf32>
    %132 = vector.shape_cast %98 : vector<8x128xf32> to vector<1x8x128xf32>
    tpu.vector_store %arg10[%129, %c0_37, %c0_38], %132 {strides = array<i32>} : memref<8x8x256xf32, #tpu.memory_space<vmem>>, vector<1x8x128xf32>,
    %133 = arith.index_cast %65 : i32 to index
    %c0_39 = arith.constant 0 : index
    %c128_40 = arith.constant 128 : index
    %134 = vector.load %arg10[%133, %c0_39, %c128_40] : memref<8x8x256xf32, #tpu.memory_space<vmem>>, vector<1x8x128xf32>
    %135 = vector.shape_cast %134 : vector<1x8x128xf32> to vector<8x128xf32>
    %136 = vector.shape_cast %128 : vector<8x128xf32> to vector<1x8x128xf32>
    tpu.vector_store %arg10[%133, %c0_39, %c128_40], %136 {strides = array<i32>} : memref<8x8x256xf32, #tpu.memory_space<vmem>>, vector<1x8x128xf32>,
    %c2_i32 = arith.constant 2 : i32
    %c7_i32_41 = arith.constant 7 : i32
    %137 = arith.subi %c7_i32_41, %c2_i32 : i32
    %138 = tpu.concatenate %98, %128 in 1 : vector<8x128xf32>, vector<8x128xf32> -> vector<8x256xf32>
    %139 = arith.truncf %138 : vector<8x256xf32> to vector<8x256xbf16>
    %cst_42 = arith.constant dense<0.000000e+00> : vector<8x768xf32>
    %140 = tpu.matmul %139, %10, %cst_42 {dimension_numbers = #tpu.dot_dimension_numbers<[1], [0], [0], [1], [0, 0, 1, 1], [], []>} : vector<8x256xbf16>, vector<256x768xbf16>, vector<8x768xf32> -> vector<8x768xf32>
    %141 = arith.index_cast %c2_i32 : i32 to index
    %c0_43 = arith.constant 0 : index
    %c0_44 = arith.constant 0 : index
    %142 = vector.load %arg9[%141, %c0_43, %c0_44] : memref<8x8x768xbf16, #tpu.memory_space<vmem>>, vector<1x8x384xbf16>
    %143 = vector.shape_cast %142 : vector<1x8x384xbf16> to vector<8x384xbf16>
    %144 = arith.extf %143 : vector<8x384xbf16> to vector<8x384xf32>
    %145 = vector.extract_strided_slice %140 {offsets = [0, 0], sizes = [8, 384], strides = [1, 1]} : vector<8x768xf32> to vector<8x384xf32>
    %146 = vector.extract_strided_slice %144 {offsets = [0, 0], sizes = [8, 128], strides = [1, 1]} : vector<8x384xf32> to vector<8x128xf32>
    %147 = vector.extract_strided_slice %145 {offsets = [0, 0], sizes = [8, 128], strides = [1, 1]} : vector<8x384xf32> to vector<8x128xf32>
    %148 = arith.addf %146, %147 : vector<8x128xf32>
    %149 = arith.negf %148 : vector<8x128xf32>
    %150 = math.exp %149 : vector<8x128xf32>
    %cst_45 = arith.constant 1.000000e+00 : f32
    %151 = vector.broadcast %cst_45 : f32 to vector<8x128xf32>
    %152 = arith.addf %151, %150 : vector<8x128xf32>
    %153 = arith.divf %151, %152 : vector<8x128xf32>
    %154 = vector.extract_strided_slice %144 {offsets = [0, 128], sizes = [8, 128], strides = [1, 1]} : vector<8x384xf32> to vector<8x128xf32>
    %155 = vector.extract_strided_slice %145 {offsets = [0, 128], sizes = [8, 128], strides = [1, 1]} : vector<8x384xf32> to vector<8x128xf32>
    %156 = arith.addf %154, %155 : vector<8x128xf32>
    %157 = arith.negf %156 : vector<8x128xf32>
    %158 = math.exp %157 : vector<8x128xf32>
    %cst_46 = arith.constant 1.000000e+00 : f32
    %159 = vector.broadcast %cst_46 : f32 to vector<8x128xf32>
    %160 = arith.addf %159, %158 : vector<8x128xf32>
    %161 = arith.divf %159, %160 : vector<8x128xf32>
    %162 = vector.extract_strided_slice %144 {offsets = [0, 256], sizes = [8, 128], strides = [1, 1]} : vector<8x384xf32> to vector<8x128xf32>
    %163 = vector.extract_strided_slice %145 {offsets = [0, 256], sizes = [8, 128], strides = [1, 1]} : vector<8x384xf32> to vector<8x128xf32>
    %164 = arith.addf %163, %13 : vector<8x128xf32>
    %165 = arith.mulf %153, %164 : vector<8x128xf32>
    %166 = arith.addf %162, %165 : vector<8x128xf32>
    %167 = math.tanh %166 : vector<8x128xf32>
    %168 = arith.subf %98, %167 : vector<8x128xf32>
    %169 = arith.mulf %161, %168 : vector<8x128xf32>
    %170 = arith.addf %169, %167 : vector<8x128xf32>
    %171 = arith.index_cast %137 : i32 to index
    %c0_47 = arith.constant 0 : index
    %c384_48 = arith.constant 384 : index
    %172 = vector.load %arg9[%171, %c0_47, %c384_48] : memref<8x8x768xbf16, #tpu.memory_space<vmem>>, vector<1x8x384xbf16>
    %173 = vector.shape_cast %172 : vector<1x8x384xbf16> to vector<8x384xbf16>
    %174 = arith.extf %173 : vector<8x384xbf16> to vector<8x384xf32>
    %175 = vector.extract_strided_slice %140 {offsets = [0, 384], sizes = [8, 384], strides = [1, 1]} : vector<8x768xf32> to vector<8x384xf32>
    %176 = vector.extract_strided_slice %174 {offsets = [0, 0], sizes = [8, 128], strides = [1, 1]} : vector<8x384xf32> to vector<8x128xf32>
    %177 = vector.extract_strided_slice %175 {offsets = [0, 0], sizes = [8, 128], strides = [1, 1]} : vector<8x384xf32> to vector<8x128xf32>
    %178 = arith.addf %176, %177 : vector<8x128xf32>
    %179 = arith.negf %178 : vector<8x128xf32>
    %180 = math.exp %179 : vector<8x128xf32>
    %cst_49 = arith.constant 1.000000e+00 : f32
    %181 = vector.broadcast %cst_49 : f32 to vector<8x128xf32>
    %182 = arith.addf %181, %180 : vector<8x128xf32>
    %183 = arith.divf %181, %182 : vector<8x128xf32>
    %184 = vector.extract_strided_slice %174 {offsets = [0, 128], sizes = [8, 128], strides = [1, 1]} : vector<8x384xf32> to vector<8x128xf32>
    %185 = vector.extract_strided_slice %175 {offsets = [0, 128], sizes = [8, 128], strides = [1, 1]} : vector<8x384xf32> to vector<8x128xf32>
    %186 = arith.addf %184, %185 : vector<8x128xf32>
    %187 = arith.negf %186 : vector<8x128xf32>
    %188 = math.exp %187 : vector<8x128xf32>
    %cst_50 = arith.constant 1.000000e+00 : f32
    %189 = vector.broadcast %cst_50 : f32 to vector<8x128xf32>
    %190 = arith.addf %189, %188 : vector<8x128xf32>
    %191 = arith.divf %189, %190 : vector<8x128xf32>
    %192 = vector.extract_strided_slice %174 {offsets = [0, 256], sizes = [8, 128], strides = [1, 1]} : vector<8x384xf32> to vector<8x128xf32>
    %193 = vector.extract_strided_slice %175 {offsets = [0, 256], sizes = [8, 128], strides = [1, 1]} : vector<8x384xf32> to vector<8x128xf32>
    %194 = arith.addf %193, %16 : vector<8x128xf32>
    %195 = arith.mulf %183, %194 : vector<8x128xf32>
    %196 = arith.addf %192, %195 : vector<8x128xf32>
    %197 = math.tanh %196 : vector<8x128xf32>
    %198 = arith.subf %128, %197 : vector<8x128xf32>
    %199 = arith.mulf %191, %198 : vector<8x128xf32>
    %200 = arith.addf %199, %197 : vector<8x128xf32>
    %201 = arith.index_cast %c2_i32 : i32 to index
    %c0_51 = arith.constant 0 : index
    %c0_52 = arith.constant 0 : index
    %202 = vector.load %arg10[%201, %c0_51, %c0_52] : memref<8x8x256xf32, #tpu.memory_space<vmem>>, vector<1x8x128xf32>
    %203 = vector.shape_cast %202 : vector<1x8x128xf32> to vector<8x128xf32>
    %204 = vector.shape_cast %170 : vector<8x128xf32> to vector<1x8x128xf32>
    tpu.vector_store %arg10[%201, %c0_51, %c0_52], %204 {strides = array<i32>} : memref<8x8x256xf32, #tpu.memory_space<vmem>>, vector<1x8x128xf32>,
    %205 = arith.index_cast %137 : i32 to index
    %c0_53 = arith.constant 0 : index
    %c128_54 = arith.constant 128 : index
    %206 = vector.load %arg10[%205, %c0_53, %c128_54] : memref<8x8x256xf32, #tpu.memory_space<vmem>>, vector<1x8x128xf32>
    %207 = vector.shape_cast %206 : vector<1x8x128xf32> to vector<8x128xf32>
    %208 = vector.shape_cast %200 : vector<8x128xf32> to vector<1x8x128xf32>
    tpu.vector_store %arg10[%205, %c0_53, %c128_54], %208 {strides = array<i32>} : memref<8x8x256xf32, #tpu.memory_space<vmem>>, vector<1x8x128xf32>,
    %c3_i32 = arith.constant 3 : i32
    %c7_i32_55 = arith.constant 7 : i32
    %209 = arith.subi %c7_i32_55, %c3_i32 : i32
    %210 = tpu.concatenate %170, %200 in 1 : vector<8x128xf32>, vector<8x128xf32> -> vector<8x256xf32>
    %211 = arith.truncf %210 : vector<8x256xf32> to vector<8x256xbf16>
    %cst_56 = arith.constant dense<0.000000e+00> : vector<8x768xf32>
    %212 = tpu.matmul %211, %10, %cst_56 {dimension_numbers = #tpu.dot_dimension_numbers<[1], [0], [0], [1], [0, 0, 1, 1], [], []>} : vector<8x256xbf16>, vector<256x768xbf16>, vector<8x768xf32> -> vector<8x768xf32>
    %213 = arith.index_cast %c3_i32 : i32 to index
    %c0_57 = arith.constant 0 : index
    %c0_58 = arith.constant 0 : index
    %214 = vector.load %arg9[%213, %c0_57, %c0_58] : memref<8x8x768xbf16, #tpu.memory_space<vmem>>, vector<1x8x384xbf16>
    %215 = vector.shape_cast %214 : vector<1x8x384xbf16> to vector<8x384xbf16>
    %216 = arith.extf %215 : vector<8x384xbf16> to vector<8x384xf32>
    %217 = vector.extract_strided_slice %212 {offsets = [0, 0], sizes = [8, 384], strides = [1, 1]} : vector<8x768xf32> to vector<8x384xf32>
    %218 = vector.extract_strided_slice %216 {offsets = [0, 0], sizes = [8, 128], strides = [1, 1]} : vector<8x384xf32> to vector<8x128xf32>
    %219 = vector.extract_strided_slice %217 {offsets = [0, 0], sizes = [8, 128], strides = [1, 1]} : vector<8x384xf32> to vector<8x128xf32>
    %220 = arith.addf %218, %219 : vector<8x128xf32>
    %221 = arith.negf %220 : vector<8x128xf32>
    %222 = math.exp %221 : vector<8x128xf32>
    %cst_59 = arith.constant 1.000000e+00 : f32
    %223 = vector.broadcast %cst_59 : f32 to vector<8x128xf32>
    %224 = arith.addf %223, %222 : vector<8x128xf32>
    %225 = arith.divf %223, %224 : vector<8x128xf32>
    %226 = vector.extract_strided_slice %216 {offsets = [0, 128], sizes = [8, 128], strides = [1, 1]} : vector<8x384xf32> to vector<8x128xf32>
    %227 = vector.extract_strided_slice %217 {offsets = [0, 128], sizes = [8, 128], strides = [1, 1]} : vector<8x384xf32> to vector<8x128xf32>
    %228 = arith.addf %226, %227 : vector<8x128xf32>
    %229 = arith.negf %228 : vector<8x128xf32>
    %230 = math.exp %229 : vector<8x128xf32>
    %cst_60 = arith.constant 1.000000e+00 : f32
    %231 = vector.broadcast %cst_60 : f32 to vector<8x128xf32>
    %232 = arith.addf %231, %230 : vector<8x128xf32>
    %233 = arith.divf %231, %232 : vector<8x128xf32>
    %234 = vector.extract_strided_slice %216 {offsets = [0, 256], sizes = [8, 128], strides = [1, 1]} : vector<8x384xf32> to vector<8x128xf32>
    %235 = vector.extract_strided_slice %217 {offsets = [0, 256], sizes = [8, 128], strides = [1, 1]} : vector<8x384xf32> to vector<8x128xf32>
    %236 = arith.addf %235, %13 : vector<8x128xf32>
    %237 = arith.mulf %225, %236 : vector<8x128xf32>
    %238 = arith.addf %234, %237 : vector<8x128xf32>
    %239 = math.tanh %238 : vector<8x128xf32>
    %240 = arith.subf %170, %239 : vector<8x128xf32>
    %241 = arith.mulf %233, %240 : vector<8x128xf32>
    %242 = arith.addf %241, %239 : vector<8x128xf32>
    %243 = arith.index_cast %209 : i32 to index
    %c0_61 = arith.constant 0 : index
    %c384_62 = arith.constant 384 : index
    %244 = vector.load %arg9[%243, %c0_61, %c384_62] : memref<8x8x768xbf16, #tpu.memory_space<vmem>>, vector<1x8x384xbf16>
    %245 = vector.shape_cast %244 : vector<1x8x384xbf16> to vector<8x384xbf16>
    %246 = arith.extf %245 : vector<8x384xbf16> to vector<8x384xf32>
    %247 = vector.extract_strided_slice %212 {offsets = [0, 384], sizes = [8, 384], strides = [1, 1]} : vector<8x768xf32> to vector<8x384xf32>
    %248 = vector.extract_strided_slice %246 {offsets = [0, 0], sizes = [8, 128], strides = [1, 1]} : vector<8x384xf32> to vector<8x128xf32>
    %249 = vector.extract_strided_slice %247 {offsets = [0, 0], sizes = [8, 128], strides = [1, 1]} : vector<8x384xf32> to vector<8x128xf32>
    %250 = arith.addf %248, %249 : vector<8x128xf32>
    %251 = arith.negf %250 : vector<8x128xf32>
    %252 = math.exp %251 : vector<8x128xf32>
    %cst_63 = arith.constant 1.000000e+00 : f32
    %253 = vector.broadcast %cst_63 : f32 to vector<8x128xf32>
    %254 = arith.addf %253, %252 : vector<8x128xf32>
    %255 = arith.divf %253, %254 : vector<8x128xf32>
    %256 = vector.extract_strided_slice %246 {offsets = [0, 128], sizes = [8, 128], strides = [1, 1]} : vector<8x384xf32> to vector<8x128xf32>
    %257 = vector.extract_strided_slice %247 {offsets = [0, 128], sizes = [8, 128], strides = [1, 1]} : vector<8x384xf32> to vector<8x128xf32>
    %258 = arith.addf %256, %257 : vector<8x128xf32>
    %259 = arith.negf %258 : vector<8x128xf32>
    %260 = math.exp %259 : vector<8x128xf32>
    %cst_64 = arith.constant 1.000000e+00 : f32
    %261 = vector.broadcast %cst_64 : f32 to vector<8x128xf32>
    %262 = arith.addf %261, %260 : vector<8x128xf32>
    %263 = arith.divf %261, %262 : vector<8x128xf32>
    %264 = vector.extract_strided_slice %246 {offsets = [0, 256], sizes = [8, 128], strides = [1, 1]} : vector<8x384xf32> to vector<8x128xf32>
    %265 = vector.extract_strided_slice %247 {offsets = [0, 256], sizes = [8, 128], strides = [1, 1]} : vector<8x384xf32> to vector<8x128xf32>
    %266 = arith.addf %265, %16 : vector<8x128xf32>
    %267 = arith.mulf %255, %266 : vector<8x128xf32>
    %268 = arith.addf %264, %267 : vector<8x128xf32>
    %269 = math.tanh %268 : vector<8x128xf32>
    %270 = arith.subf %200, %269 : vector<8x128xf32>
    %271 = arith.mulf %263, %270 : vector<8x128xf32>
    %272 = arith.addf %271, %269 : vector<8x128xf32>
    %273 = arith.index_cast %c3_i32 : i32 to index
    %c0_65 = arith.constant 0 : index
    %c0_66 = arith.constant 0 : index
    %274 = vector.load %arg10[%273, %c0_65, %c0_66] : memref<8x8x256xf32, #tpu.memory_space<vmem>>, vector<1x8x128xf32>
    %275 = vector.shape_cast %274 : vector<1x8x128xf32> to vector<8x128xf32>
    %276 = vector.shape_cast %242 : vector<8x128xf32> to vector<1x8x128xf32>
    tpu.vector_store %arg10[%273, %c0_65, %c0_66], %276 {strides = array<i32>} : memref<8x8x256xf32, #tpu.memory_space<vmem>>, vector<1x8x128xf32>,
    %277 = arith.index_cast %209 : i32 to index
    %c0_67 = arith.constant 0 : index
    %c128_68 = arith.constant 128 : index
    %278 = vector.load %arg10[%277, %c0_67, %c128_68] : memref<8x8x256xf32, #tpu.memory_space<vmem>>, vector<1x8x128xf32>
    %279 = vector.shape_cast %278 : vector<1x8x128xf32> to vector<8x128xf32>
    %280 = vector.shape_cast %272 : vector<8x128xf32> to vector<1x8x128xf32>
    tpu.vector_store %arg10[%277, %c0_67, %c128_68], %280 {strides = array<i32>} : memref<8x8x256xf32, #tpu.memory_space<vmem>>, vector<1x8x128xf32>,
    %c4_i32 = arith.constant 4 : i32
    %c7_i32_69 = arith.constant 7 : i32
    %281 = arith.subi %c7_i32_69, %c4_i32 : i32
    %282 = tpu.concatenate %242, %272 in 1 : vector<8x128xf32>, vector<8x128xf32> -> vector<8x256xf32>
    %283 = arith.truncf %282 : vector<8x256xf32> to vector<8x256xbf16>
    %cst_70 = arith.constant dense<0.000000e+00> : vector<8x768xf32>
    %284 = tpu.matmul %283, %10, %cst_70 {dimension_numbers = #tpu.dot_dimension_numbers<[1], [0], [0], [1], [0, 0, 1, 1], [], []>} : vector<8x256xbf16>, vector<256x768xbf16>, vector<8x768xf32> -> vector<8x768xf32>
    %285 = arith.index_cast %c4_i32 : i32 to index
    %c0_71 = arith.constant 0 : index
    %c0_72 = arith.constant 0 : index
    %286 = vector.load %arg9[%285, %c0_71, %c0_72] : memref<8x8x768xbf16, #tpu.memory_space<vmem>>, vector<1x8x384xbf16>
    %287 = vector.shape_cast %286 : vector<1x8x384xbf16> to vector<8x384xbf16>
    %288 = arith.extf %287 : vector<8x384xbf16> to vector<8x384xf32>
    %289 = vector.extract_strided_slice %284 {offsets = [0, 0], sizes = [8, 384], strides = [1, 1]} : vector<8x768xf32> to vector<8x384xf32>
    %290 = vector.extract_strided_slice %288 {offsets = [0, 0], sizes = [8, 128], strides = [1, 1]} : vector<8x384xf32> to vector<8x128xf32>
    %291 = vector.extract_strided_slice %289 {offsets = [0, 0], sizes = [8, 128], strides = [1, 1]} : vector<8x384xf32> to vector<8x128xf32>
    %292 = arith.addf %290, %291 : vector<8x128xf32>
    %293 = arith.negf %292 : vector<8x128xf32>
    %294 = math.exp %293 : vector<8x128xf32>
    %cst_73 = arith.constant 1.000000e+00 : f32
    %295 = vector.broadcast %cst_73 : f32 to vector<8x128xf32>
    %296 = arith.addf %295, %294 : vector<8x128xf32>
    %297 = arith.divf %295, %296 : vector<8x128xf32>
    %298 = vector.extract_strided_slice %288 {offsets = [0, 128], sizes = [8, 128], strides = [1, 1]} : vector<8x384xf32> to vector<8x128xf32>
    %299 = vector.extract_strided_slice %289 {offsets = [0, 128], sizes = [8, 128], strides = [1, 1]} : vector<8x384xf32> to vector<8x128xf32>
    %300 = arith.addf %298, %299 : vector<8x128xf32>
    %301 = arith.negf %300 : vector<8x128xf32>
    %302 = math.exp %301 : vector<8x128xf32>
    %cst_74 = arith.constant 1.000000e+00 : f32
    %303 = vector.broadcast %cst_74 : f32 to vector<8x128xf32>
    %304 = arith.addf %303, %302 : vector<8x128xf32>
    %305 = arith.divf %303, %304 : vector<8x128xf32>
    %306 = vector.extract_strided_slice %288 {offsets = [0, 256], sizes = [8, 128], strides = [1, 1]} : vector<8x384xf32> to vector<8x128xf32>
    %307 = vector.extract_strided_slice %289 {offsets = [0, 256], sizes = [8, 128], strides = [1, 1]} : vector<8x384xf32> to vector<8x128xf32>
    %308 = arith.addf %307, %13 : vector<8x128xf32>
    %309 = arith.mulf %297, %308 : vector<8x128xf32>
    %310 = arith.addf %306, %309 : vector<8x128xf32>
    %311 = math.tanh %310 : vector<8x128xf32>
    %312 = arith.subf %242, %311 : vector<8x128xf32>
    %313 = arith.mulf %305, %312 : vector<8x128xf32>
    %314 = arith.addf %313, %311 : vector<8x128xf32>
    %315 = arith.index_cast %281 : i32 to index
    %c0_75 = arith.constant 0 : index
    %c384_76 = arith.constant 384 : index
    %316 = vector.load %arg9[%315, %c0_75, %c384_76] : memref<8x8x768xbf16, #tpu.memory_space<vmem>>, vector<1x8x384xbf16>
    %317 = vector.shape_cast %316 : vector<1x8x384xbf16> to vector<8x384xbf16>
    %318 = arith.extf %317 : vector<8x384xbf16> to vector<8x384xf32>
    %319 = vector.extract_strided_slice %284 {offsets = [0, 384], sizes = [8, 384], strides = [1, 1]} : vector<8x768xf32> to vector<8x384xf32>
    %320 = vector.extract_strided_slice %318 {offsets = [0, 0], sizes = [8, 128], strides = [1, 1]} : vector<8x384xf32> to vector<8x128xf32>
    %321 = vector.extract_strided_slice %319 {offsets = [0, 0], sizes = [8, 128], strides = [1, 1]} : vector<8x384xf32> to vector<8x128xf32>
    %322 = arith.addf %320, %321 : vector<8x128xf32>
    %323 = arith.negf %322 : vector<8x128xf32>
    %324 = math.exp %323 : vector<8x128xf32>
    %cst_77 = arith.constant 1.000000e+00 : f32
    %325 = vector.broadcast %cst_77 : f32 to vector<8x128xf32>
    %326 = arith.addf %325, %324 : vector<8x128xf32>
    %327 = arith.divf %325, %326 : vector<8x128xf32>
    %328 = vector.extract_strided_slice %318 {offsets = [0, 128], sizes = [8, 128], strides = [1, 1]} : vector<8x384xf32> to vector<8x128xf32>
    %329 = vector.extract_strided_slice %319 {offsets = [0, 128], sizes = [8, 128], strides = [1, 1]} : vector<8x384xf32> to vector<8x128xf32>
    %330 = arith.addf %328, %329 : vector<8x128xf32>
    %331 = arith.negf %330 : vector<8x128xf32>
    %332 = math.exp %331 : vector<8x128xf32>
    %cst_78 = arith.constant 1.000000e+00 : f32
    %333 = vector.broadcast %cst_78 : f32 to vector<8x128xf32>
    %334 = arith.addf %333, %332 : vector<8x128xf32>
    %335 = arith.divf %333, %334 : vector<8x128xf32>
    %336 = vector.extract_strided_slice %318 {offsets = [0, 256], sizes = [8, 128], strides = [1, 1]} : vector<8x384xf32> to vector<8x128xf32>
    %337 = vector.extract_strided_slice %319 {offsets = [0, 256], sizes = [8, 128], strides = [1, 1]} : vector<8x384xf32> to vector<8x128xf32>
    %338 = arith.addf %337, %16 : vector<8x128xf32>
    %339 = arith.mulf %327, %338 : vector<8x128xf32>
    %340 = arith.addf %336, %339 : vector<8x128xf32>
    %341 = math.tanh %340 : vector<8x128xf32>
    %342 = arith.subf %272, %341 : vector<8x128xf32>
    %343 = arith.mulf %335, %342 : vector<8x128xf32>
    %344 = arith.addf %343, %341 : vector<8x128xf32>
    %345 = arith.index_cast %c4_i32 : i32 to index
    %c0_79 = arith.constant 0 : index
    %c0_80 = arith.constant 0 : index
    %346 = vector.load %arg10[%345, %c0_79, %c0_80] : memref<8x8x256xf32, #tpu.memory_space<vmem>>, vector<1x8x128xf32>
    %347 = vector.shape_cast %346 : vector<1x8x128xf32> to vector<8x128xf32>
    %348 = vector.shape_cast %314 : vector<8x128xf32> to vector<1x8x128xf32>
    tpu.vector_store %arg10[%345, %c0_79, %c0_80], %348 {strides = array<i32>} : memref<8x8x256xf32, #tpu.memory_space<vmem>>, vector<1x8x128xf32>,
    %349 = arith.index_cast %281 : i32 to index
    %c0_81 = arith.constant 0 : index
    %c128_82 = arith.constant 128 : index
    %350 = vector.load %arg10[%349, %c0_81, %c128_82] : memref<8x8x256xf32, #tpu.memory_space<vmem>>, vector<1x8x128xf32>
    %351 = vector.shape_cast %350 : vector<1x8x128xf32> to vector<8x128xf32>
    %352 = vector.shape_cast %344 : vector<8x128xf32> to vector<1x8x128xf32>
    tpu.vector_store %arg10[%349, %c0_81, %c128_82], %352 {strides = array<i32>} : memref<8x8x256xf32, #tpu.memory_space<vmem>>, vector<1x8x128xf32>,
    %c5_i32 = arith.constant 5 : i32
    %c7_i32_83 = arith.constant 7 : i32
    %353 = arith.subi %c7_i32_83, %c5_i32 : i32
    %354 = tpu.concatenate %314, %344 in 1 : vector<8x128xf32>, vector<8x128xf32> -> vector<8x256xf32>
    %355 = arith.truncf %354 : vector<8x256xf32> to vector<8x256xbf16>
    %cst_84 = arith.constant dense<0.000000e+00> : vector<8x768xf32>
    %356 = tpu.matmul %355, %10, %cst_84 {dimension_numbers = #tpu.dot_dimension_numbers<[1], [0], [0], [1], [0, 0, 1, 1], [], []>} : vector<8x256xbf16>, vector<256x768xbf16>, vector<8x768xf32> -> vector<8x768xf32>
    %357 = arith.index_cast %c5_i32 : i32 to index
    %c0_85 = arith.constant 0 : index
    %c0_86 = arith.constant 0 : index
    %358 = vector.load %arg9[%357, %c0_85, %c0_86] : memref<8x8x768xbf16, #tpu.memory_space<vmem>>, vector<1x8x384xbf16>
    %359 = vector.shape_cast %358 : vector<1x8x384xbf16> to vector<8x384xbf16>
    %360 = arith.extf %359 : vector<8x384xbf16> to vector<8x384xf32>
    %361 = vector.extract_strided_slice %356 {offsets = [0, 0], sizes = [8, 384], strides = [1, 1]} : vector<8x768xf32> to vector<8x384xf32>
    %362 = vector.extract_strided_slice %360 {offsets = [0, 0], sizes = [8, 128], strides = [1, 1]} : vector<8x384xf32> to vector<8x128xf32>
    %363 = vector.extract_strided_slice %361 {offsets = [0, 0], sizes = [8, 128], strides = [1, 1]} : vector<8x384xf32> to vector<8x128xf32>
    %364 = arith.addf %362, %363 : vector<8x128xf32>
    %365 = arith.negf %364 : vector<8x128xf32>
    %366 = math.exp %365 : vector<8x128xf32>
    %cst_87 = arith.constant 1.000000e+00 : f32
    %367 = vector.broadcast %cst_87 : f32 to vector<8x128xf32>
    %368 = arith.addf %367, %366 : vector<8x128xf32>
    %369 = arith.divf %367, %368 : vector<8x128xf32>
    %370 = vector.extract_strided_slice %360 {offsets = [0, 128], sizes = [8, 128], strides = [1, 1]} : vector<8x384xf32> to vector<8x128xf32>
    %371 = vector.extract_strided_slice %361 {offsets = [0, 128], sizes = [8, 128], strides = [1, 1]} : vector<8x384xf32> to vector<8x128xf32>
    %372 = arith.addf %370, %371 : vector<8x128xf32>
    %373 = arith.negf %372 : vector<8x128xf32>
    %374 = math.exp %373 : vector<8x128xf32>
    %cst_88 = arith.constant 1.000000e+00 : f32
    %375 = vector.broadcast %cst_88 : f32 to vector<8x128xf32>
    %376 = arith.addf %375, %374 : vector<8x128xf32>
    %377 = arith.divf %375, %376 : vector<8x128xf32>
    %378 = vector.extract_strided_slice %360 {offsets = [0, 256], sizes = [8, 128], strides = [1, 1]} : vector<8x384xf32> to vector<8x128xf32>
    %379 = vector.extract_strided_slice %361 {offsets = [0, 256], sizes = [8, 128], strides = [1, 1]} : vector<8x384xf32> to vector<8x128xf32>
    %380 = arith.addf %379, %13 : vector<8x128xf32>
    %381 = arith.mulf %369, %380 : vector<8x128xf32>
    %382 = arith.addf %378, %381 : vector<8x128xf32>
    %383 = math.tanh %382 : vector<8x128xf32>
    %384 = arith.subf %314, %383 : vector<8x128xf32>
    %385 = arith.mulf %377, %384 : vector<8x128xf32>
    %386 = arith.addf %385, %383 : vector<8x128xf32>
    %387 = arith.index_cast %353 : i32 to index
    %c0_89 = arith.constant 0 : index
    %c384_90 = arith.constant 384 : index
    %388 = vector.load %arg9[%387, %c0_89, %c384_90] : memref<8x8x768xbf16, #tpu.memory_space<vmem>>, vector<1x8x384xbf16>
    %389 = vector.shape_cast %388 : vector<1x8x384xbf16> to vector<8x384xbf16>
    %390 = arith.extf %389 : vector<8x384xbf16> to vector<8x384xf32>
    %391 = vector.extract_strided_slice %356 {offsets = [0, 384], sizes = [8, 384], strides = [1, 1]} : vector<8x768xf32> to vector<8x384xf32>
    %392 = vector.extract_strided_slice %390 {offsets = [0, 0], sizes = [8, 128], strides = [1, 1]} : vector<8x384xf32> to vector<8x128xf32>
    %393 = vector.extract_strided_slice %391 {offsets = [0, 0], sizes = [8, 128], strides = [1, 1]} : vector<8x384xf32> to vector<8x128xf32>
    %394 = arith.addf %392, %393 : vector<8x128xf32>
    %395 = arith.negf %394 : vector<8x128xf32>
    %396 = math.exp %395 : vector<8x128xf32>
    %cst_91 = arith.constant 1.000000e+00 : f32
    %397 = vector.broadcast %cst_91 : f32 to vector<8x128xf32>
    %398 = arith.addf %397, %396 : vector<8x128xf32>
    %399 = arith.divf %397, %398 : vector<8x128xf32>
    %400 = vector.extract_strided_slice %390 {offsets = [0, 128], sizes = [8, 128], strides = [1, 1]} : vector<8x384xf32> to vector<8x128xf32>
    %401 = vector.extract_strided_slice %391 {offsets = [0, 128], sizes = [8, 128], strides = [1, 1]} : vector<8x384xf32> to vector<8x128xf32>
    %402 = arith.addf %400, %401 : vector<8x128xf32>
    %403 = arith.negf %402 : vector<8x128xf32>
    %404 = math.exp %403 : vector<8x128xf32>
    %cst_92 = arith.constant 1.000000e+00 : f32
    %405 = vector.broadcast %cst_92 : f32 to vector<8x128xf32>
    %406 = arith.addf %405, %404 : vector<8x128xf32>
    %407 = arith.divf %405, %406 : vector<8x128xf32>
    %408 = vector.extract_strided_slice %390 {offsets = [0, 256], sizes = [8, 128], strides = [1, 1]} : vector<8x384xf32> to vector<8x128xf32>
    %409 = vector.extract_strided_slice %391 {offsets = [0, 256], sizes = [8, 128], strides = [1, 1]} : vector<8x384xf32> to vector<8x128xf32>
    %410 = arith.addf %409, %16 : vector<8x128xf32>
    %411 = arith.mulf %399, %410 : vector<8x128xf32>
    %412 = arith.addf %408, %411 : vector<8x128xf32>
    %413 = math.tanh %412 : vector<8x128xf32>
    %414 = arith.subf %344, %413 : vector<8x128xf32>
    %415 = arith.mulf %407, %414 : vector<8x128xf32>
    %416 = arith.addf %415, %413 : vector<8x128xf32>
    %417 = arith.index_cast %c5_i32 : i32 to index
    %c0_93 = arith.constant 0 : index
    %c0_94 = arith.constant 0 : index
    %418 = vector.load %arg10[%417, %c0_93, %c0_94] : memref<8x8x256xf32, #tpu.memory_space<vmem>>, vector<1x8x128xf32>
    %419 = vector.shape_cast %418 : vector<1x8x128xf32> to vector<8x128xf32>
    %420 = vector.shape_cast %386 : vector<8x128xf32> to vector<1x8x128xf32>
    tpu.vector_store %arg10[%417, %c0_93, %c0_94], %420 {strides = array<i32>} : memref<8x8x256xf32, #tpu.memory_space<vmem>>, vector<1x8x128xf32>,
    %421 = arith.index_cast %353 : i32 to index
    %c0_95 = arith.constant 0 : index
    %c128_96 = arith.constant 128 : index
    %422 = vector.load %arg10[%421, %c0_95, %c128_96] : memref<8x8x256xf32, #tpu.memory_space<vmem>>, vector<1x8x128xf32>
    %423 = vector.shape_cast %422 : vector<1x8x128xf32> to vector<8x128xf32>
    %424 = vector.shape_cast %416 : vector<8x128xf32> to vector<1x8x128xf32>
    tpu.vector_store %arg10[%421, %c0_95, %c128_96], %424 {strides = array<i32>} : memref<8x8x256xf32, #tpu.memory_space<vmem>>, vector<1x8x128xf32>,
    %c6_i32 = arith.constant 6 : i32
    %c7_i32_97 = arith.constant 7 : i32
    %425 = arith.subi %c7_i32_97, %c6_i32 : i32
    %426 = tpu.concatenate %386, %416 in 1 : vector<8x128xf32>, vector<8x128xf32> -> vector<8x256xf32>
    %427 = arith.truncf %426 : vector<8x256xf32> to vector<8x256xbf16>
    %cst_98 = arith.constant dense<0.000000e+00> : vector<8x768xf32>
    %428 = tpu.matmul %427, %10, %cst_98 {dimension_numbers = #tpu.dot_dimension_numbers<[1], [0], [0], [1], [0, 0, 1, 1], [], []>} : vector<8x256xbf16>, vector<256x768xbf16>, vector<8x768xf32> -> vector<8x768xf32>
    %429 = arith.index_cast %c6_i32 : i32 to index
    %c0_99 = arith.constant 0 : index
    %c0_100 = arith.constant 0 : index
    %430 = vector.load %arg9[%429, %c0_99, %c0_100] : memref<8x8x768xbf16, #tpu.memory_space<vmem>>, vector<1x8x384xbf16>
    %431 = vector.shape_cast %430 : vector<1x8x384xbf16> to vector<8x384xbf16>
    %432 = arith.extf %431 : vector<8x384xbf16> to vector<8x384xf32>
    %433 = vector.extract_strided_slice %428 {offsets = [0, 0], sizes = [8, 384], strides = [1, 1]} : vector<8x768xf32> to vector<8x384xf32>
    %434 = vector.extract_strided_slice %432 {offsets = [0, 0], sizes = [8, 128], strides = [1, 1]} : vector<8x384xf32> to vector<8x128xf32>
    %435 = vector.extract_strided_slice %433 {offsets = [0, 0], sizes = [8, 128], strides = [1, 1]} : vector<8x384xf32> to vector<8x128xf32>
    %436 = arith.addf %434, %435 : vector<8x128xf32>
    %437 = arith.negf %436 : vector<8x128xf32>
    %438 = math.exp %437 : vector<8x128xf32>
    %cst_101 = arith.constant 1.000000e+00 : f32
    %439 = vector.broadcast %cst_101 : f32 to vector<8x128xf32>
    %440 = arith.addf %439, %438 : vector<8x128xf32>
    %441 = arith.divf %439, %440 : vector<8x128xf32>
    %442 = vector.extract_strided_slice %432 {offsets = [0, 128], sizes = [8, 128], strides = [1, 1]} : vector<8x384xf32> to vector<8x128xf32>
    %443 = vector.extract_strided_slice %433 {offsets = [0, 128], sizes = [8, 128], strides = [1, 1]} : vector<8x384xf32> to vector<8x128xf32>
    %444 = arith.addf %442, %443 : vector<8x128xf32>
    %445 = arith.negf %444 : vector<8x128xf32>
    %446 = math.exp %445 : vector<8x128xf32>
    %cst_102 = arith.constant 1.000000e+00 : f32
    %447 = vector.broadcast %cst_102 : f32 to vector<8x128xf32>
    %448 = arith.addf %447, %446 : vector<8x128xf32>
    %449 = arith.divf %447, %448 : vector<8x128xf32>
    %450 = vector.extract_strided_slice %432 {offsets = [0, 256], sizes = [8, 128], strides = [1, 1]} : vector<8x384xf32> to vector<8x128xf32>
    %451 = vector.extract_strided_slice %433 {offsets = [0, 256], sizes = [8, 128], strides = [1, 1]} : vector<8x384xf32> to vector<8x128xf32>
    %452 = arith.addf %451, %13 : vector<8x128xf32>
    %453 = arith.mulf %441, %452 : vector<8x128xf32>
    %454 = arith.addf %450, %453 : vector<8x128xf32>
    %455 = math.tanh %454 : vector<8x128xf32>
    %456 = arith.subf %386, %455 : vector<8x128xf32>
    %457 = arith.mulf %449, %456 : vector<8x128xf32>
    %458 = arith.addf %457, %455 : vector<8x128xf32>
    %459 = arith.index_cast %425 : i32 to index
    %c0_103 = arith.constant 0 : index
    %c384_104 = arith.constant 384 : index
    %460 = vector.load %arg9[%459, %c0_103, %c384_104] : memref<8x8x768xbf16, #tpu.memory_space<vmem>>, vector<1x8x384xbf16>
    %461 = vector.shape_cast %460 : vector<1x8x384xbf16> to vector<8x384xbf16>
    %462 = arith.extf %461 : vector<8x384xbf16> to vector<8x384xf32>
    %463 = vector.extract_strided_slice %428 {offsets = [0, 384], sizes = [8, 384], strides = [1, 1]} : vector<8x768xf32> to vector<8x384xf32>
    %464 = vector.extract_strided_slice %462 {offsets = [0, 0], sizes = [8, 128], strides = [1, 1]} : vector<8x384xf32> to vector<8x128xf32>
    %465 = vector.extract_strided_slice %463 {offsets = [0, 0], sizes = [8, 128], strides = [1, 1]} : vector<8x384xf32> to vector<8x128xf32>
    %466 = arith.addf %464, %465 : vector<8x128xf32>
    %467 = arith.negf %466 : vector<8x128xf32>
    %468 = math.exp %467 : vector<8x128xf32>
    %cst_105 = arith.constant 1.000000e+00 : f32
    %469 = vector.broadcast %cst_105 : f32 to vector<8x128xf32>
    %470 = arith.addf %469, %468 : vector<8x128xf32>
    %471 = arith.divf %469, %470 : vector<8x128xf32>
    %472 = vector.extract_strided_slice %462 {offsets = [0, 128], sizes = [8, 128], strides = [1, 1]} : vector<8x384xf32> to vector<8x128xf32>
    %473 = vector.extract_strided_slice %463 {offsets = [0, 128], sizes = [8, 128], strides = [1, 1]} : vector<8x384xf32> to vector<8x128xf32>
    %474 = arith.addf %472, %473 : vector<8x128xf32>
    %475 = arith.negf %474 : vector<8x128xf32>
    %476 = math.exp %475 : vector<8x128xf32>
    %cst_106 = arith.constant 1.000000e+00 : f32
    %477 = vector.broadcast %cst_106 : f32 to vector<8x128xf32>
    %478 = arith.addf %477, %476 : vector<8x128xf32>
    %479 = arith.divf %477, %478 : vector<8x128xf32>
    %480 = vector.extract_strided_slice %462 {offsets = [0, 256], sizes = [8, 128], strides = [1, 1]} : vector<8x384xf32> to vector<8x128xf32>
    %481 = vector.extract_strided_slice %463 {offsets = [0, 256], sizes = [8, 128], strides = [1, 1]} : vector<8x384xf32> to vector<8x128xf32>
    %482 = arith.addf %481, %16 : vector<8x128xf32>
    %483 = arith.mulf %471, %482 : vector<8x128xf32>
    %484 = arith.addf %480, %483 : vector<8x128xf32>
    %485 = math.tanh %484 : vector<8x128xf32>
    %486 = arith.subf %416, %485 : vector<8x128xf32>
    %487 = arith.mulf %479, %486 : vector<8x128xf32>
    %488 = arith.addf %487, %485 : vector<8x128xf32>
    %489 = arith.index_cast %c6_i32 : i32 to index
    %c0_107 = arith.constant 0 : index
    %c0_108 = arith.constant 0 : index
    %490 = vector.load %arg10[%489, %c0_107, %c0_108] : memref<8x8x256xf32, #tpu.memory_space<vmem>>, vector<1x8x128xf32>
    %491 = vector.shape_cast %490 : vector<1x8x128xf32> to vector<8x128xf32>
    %492 = vector.shape_cast %458 : vector<8x128xf32> to vector<1x8x128xf32>
    tpu.vector_store %arg10[%489, %c0_107, %c0_108], %492 {strides = array<i32>} : memref<8x8x256xf32, #tpu.memory_space<vmem>>, vector<1x8x128xf32>,
    %493 = arith.index_cast %425 : i32 to index
    %c0_109 = arith.constant 0 : index
    %c128_110 = arith.constant 128 : index
    %494 = vector.load %arg10[%493, %c0_109, %c128_110] : memref<8x8x256xf32, #tpu.memory_space<vmem>>, vector<1x8x128xf32>
    %495 = vector.shape_cast %494 : vector<1x8x128xf32> to vector<8x128xf32>
    %496 = vector.shape_cast %488 : vector<8x128xf32> to vector<1x8x128xf32>
    tpu.vector_store %arg10[%493, %c0_109, %c128_110], %496 {strides = array<i32>} : memref<8x8x256xf32, #tpu.memory_space<vmem>>, vector<1x8x128xf32>,
    %c7_i32_111 = arith.constant 7 : i32
    %c7_i32_112 = arith.constant 7 : i32
    %497 = arith.subi %c7_i32_112, %c7_i32_111 : i32
    %498 = tpu.concatenate %458, %488 in 1 : vector<8x128xf32>, vector<8x128xf32> -> vector<8x256xf32>
    %499 = arith.truncf %498 : vector<8x256xf32> to vector<8x256xbf16>
    %cst_113 = arith.constant dense<0.000000e+00> : vector<8x768xf32>
    %500 = tpu.matmul %499, %10, %cst_113 {dimension_numbers = #tpu.dot_dimension_numbers<[1], [0], [0], [1], [0, 0, 1, 1], [], []>} : vector<8x256xbf16>, vector<256x768xbf16>, vector<8x768xf32> -> vector<8x768xf32>
    %501 = arith.index_cast %c7_i32_111 : i32 to index
    %c0_114 = arith.constant 0 : index
    %c0_115 = arith.constant 0 : index
    %502 = vector.load %arg9[%501, %c0_114, %c0_115] : memref<8x8x768xbf16, #tpu.memory_space<vmem>>, vector<1x8x384xbf16>
    %503 = vector.shape_cast %502 : vector<1x8x384xbf16> to vector<8x384xbf16>
    %504 = arith.extf %503 : vector<8x384xbf16> to vector<8x384xf32>
    %505 = vector.extract_strided_slice %500 {offsets = [0, 0], sizes = [8, 384], strides = [1, 1]} : vector<8x768xf32> to vector<8x384xf32>
    %506 = vector.extract_strided_slice %504 {offsets = [0, 0], sizes = [8, 128], strides = [1, 1]} : vector<8x384xf32> to vector<8x128xf32>
    %507 = vector.extract_strided_slice %505 {offsets = [0, 0], sizes = [8, 128], strides = [1, 1]} : vector<8x384xf32> to vector<8x128xf32>
    %508 = arith.addf %506, %507 : vector<8x128xf32>
    %509 = arith.negf %508 : vector<8x128xf32>
    %510 = math.exp %509 : vector<8x128xf32>
    %cst_116 = arith.constant 1.000000e+00 : f32
    %511 = vector.broadcast %cst_116 : f32 to vector<8x128xf32>
    %512 = arith.addf %511, %510 : vector<8x128xf32>
    %513 = arith.divf %511, %512 : vector<8x128xf32>
    %514 = vector.extract_strided_slice %504 {offsets = [0, 128], sizes = [8, 128], strides = [1, 1]} : vector<8x384xf32> to vector<8x128xf32>
    %515 = vector.extract_strided_slice %505 {offsets = [0, 128], sizes = [8, 128], strides = [1, 1]} : vector<8x384xf32> to vector<8x128xf32>
    %516 = arith.addf %514, %515 : vector<8x128xf32>
    %517 = arith.negf %516 : vector<8x128xf32>
    %518 = math.exp %517 : vector<8x128xf32>
    %cst_117 = arith.constant 1.000000e+00 : f32
    %519 = vector.broadcast %cst_117 : f32 to vector<8x128xf32>
    %520 = arith.addf %519, %518 : vector<8x128xf32>
    %521 = arith.divf %519, %520 : vector<8x128xf32>
    %522 = vector.extract_strided_slice %504 {offsets = [0, 256], sizes = [8, 128], strides = [1, 1]} : vector<8x384xf32> to vector<8x128xf32>
    %523 = vector.extract_strided_slice %505 {offsets = [0, 256], sizes = [8, 128], strides = [1, 1]} : vector<8x384xf32> to vector<8x128xf32>
    %524 = arith.addf %523, %13 : vector<8x128xf32>
    %525 = arith.mulf %513, %524 : vector<8x128xf32>
    %526 = arith.addf %522, %525 : vector<8x128xf32>
    %527 = math.tanh %526 : vector<8x128xf32>
    %528 = arith.subf %458, %527 : vector<8x128xf32>
    %529 = arith.mulf %521, %528 : vector<8x128xf32>
    %530 = arith.addf %529, %527 : vector<8x128xf32>
    %531 = arith.index_cast %497 : i32 to index
    %c0_118 = arith.constant 0 : index
    %c384_119 = arith.constant 384 : index
    %532 = vector.load %arg9[%531, %c0_118, %c384_119] : memref<8x8x768xbf16, #tpu.memory_space<vmem>>, vector<1x8x384xbf16>
    %533 = vector.shape_cast %532 : vector<1x8x384xbf16> to vector<8x384xbf16>
    %534 = arith.extf %533 : vector<8x384xbf16> to vector<8x384xf32>
    %535 = vector.extract_strided_slice %500 {offsets = [0, 384], sizes = [8, 384], strides = [1, 1]} : vector<8x768xf32> to vector<8x384xf32>
    %536 = vector.extract_strided_slice %534 {offsets = [0, 0], sizes = [8, 128], strides = [1, 1]} : vector<8x384xf32> to vector<8x128xf32>
    %537 = vector.extract_strided_slice %535 {offsets = [0, 0], sizes = [8, 128], strides = [1, 1]} : vector<8x384xf32> to vector<8x128xf32>
    %538 = arith.addf %536, %537 : vector<8x128xf32>
    %539 = arith.negf %538 : vector<8x128xf32>
    %540 = math.exp %539 : vector<8x128xf32>
    %cst_120 = arith.constant 1.000000e+00 : f32
    %541 = vector.broadcast %cst_120 : f32 to vector<8x128xf32>
    %542 = arith.addf %541, %540 : vector<8x128xf32>
    %543 = arith.divf %541, %542 : vector<8x128xf32>
    %544 = vector.extract_strided_slice %534 {offsets = [0, 128], sizes = [8, 128], strides = [1, 1]} : vector<8x384xf32> to vector<8x128xf32>
    %545 = vector.extract_strided_slice %535 {offsets = [0, 128], sizes = [8, 128], strides = [1, 1]} : vector<8x384xf32> to vector<8x128xf32>
    %546 = arith.addf %544, %545 : vector<8x128xf32>
    %547 = arith.negf %546 : vector<8x128xf32>
    %548 = math.exp %547 : vector<8x128xf32>
    %cst_121 = arith.constant 1.000000e+00 : f32
    %549 = vector.broadcast %cst_121 : f32 to vector<8x128xf32>
    %550 = arith.addf %549, %548 : vector<8x128xf32>
    %551 = arith.divf %549, %550 : vector<8x128xf32>
    %552 = vector.extract_strided_slice %534 {offsets = [0, 256], sizes = [8, 128], strides = [1, 1]} : vector<8x384xf32> to vector<8x128xf32>
    %553 = vector.extract_strided_slice %535 {offsets = [0, 256], sizes = [8, 128], strides = [1, 1]} : vector<8x384xf32> to vector<8x128xf32>
    %554 = arith.addf %553, %16 : vector<8x128xf32>
    %555 = arith.mulf %543, %554 : vector<8x128xf32>
    %556 = arith.addf %552, %555 : vector<8x128xf32>
    %557 = math.tanh %556 : vector<8x128xf32>
    %558 = arith.subf %488, %557 : vector<8x128xf32>
    %559 = arith.mulf %551, %558 : vector<8x128xf32>
    %560 = arith.addf %559, %557 : vector<8x128xf32>
    %561 = arith.index_cast %c7_i32_111 : i32 to index
    %c0_122 = arith.constant 0 : index
    %c0_123 = arith.constant 0 : index
    %562 = vector.load %arg10[%561, %c0_122, %c0_123] : memref<8x8x256xf32, #tpu.memory_space<vmem>>, vector<1x8x128xf32>
    %563 = vector.shape_cast %562 : vector<1x8x128xf32> to vector<8x128xf32>
    %564 = vector.shape_cast %530 : vector<8x128xf32> to vector<1x8x128xf32>
    tpu.vector_store %arg10[%561, %c0_122, %c0_123], %564 {strides = array<i32>} : memref<8x8x256xf32, #tpu.memory_space<vmem>>, vector<1x8x128xf32>,
    %565 = arith.index_cast %497 : i32 to index
    %c0_124 = arith.constant 0 : index
    %c128_125 = arith.constant 128 : index
    %566 = vector.load %arg10[%565, %c0_124, %c128_125] : memref<8x8x256xf32, #tpu.memory_space<vmem>>, vector<1x8x128xf32>
    %567 = vector.shape_cast %566 : vector<1x8x128xf32> to vector<8x128xf32>
    %568 = vector.shape_cast %560 : vector<8x128xf32> to vector<1x8x128xf32>
    tpu.vector_store %arg10[%565, %c0_124, %c128_125], %568 {strides = array<i32>} : memref<8x8x256xf32, #tpu.memory_space<vmem>>, vector<1x8x128xf32>,
    %c7_i32_126 = arith.constant 7 : i32
    %c0_127 = arith.constant 0 : index
    %c0_128 = arith.constant 0 : index
    %c0_129 = arith.constant 0 : index
    %569 = vector.load %arg10[%c0_127, %c0_128, %c0_129] : memref<8x8x256xf32, #tpu.memory_space<vmem>>, vector<8x8x256xf32>
    %570 = vector.shape_cast %569 : vector<8x8x256xf32> to vector<64x256xf32>
    %571 = arith.truncf %570 : vector<64x256xf32> to vector<64x256xbf16>
    %c0_130 = arith.constant 0 : index
    %c0_131 = arith.constant 0 : index
    %572 = vector.load %arg6[%c0_130, %c0_131] : memref<256x128xbf16, #tpu.memory_space<vmem>>, vector<256x128xbf16>
    %cst_132 = arith.constant dense<0.000000e+00> : vector<64x128xf32>
    %573 = tpu.matmul %571, %572, %cst_132 {dimension_numbers = #tpu.dot_dimension_numbers<[1], [0], [0], [1], [0, 0, 1, 1], [], []>} : vector<64x256xbf16>, vector<256x128xbf16>, vector<64x128xf32> -> vector<64x128xf32>
    %c0_133 = arith.constant 0 : index
    %c0_134 = arith.constant 0 : index
    %574 = vector.load %arg7[%c0_133, %c0_134] : memref<1x128xf32, #tpu.memory_space<vmem>>, vector<1x128xf32>
    %575 = vector.broadcast %574 : vector<1x128xf32> to vector<64x128xf32>
    %576 = arith.addf %573, %575 : vector<64x128xf32>
    %577 = vector.shape_cast %576 : vector<64x128xf32> to vector<8x8x128xf32>
    %c0_135 = arith.constant 0 : index
    %c0_136 = arith.constant 0 : index
    %c0_137 = arith.constant 0 : index
    %578 = vector.load %arg8[%c0_135, %c0_136, %c0_137] : memref<8x8x128xf32, #tpu.memory_space<vmem>>, vector<8x8x128xf32>
    tpu.vector_store %arg8[%c0_135, %c0_136, %c0_137], %577 {strides = array<i32>} : memref<8x8x128xf32, #tpu.memory_space<vmem>>, vector<8x8x128xf32>,
    return
  }
}

</mosaic_0001>

<bundles_post_ra>
// kernel: tpu_custom_call.1
= control target key start
LH: loop header
LB: loop body
LE: loop exit
PB: predicated region body
PF: predicated region fallthrough
CT: control target
= control target key end

     0   :  { %13 = vsyncpa [#allocation5], 0  ;;  %s5013_s0 = inlined_call_operand.hbm [shape: bf16[8,8,16], index: 0, kind: input, shape index: {}]   ;;  %s5014_s1 = inlined_call_operand.hbm [shape: bf16[16,768], index: 1, kind: input, shape index: {}]   ;;  %s5015_s2 = inlined_call_operand.hbm [shape: f32[1,768], index: 2, kind: input, shape index: {}]   ;;  %s5016_s3 = inlined_call_operand.hbm [shape: bf16[256,768], index: 3, kind: input, shape index: {}]   ;;  %s5017_s4 = inlined_call_operand.vmem [shape: f32[1,128], index: 4, kind: input, shape index: {}]   ;;  %s5018_s5 = inlined_call_operand.vmem [shape: f32[1,128], index: 5, kind: input, shape index: {}]   ;;  %s5019_s6 = inlined_call_operand.hbm [shape: bf16[256,128], index: 6, kind: input, shape index: {}]   ;;  %s5020_s7 = inlined_call_operand.vmem [shape: f32[1,128], index: 7, kind: input, shape index: {}]   ;;  %s5021_s8 = inlined_call_operand.hbm [shape: f32[8,8,128], index: 8, kind: output, shape index: {}]  }
   0x1   :  { %14 = vsyncpa [#allocation8], 0 }
   0x2   :  { %15 = vsyncpa [#allocation11], 0 }
   0x3   :  { %16 = vsyncpa [#allocation6], 0  ;;  %s3675_s27 = smov [#allocation7]  }
   0x4   :  { %s34_s28 = sshll.u32 %s3675_s27, 4  ;;  %s35_s28 = int_to_ptr.vmem [resolvable:$true] %s34_s28 }
   0x5   :  { %s3555_s29 = scalar_lea.vmem %s35_s28, 768  ;;  %p3560_p1 = scmp.lt.s32.totalorder %s35_s28, %s35_s28 }
   0x6   :  { %p3556_p0 = scmp.ne.s32.totalorder %s35_s28, %s3555_s29  ;;  %p3561_p2 = scmp.lt.s32.totalorder %s3555_s29, %s3555_s29 }
   0x8   :  { %p3562_p3 = por %p3561_p2, %p3560_p1 }
   0xa   :  { %p3563_p4 = pnand %p3562_p3, %p3556_p0 }
   0xc   :  { %3566 = shalt.err (!%p3563_p4)
}
   0xd   :  { %s3676_s30 = smov 384   ;;  %s3677_s9 = smov 24  }
   0xe   :  { %40 = dma.hbm_to_vmem [thread:$0]  %s5014_s1, 768, %s35_s28, [#allocation8], %s3676_s30, %s3676_s30, %s3677_s9  }
   0xf   :  { %s3678_s12 = smov [#allocation10]   ;;  %s3679_s14 = smov [#allocation4]  }
  0x10   :  { %s56_s13 = sshll.u32 %s3678_s12, 4  ;;  %s22_s15 = sshll.u32 %s3679_s14, 4  ;;  %s57_s13 = int_to_ptr.vmem [resolvable:$true] %s56_s13  ;;  %s23_s15 = int_to_ptr.vmem [resolvable:$true] %s22_s15 }
  0x11   :  { %s3575_s16 = scalar_lea.vmem %s57_s13, 12288  ;;  %p3580_p6 = scmp.lt.s32.totalorder %s57_s13, %s57_s13 }
  0x12   :  { %p3576_p5 = scmp.ne.s32.totalorder %s57_s13, %s3575_s16  ;;  %p3581_p7 = scmp.lt.s32.totalorder %s3575_s16, %s3575_s16 }
  0x14   :  { %p3582_p8 = por %p3581_p7, %p3580_p6 }
  0x16   :  { %p3583_p9 = pnand %p3582_p8, %p3576_p5 }
  0x18   :  { %3586 = shalt.err (!%p3583_p9)
}
  0x19   :  { %62 = dma.hbm_to_vmem [thread:$0]  %s5016_s3, 12288, %s57_s13, [#allocation11], %s3676_s30, %s3676_s30, %s3677_s9  }
  0x1a   :  { %s3595_s19 = scalar_lea.vmem %s23_s15, 512  ;;  %p3600_p11 = scmp.lt.s32.totalorder %s23_s15, %s23_s15 }
  0x1b   :  { %p3596_p10 = scmp.ne.s32.totalorder %s23_s15, %s3595_s19  ;;  %p3601_p12 = scmp.lt.s32.totalorder %s3595_s19, %s3595_s19 }
  0x1d   :  { %p3602_p13 = por %p3601_p12, %p3600_p11 }
  0x1f   :  { %p3603_p0 = pnand %p3602_p13, %p3596_p10 }
  0x21   :  { %3606 = shalt.err (!%p3603_p0)
}
  0x22   :  { %s3680_s1 = smov 64   ;;  %s3681_s20 = smov 4  }
  0x23   :  { %28 = dma.hbm_to_vmem [thread:$0]  %s5013_s0, 512, %s23_s15, [#allocation5], %s3680_s1, %s3680_s1, %s3681_s20  }
  0x24   :  { %s3682_s23 = smov [#allocation9]   ;;  %s3683_s25 = smov [#allocation12]  }
  0x25   :  { %s47_s24 = sshll.u32 %s3682_s23, 4  ;;  %s72_s26 = sshll.u32 %s3683_s25, 4  ;;  %s48_s24 = int_to_ptr.vmem [resolvable:$true] %s47_s24  ;;  %s73_s26 = int_to_ptr.vmem [resolvable:$true] %s72_s26 }
  0x26   :  { %s3615_s3 = scalar_lea.vmem %s48_s24, 96  ;;  %p3620_p2 = scmp.lt.s32.totalorder %s48_s24, %s48_s24 }
  0x27   :  { %p3616_p1 = scmp.ne.s32.totalorder %s48_s24, %s3615_s3  ;;  %p3621_p3 = scmp.lt.s32.totalorder %s3615_s3, %s3615_s3 }
  0x29   :  { %p3622_p4 = por %p3621_p3, %p3620_p2 }
  0x2b   :  { %p3623_p5 = pnand %p3622_p4, %p3616_p1 }
  0x2d   :  { %3626 = shalt.err (!%p3623_p5)
}
  0x2e   :  { %50 = dma.hbm_to_vmem [thread:$0]  %s5015_s2, 96, %s48_s24, [#allocation8]  }
  0x2f   :  { %s3635_s29 = scalar_lea.vmem %s73_s26, 2048  ;;  %p3640_p7 = scmp.lt.s32.totalorder %s73_s26, %s73_s26 }
  0x30   :  { %p3636_p6 = scmp.ne.s32.totalorder %s73_s26, %s3635_s29  ;;  %p3641_p8 = scmp.lt.s32.totalorder %s3635_s29, %s3635_s29 }
  0x32   :  { %p3642_p9 = por %p3641_p8, %p3640_p7 }
  0x34   :  { %p3643_p10 = pnand %p3642_p9, %p3636_p6 }
  0x36   :  { %3646 = shalt.err (!%p3643_p10)
}
  0x37   :  { %78 = dma.hbm_to_vmem [thread:$0]  %s5019_s6, 2048, %s73_s26, [#allocation11], %s3680_s1, %s3680_s1, %s3681_s20  }
  0x38   :  { %3667 = dma.done.wait [#allocation5], 512  }
  0x39   :  { %3668 = vsyncadd [#allocation5], 4294966784 }
  0x3a   :  { %3669 = dma.done.wait [#allocation8], 864  }
  0x3b   :  { %3670 = vsyncadd [#allocation8], 4294966432 }
  0x3c   :  { %3671 = dma.done.wait [#allocation11], 14336  }
  0x3d   :  { %3672 = vsyncadd [#allocation11], 4294952960  ;;  %v3684_v0 = vmov 0   ;;  %v3067_v1 = vld [vmem:[#allocation7 + $0x4] ss:$24 sps:$4 sm:$0xff]   ;;  %vm193_vm0 = vcmask 130048  }
  0x3e   :  { %238 = vmatprep.mubr.bf16.mxu0 %v3684_v0  ;;  %268 = vmatprep.mubr.bf16.mxu1 %v3684_v0  ;;  %v3069_v2 = vld [vmem:[#allocation7] ss:$24 sps:$4 sm:$0xff]   ;;  %v3071_v4 = vld [vmem:[#allocation7 + $0x10] ss:$24 sps:$4 sm:$0xff]   ;;  %v3073_v5 = vld [vmem:[#allocation7 + $0x14] ss:$24 sps:$4 sm:$0xff]  }
  0x3f   :  { %220 = vmatprep.subr.bf16.mxu0 %v3067_v1  ;;  %v3070_v3 = vld [vmem:[#allocation4] sm:$0xff]   ;;  %3052 = vmatprep.subr.bf16.mxu1 %v3067_v1  ;;  %v3075_v6 = vld [vmem:[#allocation4 + $0x18] sm:$0xff]   ;;  %v3074_v9 = vld [vmem:[#allocation4 + $0x8] sm:$0xff]  }
  0x40   :  { %221 = vmatpush1.bf16.msra.mxu0 %v3069_v2  ;;  %3053 = vmatpush1.bf16.msra.mxu1 %v3069_v2  ;;  %v3076_v7 = vld [vmem:[#allocation7 + $0x8] ss:$24 sps:$4 sm:$0xff]   ;;  %v3078_v8 = vld [vmem:[#allocation7 + $0xc] ss:$24 sps:$4 sm:$0xff]   ;;  %v3079_v10 = vld [vmem:[#allocation4 + $0x10] sm:$0xff]  }
  0x41   :  { %366 = vmatprep.subr.bf16.mxu0 %v3073_v5  ;;  %293 = vmatprep.subr.bf16.mxu1 %v3078_v8  ;;  %v3760_v11 = vld [vmem:[#allocation10 + $0x154] ss:$24 sps:$4 sm:$0xff]   ;;  %v3762_v12 = vld [vmem:[#allocation10 + $0x150] ss:$24 sps:$4 sm:$0xff]   ;;  %v3768_v15 = vld [vmem:[#allocation10 + $0x124] ss:$24 sps:$4 sm:$0xff]  }
  0x42   :  { %5194 = vst [vmem:[#allocation18_spill] sm:$0xff] %v3760_v11  ;;  %v3764_v13 = vld [vmem:[#allocation10 + $0x15c] ss:$24 sps:$4 sm:$0xff]   ;;  %v3766_v14 = vld [vmem:[#allocation10 + $0x158] ss:$24 sps:$4 sm:$0xff]  }
  0x43   :  { %2805 = vmatmul.mubr.msk.bf16.vlgmr.msra.gmra.mxu0 %vm193_vm0, %v3070_v3  ;;  %2808 = vmatmul.mubr.msk.bf16.vlgmr.msra.gmra.mxu1 %vm193_vm0, %v3075_v6  ;;  %v3772_v16 = vld [vmem:[#allocation10 + $0x12c] ss:$24 sps:$4 sm:$0xff]   ;;  %v3776_v17 = vld [vmem:[#allocation10 + $0x120] ss:$24 sps:$4 sm:$0xff]   ;;  %v3784_v20 = vld [vmem:[#allocation10 + $0xfc] ss:$24 sps:$4 sm:$0xff]  }
  0x44   :  { %367 = vmatpush1.bf16.msra.mxu0 %v3071_v4  ;;  %248 = vmatprep.mubr.bf16.mxu0 %v3684_v0  ;;  %v3778_v18 = vld [vmem:[#allocation10 + $0x128] ss:$24 sps:$4 sm:$0xff]   ;;  %v3782_v19 = vld [vmem:[#allocation10 + $0xf4] ss:$24 sps:$4 sm:$0xff]   ;;  %v3790_v22 = vld [vmem:[#allocation10 + $0xf8] ss:$24 sps:$4 sm:$0xff]  }
  0x45   :  { %294 = vmatpush1.bf16.msra.mxu1 %v3076_v7  ;;  %311 = vmatprep.mubr.bf16.mxu1 %v3684_v0  ;;  %v3788_v21 = vld [vmem:[#allocation10 + $0xf0] ss:$24 sps:$4 sm:$0xff]   ;;  %v3794_v23 = vld [vmem:[#allocation10 + $0xc4] ss:$24 sps:$4 sm:$0xff]   ;;  %v3800_v25 = vld [vmem:[#allocation10 + $0xc0] ss:$24 sps:$4 sm:$0xff]   ;;  %v113_v7 = vlaneseq }
  0x46   :  { %1281 = vmatprep.subr.bf16.mxu1 %v3760_v11  ;;  %1322 = vmatprep.subr.bf16.mxu0 %v3764_v13  ;;  %v3796_v24 = vld [vmem:[#allocation10 + $0xcc] ss:$24 sps:$4 sm:$0xff]   ;;  %v3802_v26 = vld [vmem:[#allocation10 + $0xc8] ss:$24 sps:$4 sm:$0xff]   ;;  %v3808_v28 = vld [vmem:[#allocation10 + $0x9c] ss:$24 sps:$4 sm:$0xff]  }
  0x47   :  { %5195 = vst [vmem:[#allocation19_spill] sm:$0xff] %v3802_v26  ;;  %v3806_v27 = vld [vmem:[#allocation10 + $0x94] ss:$24 sps:$4 sm:$0xff]   ;;  %5196 = vst [vmem:[#allocation20_spill] sm:$0xff] %v3808_v28  ;;  %v3812_v29 = vld [vmem:[#allocation10 + $0x90] ss:$24 sps:$4 sm:$0xff]  }
  0x48   :  { %v3814_v30 = vld [vmem:[#allocation10 + $0x98] ss:$24 sps:$4 sm:$0xff]   ;;  %v3818_v31 = vld [vmem:[#allocation10 + $0x64] ss:$24 sps:$4 sm:$0xff]   ;;  %v3826_v34 = vld [vmem:[#allocation10 + $0x68] ss:$24 sps:$4 sm:$0xff]  }
  0x49   :  { %5197 = vst [vmem:[#allocation21_spill] sm:$0xff] %v3814_v30  ;;  %v3820_v32 = vld [vmem:[#allocation10 + $0x6c] ss:$24 sps:$4 sm:$0xff]   ;;  %v3824_v33 = vld [vmem:[#allocation10 + $0x60] ss:$24 sps:$4 sm:$0xff]   ;;  %5199 = vst [vmem:[#allocation23_spill] sm:$0xff] %v3826_v34 }
  0x4a   :  { %5198 = vst [vmem:[#allocation22_spill] sm:$0xff] %v3820_v32  ;;  %v3830_v35 = vld [vmem:[#allocation10 + $0x34] ss:$24 sps:$4 sm:$0xff]   ;;  %v3836_v37 = vld [vmem:[#allocation10 + $0x30] ss:$24 sps:$4 sm:$0xff]  }
  0x4b   :  { %2806 = vmatmul.mubr.msk.bf16.gmra.mxu0 %vm193_vm0, %v3074_v9  ;;  %2809 = vmatmul.mubr.msk.bf16.vlgmr.msra.gmra.mxu1 %vm193_vm0, %v3070_v3  ;;  %v3832_v36 = vld [vmem:[#allocation10 + $0x3c] ss:$24 sps:$4 sm:$0xff]   ;;  %v3838_v38 = vld [vmem:[#allocation10 + $0x38] ss:$24 sps:$4 sm:$0xff]   ;;  %v3844_v40 = vld [vmem:[#allocation10 + $0xc] ss:$24 sps:$4 sm:$0xff]  }
  0x4c   :  { %258 = vmatprep.mubr.bf16.mxu0 %v3684_v0  ;;  %321 = vmatprep.mubr.bf16.mxu1 %v3684_v0  ;;  %5200 = vst [vmem:[#allocation24_spill] sm:$0xff] %v3832_v36  ;;  %5201 = vst [vmem:[#allocation25_spill] sm:$0xff] %v3838_v38  ;;  %v3842_v39 = vld [vmem:[#allocation10 + $0x4] ss:$24 sps:$4 sm:$0xff]   ;;  %v3848_v41 = vld [vmem:[#allocation10] ss:$24 sps:$4 sm:$0xff]  }
  0x4d   :  { %1282 = vmatpush1.bf16.msra.mxu1 %v3762_v12  ;;  %5202 = vst [vmem:[#allocation26_spill] sm:$0xff] %v3844_v40  ;;  %v3850_v42 = vld [vmem:[#allocation10 + $0x8] ss:$24 sps:$4 sm:$0xff]   ;;  %v3854_v43 = vld [vmem:[#allocation10 + $0x2d4] ss:$24 sps:$4 sm:$0xff]  }
  0x4e   :  { %1283 = vmatprep.subr.bf16.mxu1 %v3768_v15  ;;  %5203 = vst [vmem:[#allocation27_spill] sm:$0xff] %v3850_v42  ;;  %v3856_v44 = vld [vmem:[#allocation10 + $0x2dc] ss:$24 sps:$4 sm:$0xff]   ;;  %v3860_v45 = vld [vmem:[#allocation10 + $0x2d0] ss:$24 sps:$4 sm:$0xff]  }
  0x4f   :  { %5204 = vst [vmem:[#allocation28_spill] sm:$0xff] %v3856_v44  ;;  %v3862_v46 = vld [vmem:[#allocation10 + $0x2d8] ss:$24 sps:$4 sm:$0xff]   ;;  %v3866_v47 = vld [vmem:[#allocation10 + $0x2a4] ss:$24 sps:$4 sm:$0xff]  }
  0x50   :  { %5205 = vst [vmem:[#allocation29_spill] sm:$0xff] %v3862_v46  ;;  %v3868_v48 = vld [vmem:[#allocation10 + $0x2ac] ss:$24 sps:$4 sm:$0xff]   ;;  %v3872_v49 = vld [vmem:[#allocation10 + $0x2a0] ss:$24 sps:$4 sm:$0xff]  }
  0x51   :  { %1284 = vmatpush1.bf16.msra.mxu1 %v3776_v17  ;;  %5206 = vst [vmem:[#allocation30_spill] sm:$0xff] %v3868_v48  ;;  %v3874_v50 = vld [vmem:[#allocation10 + $0x2a8] ss:$24 sps:$4 sm:$0xff]   ;;  %v3878_v51 = vld [vmem:[#allocation10 + $0x274] ss:$24 sps:$4 sm:$0xff]  }
  0x52   :  { %1285 = vmatprep.subr.bf16.mxu1 %v3782_v19  ;;  %5207 = vst [vmem:[#allocation31_spill] sm:$0xff] %v3874_v50  ;;  %v3880_v52 = vld [vmem:[#allocation10 + $0x27c] ss:$24 sps:$4 sm:$0xff]   ;;  %v3884_v53 = vld [vmem:[#allocation10 + $0x270] ss:$24 sps:$4 sm:$0xff]  }
  0x53   :  { %2807 = vmatmul.mubr.msk.bf16.gmra.mxu0 %vm193_vm0, %v3079_v10  ;;  %2810 = vmatmul.mubr.msk.bf16.gmra.mxu1 %vm193_vm0, %v3074_v9  ;;  %5208 = vst [vmem:[#allocation32_spill] sm:$0xff] %v3880_v52  ;;  %v3886_v54 = vld [vmem:[#allocation10 + $0x278] ss:$24 sps:$4 sm:$0xff]   ;;  %v3890_v55 = vld [vmem:[#allocation10 + $0x244] ss:$24 sps:$4 sm:$0xff]  }
  0x54   :  { %384 = vmatprep.mubr.bf16.mxu0 %v3684_v0  ;;  %331 = vmatprep.mubr.bf16.mxu1 %v3684_v0  ;;  %5209 = vst [vmem:[#allocation33_spill] sm:$0xff] %v3886_v54  ;;  %v3892_v56 = vld [vmem:[#allocation10 + $0x24c] ss:$24 sps:$4 sm:$0xff]   ;;  %v3896_v57 = vld [vmem:[#allocation10 + $0x240] ss:$24 sps:$4 sm:$0xff]  }
  0x55   :  { %1286 = vmatpush1.bf16.msra.mxu1 %v3788_v21  ;;  %5210 = vst [vmem:[#allocation34_spill] sm:$0xff] %v3892_v56  ;;  %v3898_v58 = vld [vmem:[#allocation10 + $0x248] ss:$24 sps:$4 sm:$0xff]   ;;  %v3902_v59 = vld [vmem:[#allocation10 + $0x214] ss:$24 sps:$4 sm:$0xff]  }
  0x56   :  { %1287 = vmatprep.subr.bf16.mxu1 %v3794_v23  ;;  %5211 = vst [vmem:[#allocation35_spill] sm:$0xff] %v3898_v58  ;;  %v3904_v60 = vld [vmem:[#allocation10 + $0x21c] ss:$24 sps:$4 sm:$0xff]   ;;  %v3908_v61 = vld [vmem:[#allocation10 + $0x210] ss:$24 sps:$4 sm:$0xff]  }
  0x57   :  { %5212 = vst [vmem:[#allocation36_spill] sm:$0xff] %v3904_v60  ;;  %v3910_v62 = vld [vmem:[#allocation10 + $0x218] ss:$24 sps:$4 sm:$0xff]   ;;  %v3914_v63 = vld [vmem:[#allocation10 + $0x1e4] ss:$24 sps:$4 sm:$0xff]  }
  0x58   :  { %5213 = vst [vmem:[#allocation37_spill] sm:$0xff] %v3910_v62  ;;  %v3920_v1 = vld [vmem:[#allocation10 + $0x1e0] ss:$24 sps:$4 sm:$0xff]   ;;  %v3928_v4 = vld [vmem:[#allocation10 + $0x1bc] ss:$24 sps:$4 sm:$0xff]  }
  0x59   :  { %1288 = vmatpush1.bf16.msra.mxu1 %v3800_v25  ;;  %5215 = vst [vmem:[#allocation39_spill] sm:$0xff] %v3920_v1  ;;  %v3922_v2 = vld [vmem:[#allocation10 + $0x1e8] ss:$24 sps:$4 sm:$0xff]   ;;  %5218 = vst [vmem:[#allocation42_spill] sm:$0xff] %v3928_v4  ;;  %v3938_v8 = vld [vmem:[#allocation10 + $0x184] ss:$24 sps:$4 sm:$0xff]  }
  0x5a   :  { %1289 = vmatprep.subr.bf16.mxu1 %v3806_v27  ;;  %5216 = vst [vmem:[#allocation40_spill] sm:$0xff] %v3922_v2  ;;  %v3932_v5 = vld [vmem:[#allocation10 + $0x1b0] ss:$24 sps:$4 sm:$0xff]   ;;  %5221 = vst [vmem:[#allocation45_spill] sm:$0xff] %v3938_v8 }
  0x5b   :  { %2813 = vmatmul.mubr.msk.bf16.vlgmr.msra.gmra.mxu0 %vm193_vm0, %v3070_v3  ;;  %2811 = vmatmul.mubr.msk.bf16.gmra.mxu1 %vm193_vm0, %v3079_v10  ;;  %v3926_v3 = vld [vmem:[#allocation10 + $0x1b4] ss:$24 sps:$4 sm:$0xff]   ;;  %5219 = vst [vmem:[#allocation43_spill] sm:$0xff] %v3932_v5 }
  0x5c   :  { %394 = vmatprep.mubr.bf16.mxu0 %v3684_v0  ;;  %341 = vmatprep.mubr.bf16.mxu1 %v3684_v0  ;;  %5217 = vst [vmem:[#allocation41_spill] sm:$0xff] %v3926_v3 }
  0x5d   :  { %1323 = vmatpush1.bf16.msra.mxu0 %v3766_v14  ;;  %1290 = vmatpush1.bf16.msra.mxu1 %v3812_v29 }
  0x5e   :  { %1324 = vmatprep.subr.bf16.mxu0 %v3772_v16  ;;  %1291 = vmatprep.subr.bf16.mxu1 %v3818_v31 }
  0x61   :  { %1325 = vmatpush1.bf16.msra.mxu0 %v3778_v18  ;;  %1292 = vmatpush1.bf16.msra.mxu1 %v3824_v33 }
  0x62   :  { %1326 = vmatprep.subr.bf16.mxu0 %v3784_v20  ;;  %1293 = vmatprep.subr.bf16.mxu1 %v3830_v35 }
  0x63   :  { %2814 = vmatmul.mubr.msk.bf16.gmra.mxu0 %vm193_vm0, %v3074_v9  ;;  %2812 = vmatmul.mubr.msk.bf16.gmra.mxu1 %vm193_vm0, %v3075_v6  ;;  %v3940_v9 = vld [vmem:[#allocation10 + $0x18c] ss:$24 sps:$4 sm:$0xff]  }
  0x64   :  { %404 = vmatprep.mubr.bf16.mxu0 %v3684_v0  ;;  %5222 = vst [vmem:[#allocation46_spill] sm:$0xff] %v3940_v9 }
  0x65   :  { %1327 = vmatpush1.bf16.msra.mxu0 %v3790_v22  ;;  %1294 = vmatpush1.bf16.msra.mxu1 %v3836_v37 }
  0x66   :  { %1328 = vmatprep.subr.bf16.mxu0 %v3796_v24  ;;  %1295 = vmatprep.subr.bf16.mxu1 %v3842_v39 }
  0x69   :  { %1329 = vmatpush1.bf16.msra.mxu0 %v3802_v26  ;;  %1296 = vmatpush1.bf16.msra.mxu1 %v3848_v41 }
  0x6a   :  { %1330 = vmatprep.subr.bf16.mxu0 %v3808_v28  ;;  %1297 = vmatprep.subr.bf16.mxu1 %v3854_v43 }
  0x6b   :  { %2815 = vmatmul.mubr.msk.bf16.gmra.mxu0 %vm193_vm0, %v3079_v10  ;;  %v3944_v10 = vld [vmem:[#allocation10 + $0x180] ss:$24 sps:$4 sm:$0xff]  }
  0x6c   :  { %414 = vmatprep.mubr.bf16.mxu0 %v3684_v0  ;;  %v3916_v0 = vld [vmem:[#allocation10 + $0x1ec] ss:$24 sps:$4 sm:$0xff]   ;;  %5223 = vst [vmem:[#allocation47_spill] sm:$0xff] %v3944_v10 }
  0x6d   :  { %1331 = vmatpush1.bf16.msra.mxu0 %v3814_v30  ;;  %1298 = vmatpush2.bf16.msra.mxu1 %v3860_v45  ;;  %5214 = vst [vmem:[#allocation38_spill] sm:$0xff] %v3916_v0 }
  0x6e   :  { %1332 = vmatprep.subr.bf16.mxu0 %v3820_v32  ;;  %1299 = vmatprep.subr.bf16.mxu1 %v3866_v47 }
  0x71   :  { %1333 = vmatpush1.bf16.msra.mxu0 %v3826_v34  ;;  %1300 = vmatpush2.bf16.msra.mxu1 %v3872_v49 }
  0x72   :  { %1334 = vmatprep.subr.bf16.mxu0 %v3832_v36  ;;  %1301 = vmatprep.subr.bf16.mxu1 %v3878_v51 }
  0x73   :  { %2816 = vmatmul.mubr.msk.bf16.gmra.mxu0 %vm193_vm0, %v3075_v6  ;;  %v3934_v6 = vld [vmem:[#allocation10 + $0x1b8] ss:$24 sps:$4 sm:$0xff]  }
  0x74   :  { %5220 = vst [vmem:[#allocation44_spill] sm:$0xff] %v3934_v6 }
  0x75   :  { %1335 = vmatpush1.bf16.msra.mxu0 %v3838_v38  ;;  %1302 = vmatpush2.bf16.msra.mxu1 %v3884_v53 }
  0x76   :  { %1336 = vmatprep.subr.bf16.mxu0 %v3844_v40  ;;  %1303 = vmatprep.subr.bf16.mxu1 %v3890_v55 }
  0x79   :  { %1337 = vmatpush1.bf16.msra.mxu0 %v3850_v42  ;;  %1304 = vmatpush2.bf16.msra.mxu1 %v3896_v57 }
  0x7a   :  { %1338 = vmatprep.subr.bf16.mxu0 %v3856_v44  ;;  %1305 = vmatprep.subr.bf16.mxu1 %v3902_v59 }
  0x7d   :  { %1339 = vmatpush2.bf16.msra.mxu0 %v3862_v46  ;;  %1306 = vmatpush2.bf16.msra.mxu1 %v3908_v61 }
  0x7e   :  { %1340 = vmatprep.subr.bf16.mxu0 %v3868_v48  ;;  %1307 = vmatprep.subr.bf16.mxu1 %v3914_v63 }
  0x81   :  { %1341 = vmatpush2.bf16.msra.mxu0 %v3874_v50  ;;  %1308 = vmatpush2.bf16.msra.mxu1 %v3920_v1 }
  0x82   :  { %1342 = vmatprep.subr.bf16.mxu0 %v3880_v52  ;;  %1309 = vmatprep.subr.bf16.mxu1 %v3926_v3 }
  0x85   :  { %1343 = vmatpush2.bf16.msra.mxu0 %v3886_v54  ;;  %1310 = vmatpush2.bf16.msra.mxu1 %v3932_v5 }
  0x86   :  { %1344 = vmatprep.subr.bf16.mxu0 %v3892_v56  ;;  %1311 = vmatprep.subr.bf16.mxu1 %v3938_v8 }
  0x89   :  { %1345 = vmatpush2.bf16.msra.mxu0 %v3898_v58  ;;  %1312 = vmatpush2.bf16.msra.mxu1 %v3944_v10 }
  0x8a   :  { %1346 = vmatprep.subr.bf16.mxu0 %v3904_v60  ;;  %v3959_v60 = vld [vmem:[#allocation10 + $0x164] ss:$24 sps:$4 sm:$0xff]  }
  0x8b   :  { %5225 = vst [vmem:[#allocation49_spill] sm:$0xff] %v3959_v60  ;;  %1363 = vmatprep.subr.bf16.mxu1 %v3959_v60 }
  0x8d   :  { %1347 = vmatpush2.bf16.msra.mxu0 %v3910_v62 }
  0x8e   :  { %1348 = vmatprep.subr.bf16.mxu0 %v3916_v0  ;;  %v3948_v0 = vshrl.u32 %v113_v7, 7 }
  0x90   :  { %v119_v62 = vsub.s32 1, %v3948_v0  ;;  %v123_v54 = vsub.s32 2, %v3948_v0  ;;  %v127_v44 = vsub.s32 3, %v3948_v0 }
  0x91   :  { %1349 = vmatpush2.bf16.msra.mxu0 %v3922_v2  ;;  %v3946_v2 = vld [vmem:[#allocation10 + $0x188] ss:$24 sps:$4 sm:$0xff]  }
  0x92   :  { %1350 = vmatprep.subr.bf16.mxu0 %v3928_v4  ;;  %5224 = vst [vmem:[#allocation48_spill] sm:$0xff] %v3946_v2  ;;  %v115_v4 = vsub.s32 0, %v3948_v0 }
  0x95   :  { %1351 = vmatpush2.bf16.msra.mxu0 %v3934_v6  ;;  %v3957_v6 = vld [vmem:[#allocation9] sm:$0x3f] }
  0x96   :  { %1352 = vmatprep.subr.bf16.mxu0 %v3940_v9  ;;  %v3962_v7 = vrot.slane %v3957_v6, %v115_v4  ;;  %v3965_v58 = vrot.slane %v3957_v6, %v119_v62  ;;  %v3977_v38 = vrot.slane %v3957_v6, %v123_v54 }
  0x99   :  { %1353 = vmatpush2.bf16.msra.mxu0 %v3946_v2 }
  0x9a   :  { %1464 = vmatprep.subr.bf16.mxu0 %v3760_v11 }
 0x103   :  { %v240_v9 = vpop.f32.mrf.mxu0  ;;  %v270_v56 = vpop.f32.mrf.mxu1 }
 0x104   :  { %v241_v52 = vadd.f32 %v240_v9, %v3962_v7  ;;  %v271_v50 = vadd.f32 %v270_v56, %v3962_v7 }
 0x105   :  { %v242_v2 = vpop.f32.mrf.mxu0  ;;  %v272_v46 = vpop.f32.mrf.mxu1 }
 0x106   :  { %v243_v11 = vadd.f32 %v242_v2, %v3965_v58  ;;  %v273_v62 = vadd.f32 %v272_v46, %v3965_v58 }
 0x107   :  { %v244_v48 = vpop.f32.mrf.mxu0  ;;  %v274_v40 = vpop.f32.mrf.mxu1 }
 0x108   :  { %v3972_v4 = vpack.c.bf16 %v243_v11, %v241_v52  ;;  %v245_v36 = vadd.f32 %v244_v48, %v3962_v7  ;;  %v3006_v2 = vpack.c.bf16 %v273_v62, %v271_v50  ;;  %v275_v56 = vadd.f32 %v274_v40, %v3962_v7 }
 0x109   :  { %v246_v42 = vpop.f32.mrf.mxu0  ;;  %v276_v32 = vpop.f32.mrf.mxu1  ;;  %v3986_v52 = vrot.slane %v3957_v6, %v127_v44 }
 0x10a   :  { %v247_v9 = vadd.f32 %v246_v42, %v3965_v58  ;;  %635 = vst [vmem:[#allocation2 + $0x90] sm:$0xff] %v3006_v2  ;;  %v277_v46 = vadd.f32 %v276_v32, %v3965_v58 }
 0x10b   :  { %v250_v34 = vpop.f32.mrf.mxu0  ;;  %v313_v54 = vpop.f32.mrf.mxu1 }
 0x10c   :  { %v3982_v11 = vpack.c.bf16 %v247_v9, %v245_v36  ;;  %v251_v28 = vadd.f32 %v250_v34, %v3962_v7  ;;  %v3009_v42 = vpack.c.bf16 %v277_v46, %v275_v56  ;;  %v314_v50 = vadd.f32 %v313_v54, %v3977_v38 }
 0x10d   :  { %v252_v30 = vpop.f32.mrf.mxu0  ;;  %v315_v62 = vpop.f32.mrf.mxu1 }
 0x10e   :  { %5226 = vst [vmem:[#allocation50_spill] sm:$0xff] %v3982_v11  ;;  %v253_v48 = vadd.f32 %v252_v30, %v3965_v58  ;;  %638 = vst [vmem:[#allocation2 + $0xa8] sm:$0xff] %v3009_v42  ;;  %v316_v36 = vadd.f32 %v315_v62, %v3986_v52  ;;  %v135_v42 = vsub.s32 5, %v3948_v0 }
 0x10f   :  { %v254_v40 = vpop.f32.mrf.mxu0  ;;  %v317_v32 = vpop.f32.mrf.mxu1 }
 0x110   :  { %v2994_v26 = vpack.c.bf16 %v253_v48, %v251_v28  ;;  %v255_v44 = vadd.f32 %v254_v40, %v3962_v7  ;;  %v2989_v11 = vpack.c.bf16 %v316_v36, %v314_v50  ;;  %v318_v34 = vadd.f32 %v317_v32, %v3977_v38 }
 0x111   :  { %v256_v9 = vpop.f32.mrf.mxu0  ;;  %v319_v56 = vpop.f32.mrf.mxu1  ;;  %v131_v48 = vsub.s32 4, %v3948_v0  ;;  %v4006_v0 = vrot.slane %v3957_v6, %v135_v42 }
 0x112   :  { %623 = vst [vmem:[#allocation2 + $0x30] sm:$0xff] %v2994_v26  ;;  %v257_v2 = vadd.f32 %v256_v9, %v3965_v58  ;;  %618 = vst [vmem:[#allocation2 + $0x8] sm:$0xff] %v2989_v11  ;;  %v320_v54 = vadd.f32 %v319_v56, %v3986_v52 }
 0x113   :  { %v260_v30 = vpop.f32.mrf.mxu0  ;;  %v323_v62 = vpop.f32.mrf.mxu1  ;;  %v4003_v56 = vrot.slane %v3957_v6, %v131_v48 }
 0x114   :  { %v2997_v46 = vpack.c.bf16 %v257_v2, %v255_v44  ;;  %v261_v26 = vadd.f32 %v260_v30, %v3962_v7  ;;  %v2992_v50 = vpack.c.bf16 %v320_v54, %v318_v34  ;;  %v324_v36 = vadd.f32 %v323_v62, %v3977_v38 }
 0x115   :  { %v262_v28 = vpop.f32.mrf.mxu0  ;;  %v325_v32 = vpop.f32.mrf.mxu1 }
 0x116   :  { %626 = vst [vmem:[#allocation2 + $0x48] sm:$0xff] %v2997_v46  ;;  %v263_v40 = vadd.f32 %v262_v28, %v3965_v58  ;;  %621 = vst [vmem:[#allocation2 + $0x20] sm:$0xff] %v2992_v50  ;;  %v326_v11 = vadd.f32 %v325_v32, %v3986_v52 }
 0x117   :  { %v264_v9 = vpop.f32.mrf.mxu0  ;;  %v327_v46 = vpop.f32.mrf.mxu1 }
 0x118   :  { %v3000_v44 = vpack.c.bf16 %v263_v40, %v261_v26  ;;  %v265_v30 = vadd.f32 %v264_v9, %v3962_v7  ;;  %v2995_v54 = vpack.c.bf16 %v326_v11, %v324_v36  ;;  %v328_v28 = vadd.f32 %v327_v46, %v3977_v38 }
 0x119   :  { %v266_v2 = vpop.f32.mrf.mxu0  ;;  %v329_v26 = vpop.f32.mrf.mxu1 }
 0x11a   :  { %629 = vst [vmem:[#allocation2 + $0x60] sm:$0xff] %v3000_v44  ;;  %v267_v34 = vadd.f32 %v266_v2, %v3965_v58  ;;  %624 = vst [vmem:[#allocation2 + $0x38] sm:$0xff] %v2995_v54  ;;  %v330_v50 = vadd.f32 %v329_v26, %v3986_v52 }
 0x11b   :  { %v386_v62 = vpop.f32.mrf.mxu0  ;;  %v333_v32 = vpop.f32.mrf.mxu1 }
 0x11c   :  { %v3003_v40 = vpack.c.bf16 %v267_v34, %v265_v30  ;;  %v387_v6 = vadd.f32 %v386_v62, %v4003_v56  ;;  %v2998_v44 = vpack.c.bf16 %v330_v50, %v328_v28  ;;  %v334_v7 = vadd.f32 %v333_v32, %v3977_v38 }
 0x11d   :  { %v388_v48 = vpop.f32.mrf.mxu0  ;;  %v335_v36 = vpop.f32.mrf.mxu1 }
 0x11e   :  { %632 = vst [vmem:[#allocation2 + $0x78] sm:$0xff] %v3003_v40  ;;  %v389_v42 = vadd.f32 %v388_v48, %v4006_v0  ;;  %627 = vst [vmem:[#allocation2 + $0x50] sm:$0xff] %v2998_v44  ;;  %v336_v11 = vadd.f32 %v335_v36, %v3986_v52 }
 0x11f   :  { %v390_v58 = vpop.f32.mrf.mxu0  ;;  %v337_v46 = vpop.f32.mrf.mxu1 }
 0x120   :  { %v2990_v9 = vpack.c.bf16 %v389_v42, %v387_v6  ;;  %v391_v30 = vadd.f32 %v390_v58, %v4003_v56  ;;  %v3001_v54 = vpack.c.bf16 %v336_v11, %v334_v7  ;;  %v338_v62 = vadd.f32 %v337_v46, %v3977_v38 }
 0x121   :  { %v392_v2 = vpop.f32.mrf.mxu0  ;;  %v339_v28 = vpop.f32.mrf.mxu1 }
 0x122   :  { %619 = vst [vmem:[#allocation2 + $0x10] sm:$0xff] %v2990_v9  ;;  %v393_v34 = vadd.f32 %v392_v2, %v4006_v0  ;;  %630 = vst [vmem:[#allocation2 + $0x68] sm:$0xff] %v3001_v54  ;;  %v340_v50 = vadd.f32 %v339_v28, %v3986_v52 }
 0x123   :  { %v396_v26 = vpop.f32.mrf.mxu0  ;;  %v343_v32 = vpop.f32.mrf.mxu1 }
 0x124   :  { %v2993_v40 = vpack.c.bf16 %v393_v34, %v391_v30  ;;  %v397_v6 = vadd.f32 %v396_v26, %v4003_v56  ;;  %v3004_v44 = vpack.c.bf16 %v340_v50, %v338_v62  ;;  %v344_v58 = vadd.f32 %v343_v32, %v3977_v38 }
 0x125   :  { %v398_v48 = vpop.f32.mrf.mxu0  ;;  %v345_v7 = vpop.f32.mrf.mxu1 }
 0x126   :  { %622 = vst [vmem:[#allocation2 + $0x28] sm:$0xff] %v2993_v40  ;;  %v399_v42 = vadd.f32 %v398_v48, %v4006_v0  ;;  %633 = vst [vmem:[#allocation2 + $0x80] sm:$0xff] %v3004_v44  ;;  %v346_v11 = vadd.f32 %v345_v7, %v3986_v52 }
 0x127   :  { %v400_v36 = vpop.f32.mrf.mxu0  ;;  %v347_v46 = vpop.f32.mrf.mxu1 }
 0x128   :  { %v2996_v9 = vpack.c.bf16 %v399_v42, %v397_v6  ;;  %v401_v30 = vadd.f32 %v400_v36, %v4003_v56  ;;  %v3007_v54 = vpack.c.bf16 %v346_v11, %v344_v58  ;;  %v348_v26 = vadd.f32 %v347_v46, %v3977_v38 }
 0x129   :  { %v402_v2 = vpop.f32.mrf.mxu0  ;;  %v349_v62 = vpop.f32.mrf.mxu1 }
 0x12a   :  { %625 = vst [vmem:[#allocation2 + $0x40] sm:$0xff] %v2996_v9  ;;  %v403_v34 = vadd.f32 %v402_v2, %v4006_v0  ;;  %636 = vst [vmem:[#allocation2 + $0x98] sm:$0xff] %v3007_v54  ;;  %v350_v50 = vadd.f32 %v349_v62, %v3986_v52  ;;  %v753_v52 = vunpack.c.l.bf16 %v3972_v4 }
 0x12b   :  { %v406_v28 = vpop.f32.mrf.mxu0 }
 0x12c   :  { %v2999_v40 = vpack.c.bf16 %v403_v34, %v401_v30  ;;  %v407_v32 = vadd.f32 %v406_v28, %v4003_v56  ;;  %v3010_v42 = vpack.c.bf16 %v350_v50, %v348_v26  ;;  %v2843_v26 = vmul.f32 -1.442695, %v753_v52  ;;  %v4041_v52 = vld [vmem:[%s5017_s4] ss:$0 sm:$0xff] }
 0x12d   :  { %v408_v48 = vpop.f32.mrf.mxu0 }
 0x12e   :  { %628 = vst [vmem:[#allocation2 + $0x58] sm:$0xff] %v2999_v40  ;;  %v409_v6 = vadd.f32 %v408_v48, %v4006_v0  ;;  %639 = vst [vmem:[#allocation2 + $0xb0] sm:$0xff] %v3010_v42  ;;  %3240 = vpow2.f32 %v2843_v26 }
 0x12f   :  { %v410_v44 = vpop.f32.mrf.mxu0 }
 0x130   :  { %v3002_v36 = vpack.c.bf16 %v409_v6, %v407_v32  ;;  %v411_v38 = vadd.f32 %v410_v44, %v4003_v56 }
 0x131   :  { %v412_v7 = vpop.f32.mrf.mxu0 }
 0x132   :  { %631 = vst [vmem:[#allocation2 + $0x70] sm:$0xff] %v3002_v36  ;;  %v413_v58 = vadd.f32 %v412_v7, %v4006_v0  ;;  %v754_v36 = vunpack.c.h.bf16 %v3972_v4 }
 0x133   :  { %v416_v9 = vpop.f32.mrf.mxu0 }
 0x134   :  { %v3005_v11 = vpack.c.bf16 %v413_v58, %v411_v38  ;;  %v417_v46 = vadd.f32 %v416_v9, %v4003_v56  ;;  %v2844_v38 = vmul.f32 -1.442695, %v754_v36 }
 0x135   :  { %v418_v2 = vpop.f32.mrf.mxu0 }
 0x136   :  { %634 = vst [vmem:[#allocation2 + $0x88] sm:$0xff] %v3005_v11  ;;  %v419_v30 = vadd.f32 %v418_v2, %v4006_v0 }
 0x137   :  { %v420_v34 = vpop.f32.mrf.mxu0 }
 0x138   :  { %v3008_v54 = vpack.c.bf16 %v419_v30, %v417_v46  ;;  %v421_v62 = vadd.f32 %v420_v34, %v4003_v56 }
 0x139   :  { %v422_v28 = vpop.f32.mrf.mxu0 }
 0x13a   :  { %637 = vst [vmem:[#allocation2 + $0xa0] sm:$0xff] %v3008_v54  ;;  %v423_v40 = vadd.f32 %v422_v28, %v4006_v0  ;;  %v4047_v54 = vld [vmem:[%s5018_s5] ss:$0 sm:$0xff] }
 0x13b   :  { %v3241_v42 = vpop.eup %3240 }
 0x13c   :  { %v3011_v50 = vpack.c.bf16 %v423_v40, %v421_v62  ;;  %v759_v44 = vadd.f32 1.0, %v3241_v42 }
 0x13e   :  { %640 = vst [vmem:[#allocation2 + $0xb8] sm:$0xff] %v3011_v50 }
 0x145   :  { %v774_v48 = vld [vmem:[#allocation2 + $0xb4] sm:$0xff]  ;;  %v775_v0 = vld [vmem:[#allocation2 + $0x8] ss:$180 sps:$4 sm:$0xff]  }
 0x146   :  { %v776_v32 = vunpack.c.l.bf16 %v774_v48  ;;  %v777_v7 = vunpack.c.h.bf16 %v774_v48  ;;  %v755_v2 = vunpack.c.l.bf16 %v775_v0  ;;  %v778_v40 = vunpack.c.h.bf16 %v775_v0 }
 0x148   :  { %v2845_v6 = vmul.f32 -1.442695, %v776_v32  ;;  %v2846_v58 = vmul.f32 -1.442695, %v777_v7 }
 0x14a   :  { %3242 = vpow2.f32 %v2845_v6 }
 0x14b   :  { %3244 = vrcp.f32 %v759_v44 }
 0x14c   :  { %3246 = vpow2.f32 %v2844_v38 }
 0x14d   :  { %3248 = vpow2.f32 %v2846_v58 }
 0x157   :  { %v3243_v9 = vpop.eup %3242 }
 0x158   :  { %v782_v56 = vadd.f32 1.0, %v3243_v9  ;;  %v3245_v11 = vpop.eup %3244 }
 0x159   :  { %v768_v46 = vmul.f32 %v3245_v11, %v4041_v52  ;;  %v3247_v4 = vpop.eup %3246  ;;  %v4062_v11 = vld [vmem:[#allocation10 + $0x134] ss:$24 sps:$4 sm:$0xff]  }
 0x15a   :  { %3250 = vrcp.f32 %v782_v56  ;;  %v3249_v34 = vpop.eup %3248  ;;  %v765_v26 = vadd.f32 1.0, %v3247_v4  ;;  %v4056_v56 = vld [vmem:[#allocation10 + $0x160] ss:$24 sps:$4 sm:$0xff]  }
 0x15b   :  { %v769_v30 = vadd.f32 %v768_v46, %v755_v2  ;;  %v788_v62 = vadd.f32 1.0, %v3249_v34  ;;  %v4067_v2 = vld [vmem:[#allocation10 + $0x130] ss:$24 sps:$4 sm:$0xff]   ;;  %v4070_v46 = vld [vmem:[#allocation10 + $0x104] ss:$24 sps:$4 sm:$0xff]  }
 0x15c   :  { %v4075_v4 = vld [vmem:[#allocation10 + $0x100] ss:$24 sps:$4 sm:$0xff]   ;;  %v4083_v34 = vld [vmem:[#allocation10 + $0xd0] ss:$24 sps:$4 sm:$0xff]  }
 0x15d   :  { %3252 = vtanh.f32 %v769_v30  ;;  %v4078_v30 = vld [vmem:[#allocation10 + $0xd4] ss:$24 sps:$4 sm:$0xff]  }
 0x15e   :  { %3254 = vrcp.f32 %v765_v26  ;;  %v4147_v26 = vld [vmem:[#allocation10 + $0x250] ss:$24 sps:$4 sm:$0xff]  }
 0x15f   :  { %3256 = vrcp.f32 %v788_v62  ;;  %v4155_v62 = vld [vmem:[#allocation10 + $0x220] ss:$24 sps:$4 sm:$0xff]  }
 0x160   :  { %5229 = vst [vmem:[#allocation53_spill] sm:$0xff] %v4155_v62 }
 0x167   :  { %v3251_v28 = vpop.eup %3250 }
 0x168   :  { %v791_v50 = vmul.f32 %v3251_v28, %v4047_v54  ;;  %v4150_v28 = vld [vmem:[#allocation10 + $0x224] ss:$24 sps:$4 sm:$0xff]  }
 0x16a   :  { %v792_v48 = vadd.f32 %v791_v50, %v778_v40  ;;  %v3253_v32 = vpop.eup %3252  ;;  %v4158_v40 = vld [vmem:[#allocation10 + $0x1f4] ss:$24 sps:$4 sm:$0xff]   ;;  %v4163_v50 = vld [vmem:[#allocation10 + $0x1f0] ss:$24 sps:$4 sm:$0xff]  }
 0x16b   :  { %v3255_v6 = vpop.eup %3254  ;;  %5230 = vst [vmem:[#allocation54_spill] sm:$0xff] %v4158_v40  ;;  %5231 = vst [vmem:[#allocation55_spill] sm:$0xff] %v4163_v50 }
 0x16c   :  { %3258 = vtanh.f32 %v792_v48  ;;  %v771_v42 = vmul.f32 %v3255_v6, %v3253_v32  ;;  %v3257_v44 = vpop.eup %3256  ;;  %v4166_v48 = vld [vmem:[#allocation10 + $0x1c4] ss:$24 sps:$4 sm:$0xff]   ;;  %v4174_v6 = vld [vmem:[#allocation10 + $0x194] ss:$24 sps:$4 sm:$0xff]  }
 0x16d   :  { %5232 = vst [vmem:[#allocation56_spill] sm:$0xff] %v4166_v48  ;;  %5234 = vst [vmem:[#allocation58_spill] sm:$0xff] %v4174_v6 }
 0x16e   :  { %v4050_v38 = vsub.f32 %v3253_v32, %v771_v42  ;;  %v4171_v32 = vld [vmem:[#allocation10 + $0x1c0] ss:$24 sps:$4 sm:$0xff]   ;;  %v4179_v42 = vld [vmem:[#allocation10 + $0x190] ss:$24 sps:$4 sm:$0xff]  }
 0x16f   :  { %5233 = vst [vmem:[#allocation57_spill] sm:$0xff] %v4171_v32  ;;  %5235 = vst [vmem:[#allocation59_spill] sm:$0xff] %v4179_v42 }
 0x170   :  { %5227 = vst [vmem:[#allocation51_spill] sm:$0xff] %v4050_v38  ;;  %v4060_v0 = vpack.c.bf16 %v4050_v38, %v4050_v38 }
 0x179   :  { %v3259_v36 = vpop.eup %3258 }
 0x17a   :  { %v794_v7 = vmul.f32 %v3259_v36, %v3257_v44  ;;  %v5236_v44 = vld [vmem:[#allocation19_spill] sm:$0xff] }
 0x17c   :  { %v4052_v58 = vsub.f32 %v3259_v36, %v794_v7  ;;  %v5238_v36 = vld [vmem:[#allocation21_spill] sm:$0xff]  ;;  %v5239_v7 = vld [vmem:[#allocation22_spill] sm:$0xff] }
 0x17e   :  { %5228 = vst [vmem:[#allocation52_spill] sm:$0xff] %v4052_v58  ;;  %v800_v9 = vpack.c.bf16 %v4052_v58, %v4052_v58 }
 0x180   :  { %1313 = vmatprep.mubr.bf16.mxu1 %v800_v9  ;;  %1354 = vmatprep.mubr.bf16.mxu0 %v800_v9 }
 0x181   :  { %1314 = vmatmul.mubr.bf16.vlgmr.msra.gmra.mxu1 %v4060_v0  ;;  %1355 = vmatmul.mubr.bf16.vlgmr.msra.gmra.mxu0 %v4060_v0 }
 0x182   :  { %1364 = vmatpush1.bf16.msra.mxu1 %v4056_v56  ;;  %1395 = vmatprep.mubr.bf16.mxu1 %v800_v9  ;;  %v5240_v9 = vld [vmem:[#allocation23_spill] sm:$0xff] }
 0x183   :  { %1365 = vmatprep.subr.bf16.mxu1 %v4062_v11  ;;  %1465 = vmatpush1.bf16.msra.mxu0 %v3762_v12  ;;  %v4086_v12 = vld [vmem:[#allocation10 + $0xa4] ss:$24 sps:$4 sm:$0xff]  }
 0x184   :  { %1466 = vmatprep.subr.bf16.mxu0 %v3768_v15  ;;  %v4091_v15 = vld [vmem:[#allocation10 + $0xa0] ss:$24 sps:$4 sm:$0xff]  }
 0x186   :  { %1366 = vmatpush1.bf16.msra.mxu1 %v4067_v2 }
 0x187   :  { %1367 = vmatprep.subr.bf16.mxu1 %v4070_v46  ;;  %1467 = vmatpush1.bf16.msra.mxu0 %v3776_v17  ;;  %v4094_v17 = vld [vmem:[#allocation10 + $0x74] ss:$24 sps:$4 sm:$0xff]  }
 0x188   :  { %1468 = vmatprep.subr.bf16.mxu0 %v3782_v19  ;;  %v4099_v19 = vld [vmem:[#allocation10 + $0x70] ss:$24 sps:$4 sm:$0xff]  }
 0x18a   :  { %1368 = vmatpush1.bf16.msra.mxu1 %v4075_v4 }
 0x18b   :  { %1369 = vmatprep.subr.bf16.mxu1 %v4078_v30  ;;  %1469 = vmatpush1.bf16.msra.mxu0 %v3788_v21  ;;  %v4102_v21 = vld [vmem:[#allocation10 + $0x44] ss:$24 sps:$4 sm:$0xff]  }
 0x18c   :  { %1470 = vmatprep.subr.bf16.mxu0 %v3794_v23  ;;  %v4107_v23 = vld [vmem:[#allocation10 + $0x40] ss:$24 sps:$4 sm:$0xff]  }
 0x18e   :  { %1370 = vmatpush1.bf16.msra.mxu1 %v4083_v34 }
 0x18f   :  { %1371 = vmatprep.subr.bf16.mxu1 %v4086_v12  ;;  %1471 = vmatpush1.bf16.msra.mxu0 %v3800_v25  ;;  %v4110_v25 = vld [vmem:[#allocation10 + $0x14] ss:$24 sps:$4 sm:$0xff]  }
 0x190   :  { %1472 = vmatprep.subr.bf16.mxu0 %v3806_v27  ;;  %v4115_v27 = vld [vmem:[#allocation10 + $0x10] ss:$24 sps:$4 sm:$0xff]  }
 0x192   :  { %1372 = vmatpush1.bf16.msra.mxu1 %v4091_v15 }
 0x193   :  { %1373 = vmatprep.subr.bf16.mxu1 %v4094_v17  ;;  %1473 = vmatpush1.bf16.msra.mxu0 %v3812_v29  ;;  %v4118_v29 = vld [vmem:[#allocation10 + $0x2e4] ss:$24 sps:$4 sm:$0xff]  }
 0x194   :  { %1474 = vmatprep.subr.bf16.mxu0 %v3818_v31  ;;  %v4123_v31 = vld [vmem:[#allocation10 + $0x2e0] ss:$24 sps:$4 sm:$0xff]  }
 0x196   :  { %1374 = vmatpush1.bf16.msra.mxu1 %v4099_v19 }
 0x197   :  { %1375 = vmatprep.subr.bf16.mxu1 %v4102_v21  ;;  %1475 = vmatpush1.bf16.msra.mxu0 %v3824_v33  ;;  %v4126_v33 = vld [vmem:[#allocation10 + $0x2b4] ss:$24 sps:$4 sm:$0xff]  }
 0x198   :  { %1476 = vmatprep.subr.bf16.mxu0 %v3830_v35  ;;  %v4131_v35 = vld [vmem:[#allocation10 + $0x2b0] ss:$24 sps:$4 sm:$0xff]  }
 0x19a   :  { %1376 = vmatpush1.bf16.msra.mxu1 %v4107_v23 }
 0x19b   :  { %1377 = vmatprep.subr.bf16.mxu1 %v4110_v25  ;;  %1477 = vmatpush1.bf16.msra.mxu0 %v3836_v37  ;;  %v4134_v37 = vld [vmem:[#allocation10 + $0x284] ss:$24 sps:$4 sm:$0xff]  }
 0x19c   :  { %1478 = vmatprep.subr.bf16.mxu0 %v3842_v39  ;;  %v4139_v39 = vld [vmem:[#allocation10 + $0x280] ss:$24 sps:$4 sm:$0xff]  }
 0x19e   :  { %1378 = vmatpush1.bf16.msra.mxu1 %v4115_v27 }
 0x19f   :  { %1379 = vmatprep.subr.bf16.mxu1 %v4118_v29  ;;  %1479 = vmatpush1.bf16.msra.mxu0 %v3848_v41  ;;  %v4142_v41 = vld [vmem:[#allocation10 + $0x254] ss:$24 sps:$4 sm:$0xff]  }
 0x1a0   :  { %1480 = vmatprep.subr.bf16.mxu0 %v3854_v43 }
 0x1a2   :  { %1380 = vmatpush2.bf16.msra.mxu1 %v4123_v31 }
 0x1a3   :  { %1381 = vmatprep.subr.bf16.mxu1 %v4126_v33  ;;  %1481 = vmatpush2.bf16.msra.mxu0 %v3860_v45 }
 0x1a4   :  { %1482 = vmatprep.subr.bf16.mxu0 %v3866_v47 }
 0x1a6   :  { %1382 = vmatpush2.bf16.msra.mxu1 %v4131_v35 }
 0x1a7   :  { %1383 = vmatprep.subr.bf16.mxu1 %v4134_v37  ;;  %1483 = vmatpush2.bf16.msra.mxu0 %v3872_v49 }
 0x1a8   :  { %1484 = vmatprep.subr.bf16.mxu0 %v3878_v51 }
 0x1aa   :  { %1384 = vmatpush2.bf16.msra.mxu1 %v4139_v39 }
 0x1ab   :  { %1385 = vmatprep.subr.bf16.mxu1 %v4142_v41  ;;  %1485 = vmatpush2.bf16.msra.mxu0 %v3884_v53 }
 0x1ac   :  { %1486 = vmatprep.subr.bf16.mxu0 %v3890_v55 }
 0x1ae   :  { %1386 = vmatpush2.bf16.msra.mxu1 %v4147_v26 }
 0x1af   :  { %1387 = vmatprep.subr.bf16.mxu1 %v4150_v28  ;;  %1487 = vmatpush2.bf16.msra.mxu0 %v3896_v57 }
 0x1b0   :  { %1488 = vmatprep.subr.bf16.mxu0 %v3902_v59 }
 0x1b2   :  { %1388 = vmatpush2.bf16.msra.mxu1 %v4155_v62 }
 0x1b3   :  { %1389 = vmatprep.subr.bf16.mxu1 %v4158_v40  ;;  %1489 = vmatpush2.bf16.msra.mxu0 %v3908_v61 }
 0x1b4   :  { %1490 = vmatprep.subr.bf16.mxu0 %v3914_v63 }
 0x1b6   :  { %1390 = vmatpush2.bf16.msra.mxu1 %v4163_v50 }
 0x1b7   :  { %1391 = vmatprep.subr.bf16.mxu1 %v4166_v48  ;;  %1491 = vmatpush2.bf16.msra.mxu0 %v3920_v1 }
 0x1b8   :  { %1492 = vmatprep.subr.bf16.mxu0 %v3926_v3 }
 0x1ba   :  { %1392 = vmatpush2.bf16.msra.mxu1 %v4171_v32 }
 0x1bb   :  { %1393 = vmatprep.subr.bf16.mxu1 %v4174_v6  ;;  %1493 = vmatpush2.bf16.msra.mxu0 %v3932_v5 }
 0x1bc   :  { %1494 = vmatprep.subr.bf16.mxu0 %v3938_v8 }
 0x1be   :  { %1394 = vmatpush2.bf16.msra.mxu1 %v4179_v42 }
 0x1bf   :  { %1505 = vmatprep.subr.bf16.mxu1 %v3764_v13  ;;  %1495 = vmatpush2.bf16.msra.mxu0 %v3944_v10  ;;  %v5237_v13 = vld [vmem:[#allocation20_spill] sm:$0xff] }
 0x1c0   :  { %1546 = vmatprep.subr.bf16.mxu0 %v3959_v60 }
 0x1c1   :  { %1396 = vmatmul.mubr.bf16.vlgmr.msra.gmra.mxu1 %v4060_v0  ;;  %v5247_v0 = vld [vmem:[#allocation30_spill] sm:$0xff] }
 0x1c2   :  { %1506 = vmatpush1.bf16.msra.mxu1 %v3766_v14  ;;  %v5241_v14 = vld [vmem:[#allocation24_spill] sm:$0xff] }
 0x1c3   :  { %1507 = vmatprep.subr.bf16.mxu1 %v3772_v16  ;;  %v5242_v16 = vld [vmem:[#allocation25_spill] sm:$0xff] }
 0x1c6   :  { %1508 = vmatpush1.bf16.msra.mxu1 %v3778_v18  ;;  %v5243_v18 = vld [vmem:[#allocation26_spill] sm:$0xff] }
 0x1c7   :  { %1509 = vmatprep.subr.bf16.mxu1 %v3784_v20  ;;  %v5244_v20 = vld [vmem:[#allocation27_spill] sm:$0xff] }
 0x1ca   :  { %1510 = vmatpush1.bf16.msra.mxu1 %v3790_v22  ;;  %v5245_v22 = vld [vmem:[#allocation28_spill] sm:$0xff] }
 0x1cb   :  { %1511 = vmatprep.subr.bf16.mxu1 %v3796_v24  ;;  %v5246_v24 = vld [vmem:[#allocation29_spill] sm:$0xff] }
 0x1ce   :  { %1512 = vmatpush1.bf16.msra.mxu1 %v5236_v44  ;;  %v5248_v44 = vld [vmem:[#allocation31_spill] sm:$0xff] }
 0x1cf   :  { %1513 = vmatprep.subr.bf16.mxu1 %v5237_v13  ;;  %v5249_v13 = vld [vmem:[#allocation32_spill] sm:$0xff] }
 0x1d2   :  { %1514 = vmatpush1.bf16.msra.mxu1 %v5238_v36  ;;  %v5250_v36 = vld [vmem:[#allocation33_spill] sm:$0xff] }
 0x1d3   :  { %1515 = vmatprep.subr.bf16.mxu1 %v5239_v7  ;;  %v5251_v7 = vld [vmem:[#allocation34_spill] sm:$0xff] }
 0x1d6   :  { %1516 = vmatpush1.bf16.msra.mxu1 %v5240_v9  ;;  %v5252_v9 = vld [vmem:[#allocation35_spill] sm:$0xff] }
 0x1d7   :  { %1517 = vmatprep.subr.bf16.mxu1 %v5241_v14  ;;  %v5253_v14 = vld [vmem:[#allocation36_spill] sm:$0xff] }
 0x1da   :  { %1518 = vmatpush1.bf16.msra.mxu1 %v5242_v16  ;;  %v5254_v16 = vld [vmem:[#allocation37_spill] sm:$0xff] }
 0x1db   :  { %1519 = vmatprep.subr.bf16.mxu1 %v5243_v18  ;;  %v5255_v18 = vld [vmem:[#allocation38_spill] sm:$0xff] }
 0x1de   :  { %1520 = vmatpush1.bf16.msra.mxu1 %v5244_v20  ;;  %v5256_v20 = vld [vmem:[#allocation40_spill] sm:$0xff] }
 0x1df   :  { %1521 = vmatprep.subr.bf16.mxu1 %v5245_v22  ;;  %v5257_v22 = vld [vmem:[#allocation42_spill] sm:$0xff] }
 0x1e2   :  { %1522 = vmatpush2.bf16.msra.mxu1 %v5246_v24  ;;  %v5258_v24 = vld [vmem:[#allocation44_spill] sm:$0xff] }
 0x1e3   :  { %1523 = vmatprep.subr.bf16.mxu1 %v5247_v0  ;;  %v5259_v0 = vld [vmem:[#allocation46_spill] sm:$0xff] }
 0x1e6   :  { %1524 = vmatpush2.bf16.msra.mxu1 %v5248_v44  ;;  %v5260_v44 = vld [vmem:[#allocation48_spill] sm:$0xff] }
 0x1e7   :  { %1525 = vmatprep.subr.bf16.mxu1 %v5249_v13  ;;  %v5261_v13 = vld [vmem:[#allocation18_spill] sm:$0xff] }
 0x1ea   :  { %1526 = vmatpush2.bf16.msra.mxu1 %v5250_v36  ;;  %v5262_v36 = vld [vmem:[#allocation50_spill] sm:$0xff] }
 0x1eb   :  { %1527 = vmatprep.subr.bf16.mxu1 %v5251_v7  ;;  %v1407_v7 = vunpack.c.l.bf16 %v5262_v36 }
 0x1ee   :  { %1528 = vmatpush2.bf16.msra.mxu1 %v5252_v9 }
 0x1ef   :  { %1529 = vmatprep.subr.bf16.mxu1 %v5253_v14 }
 0x1f2   :  { %1530 = vmatpush2.bf16.msra.mxu1 %v5254_v16 }
 0x1f3   :  { %1531 = vmatprep.subr.bf16.mxu1 %v5255_v18 }
 0x1f6   :  { %1532 = vmatpush2.bf16.msra.mxu1 %v5256_v20 }
 0x1f7   :  { %1533 = vmatprep.subr.bf16.mxu1 %v5257_v22 }
 0x1fa   :  { %1534 = vmatpush2.bf16.msra.mxu1 %v5258_v24  ;;  %v1408_v24 = vunpack.c.h.bf16 %v5262_v36 }
 0x1fb   :  { %1535 = vmatprep.subr.bf16.mxu1 %v5259_v0 }
 0x1fe   :  { %1536 = vmatpush2.bf16.msra.mxu1 %v5260_v44 }
 0x1ff   :  { %1647 = vmatprep.subr.bf16.mxu1 %v5261_v13  ;;  %v1432_v13 = vld [vmem:[#allocation2 + $0x9c] sm:$0xff] }
 0x200   :  { %v1434_v32 = vunpack.c.l.bf16 %v1432_v13 }
 0x241   :  { %v1315_v9 = vpop.f32.mrf.mxu1  ;;  %v1356_v14 = vpop.f32.mrf.mxu0 }
 0x242   :  { %v1410_v60 = vadd.f32 %v1407_v7, %v1315_v9  ;;  %v1406_v7 = vld [vmem:[#allocation2 + $0x20] ss:$132 sps:$4 sm:$0xff]  }
 0x243   :  { %v1317_v16 = vpop.f32.mrf.mxu1  ;;  %v1358_v10 = vpop.f32.mrf.mxu0 }
 0x244   :  { %v2943_v18 = vmul.f32 -1.442695, %v1410_v60  ;;  %v1417_v0 = vadd.f32 %v1408_v24, %v1317_v16  ;;  %v1437_v3 = vadd.f32 %v1434_v32, %v1358_v10  ;;  %v1424_v60 = vadd.f32 %v4041_v52, %v1356_v14 }
 0x245   :  { %v1319_v42 = vpop.f32.mrf.mxu1  ;;  %v1360_v20 = vpop.f32.mrf.mxu0  ;;  %v1435_v14 = vunpack.c.h.bf16 %v1432_v13 }
 0x246   :  { %3260 = vpow2.f32 %v2943_v18  ;;  %v2944_v5 = vmul.f32 -1.442695, %v1417_v0  ;;  %v2945_v20 = vmul.f32 -1.442695, %v1437_v3  ;;  %v1409_v18 = vunpack.c.l.bf16 %v1406_v7 }
 0x247   :  { %v1320_v22 = vpop.f32.mrf.mxu1  ;;  %v1361_v8 = vpop.f32.mrf.mxu0 }
 0x248   :  { %3262 = vpow2.f32 %v2944_v5 }
 0x253   :  { %v3261_v44 = vpop.eup %3260 }
 0x254   :  { %v1414_v6 = vadd.f32 1.0, %v3261_v44 }
 0x255   :  { %v3263_v9 = vpop.eup %3262 }
 0x256   :  { %3264 = vrcp.f32 %v1414_v6  ;;  %v1421_v1 = vadd.f32 1.0, %v3263_v9 }
 0x257   :  { %3266 = vpow2.f32 %v2945_v20 }
 0x263   :  { %v3265_v42 = vpop.eup %3264 }
 0x264   :  { %v1425_v22 = vmul.f32 %v3265_v42, %v1424_v60  ;;  %v3267_v36 = vpop.eup %3266 }
 0x265   :  { %v1441_v24 = vadd.f32 1.0, %v3267_v36 }
 0x266   :  { %v1426_v8 = vadd.f32 %v1425_v22, %v1409_v18  ;;  %v1436_v22 = vunpack.c.h.bf16 %v1406_v7  ;;  %v4241_v7 = vld [vmem:[#allocation10 + $0x150] ss:$24 sps:$4 sm:$0xff]  }
 0x268   :  { %3268 = vtanh.f32 %v1426_v8 }
 0x269   :  { %3270 = vrcp.f32 %v1421_v1 }
 0x26a   :  { %3272 = vrcp.f32 %v1441_v24 }
 0x275   :  { %v3269_v16 = vpop.eup %3268 }
 0x276   :  { %v1428_v5 = vsub.f32 %v4050_v38, %v3269_v16  ;;  %v3271_v6 = vpop.eup %3270  ;;  %v4372_v38 = vld [vmem:[#allocation10 + $0x38] ss:$24 sps:$4 sm:$0xff]  }
 0x277   :  { %v3273_v20 = vpop.eup %3272  ;;  %5287 = vst [vmem:[#allocation34_spill] sm:$0xff] %v4372_v38 }
 0x278   :  { %v1429_v10 = vmul.f32 %v3271_v6, %v1428_v5 }
 0x27a   :  { %v4225_v32 = vadd.f32 %v3269_v16, %v1429_v10 }
 0x27c   :  { %5263 = vst [vmem:[#allocation19_spill] sm:$0xff] %v4225_v32 }
 0x281   :  { %v1397_v0 = vpop.f32.mrf.mxu1 }
 0x282   :  { %v1444_v3 = vadd.f32 %v1435_v14, %v1397_v0  ;;  %v4235_v0 = vpack.c.bf16 %v4225_v32, %v4225_v32 }
 0x283   :  { %v1399_v44 = vpop.f32.mrf.mxu1 }
 0x284   :  { %v2946_v60 = vmul.f32 -1.442695, %v1444_v3  ;;  %v1451_v9 = vadd.f32 %v4047_v54, %v1399_v44  ;;  %v4244_v3 = vld [vmem:[#allocation10 + $0x124] ss:$24 sps:$4 sm:$0xff]   ;;  %v4249_v44 = vld [vmem:[#allocation10 + $0x120] ss:$24 sps:$4 sm:$0xff]  }
 0x285   :  { %v1401_v42 = vpop.f32.mrf.mxu1 }
 0x286   :  { %3274 = vpow2.f32 %v2946_v60  ;;  %v1452_v18 = vmul.f32 %v3273_v20, %v1451_v9  ;;  %v4252_v60 = vld [vmem:[#allocation10 + $0xf4] ss:$24 sps:$4 sm:$0xff]   ;;  %v4257_v42 = vld [vmem:[#allocation10 + $0xf0] ss:$24 sps:$4 sm:$0xff]   ;;  %v4260_v9 = vld [vmem:[#allocation10 + $0xc4] ss:$24 sps:$4 sm:$0xff]  }
 0x287   :  { %v1402_v1 = vpop.f32.mrf.mxu1  ;;  %v4268_v20 = vld [vmem:[#allocation10 + $0x94] ss:$24 sps:$4 sm:$0xff]  }
 0x288   :  { %v1453_v8 = vadd.f32 %v1452_v18, %v1436_v22  ;;  %v4265_v1 = vld [vmem:[#allocation10 + $0xc0] ss:$24 sps:$4 sm:$0xff]   ;;  %v4273_v18 = vld [vmem:[#allocation10 + $0x90] ss:$24 sps:$4 sm:$0xff]   ;;  %v4276_v22 = vld [vmem:[#allocation10 + $0x64] ss:$24 sps:$4 sm:$0xff]  }
 0x28a   :  { %3276 = vtanh.f32 %v1453_v8  ;;  %v4281_v8 = vld [vmem:[#allocation10 + $0x60] ss:$24 sps:$4 sm:$0xff]  }
 0x293   :  { %v3275_v36 = vpop.eup %3274 }
 0x294   :  { %v1448_v5 = vadd.f32 1.0, %v3275_v36  ;;  %v4284_v36 = vld [vmem:[#allocation10 + $0x34] ss:$24 sps:$4 sm:$0xff]  }
 0x296   :  { %3278 = vrcp.f32 %v1448_v5  ;;  %v4289_v5 = vld [vmem:[#allocation10 + $0x30] ss:$24 sps:$4 sm:$0xff]  }
 0x297   :  { %v3277_v16 = vpop.eup %3276 }
 0x298   :  { %v1455_v13 = vsub.f32 %v4052_v58, %v3277_v16  ;;  %v4369_v58 = vld [vmem:[#allocation10 + $0x3c] ss:$24 sps:$4 sm:$0xff]  }
 0x299   :  { %5286 = vst [vmem:[#allocation33_spill] sm:$0xff] %v4369_v58 }
 0x2a3   :  { %v3279_v6 = vpop.eup %3278 }
 0x2a4   :  { %v1456_v24 = vmul.f32 %v3279_v6, %v1455_v13  ;;  %v4297_v13 = vld [vmem:[#allocation10] ss:$24 sps:$4 sm:$0xff]   ;;  %v4339_v6 = vld [vmem:[#allocation10 + $0x12c] ss:$24 sps:$4 sm:$0xff]  }
 0x2a5   :  { %5276 = vst [vmem:[#allocation23_spill] sm:$0xff] %v4339_v6 }
 0x2a6   :  { %v4229_v10 = vadd.f32 %v3277_v16, %v1456_v24  ;;  %v4292_v16 = vld [vmem:[#allocation10 + $0x4] ss:$24 sps:$4 sm:$0xff]   ;;  %v4342_v24 = vld [vmem:[#allocation10 + $0x128] ss:$24 sps:$4 sm:$0xff]  }
 0x2a7   :  { %5277 = vst [vmem:[#allocation24_spill] sm:$0xff] %v4342_v24 }
 0x2a8   :  { %5264 = vst [vmem:[#allocation20_spill] sm:$0xff] %v4229_v10  ;;  %v1463_v14 = vpack.c.bf16 %v4229_v10, %v4229_v10 }
 0x2aa   :  { %1496 = vmatprep.mubr.bf16.mxu0 %v1463_v14  ;;  %1537 = vmatprep.mubr.bf16.mxu1 %v1463_v14 }
 0x2ab   :  { %1497 = vmatmul.mubr.bf16.vlgmr.msra.gmra.mxu0 %v4235_v0  ;;  %1538 = vmatmul.mubr.bf16.vlgmr.msra.gmra.mxu1 %v4235_v0 }
 0x2ac   :  { %1547 = vmatpush1.bf16.msra.mxu0 %v4056_v56  ;;  %1578 = vmatprep.mubr.bf16.mxu0 %v1463_v14  ;;  %v4345_v14 = vld [vmem:[#allocation10 + $0xfc] ss:$24 sps:$4 sm:$0xff]  }
 0x2ad   :  { %1548 = vmatprep.subr.bf16.mxu0 %v4062_v11  ;;  %1648 = vmatpush1.bf16.msra.mxu1 %v4241_v7  ;;  %5278 = vst [vmem:[#allocation25_spill] sm:$0xff] %v4345_v14 }
 0x2ae   :  { %1649 = vmatprep.subr.bf16.mxu1 %v4244_v3 }
 0x2b0   :  { %1549 = vmatpush1.bf16.msra.mxu0 %v4067_v2 }
 0x2b1   :  { %1550 = vmatprep.subr.bf16.mxu0 %v4070_v46  ;;  %1650 = vmatpush1.bf16.msra.mxu1 %v4249_v44 }
 0x2b2   :  { %1651 = vmatprep.subr.bf16.mxu1 %v4252_v60 }
 0x2b4   :  { %1551 = vmatpush1.bf16.msra.mxu0 %v4075_v4 }
 0x2b5   :  { %1552 = vmatprep.subr.bf16.mxu0 %v4078_v30  ;;  %1652 = vmatpush1.bf16.msra.mxu1 %v4257_v42 }
 0x2b6   :  { %1653 = vmatprep.subr.bf16.mxu1 %v4260_v9 }
 0x2b8   :  { %1553 = vmatpush1.bf16.msra.mxu0 %v4083_v34 }
 0x2b9   :  { %1554 = vmatprep.subr.bf16.mxu0 %v4086_v12  ;;  %1654 = vmatpush1.bf16.msra.mxu1 %v4265_v1 }
 0x2ba   :  { %1655 = vmatprep.subr.bf16.mxu1 %v4268_v20 }
 0x2bc   :  { %1555 = vmatpush1.bf16.msra.mxu0 %v4091_v15 }
 0x2bd   :  { %1556 = vmatprep.subr.bf16.mxu0 %v4094_v17  ;;  %1656 = vmatpush1.bf16.msra.mxu1 %v4273_v18 }
 0x2be   :  { %1657 = vmatprep.subr.bf16.mxu1 %v4276_v22 }
 0x2c0   :  { %1557 = vmatpush1.bf16.msra.mxu0 %v4099_v19 }
 0x2c1   :  { %1558 = vmatprep.subr.bf16.mxu0 %v4102_v21  ;;  %1658 = vmatpush1.bf16.msra.mxu1 %v4281_v8 }
 0x2c2   :  { %1659 = vmatprep.subr.bf16.mxu1 %v4284_v36 }
 0x2c4   :  { %1559 = vmatpush1.bf16.msra.mxu0 %v4107_v23 }
 0x2c5   :  { %1560 = vmatprep.subr.bf16.mxu0 %v4110_v25  ;;  %1660 = vmatpush1.bf16.msra.mxu1 %v4289_v5 }
 0x2c6   :  { %1661 = vmatprep.subr.bf16.mxu1 %v4292_v16 }
 0x2c8   :  { %1561 = vmatpush1.bf16.msra.mxu0 %v4115_v27 }
 0x2c9   :  { %1562 = vmatprep.subr.bf16.mxu0 %v4118_v29  ;;  %1662 = vmatpush1.bf16.msra.mxu1 %v4297_v13 }
 0x2ca   :  { %1663 = vmatprep.subr.bf16.mxu1 %v3854_v43  ;;  %v5265_v43 = vld [vmem:[#allocation39_spill] sm:$0xff] }
 0x2cc   :  { %1563 = vmatpush2.bf16.msra.mxu0 %v4123_v31 }
 0x2cd   :  { %1564 = vmatprep.subr.bf16.mxu0 %v4126_v33  ;;  %1664 = vmatpush2.bf16.msra.mxu1 %v3860_v45  ;;  %v5266_v45 = vld [vmem:[#allocation41_spill] sm:$0xff] }
 0x2ce   :  { %1665 = vmatprep.subr.bf16.mxu1 %v3866_v47  ;;  %v5267_v47 = vld [vmem:[#allocation57_spill] sm:$0xff] }
 0x2d0   :  { %1565 = vmatpush2.bf16.msra.mxu0 %v4131_v35 }
 0x2d1   :  { %1566 = vmatprep.subr.bf16.mxu0 %v4134_v37  ;;  %1666 = vmatpush2.bf16.msra.mxu1 %v3872_v49  ;;  %v5268_v49 = vld [vmem:[#allocation58_spill] sm:$0xff] }
 0x2d2   :  { %1667 = vmatprep.subr.bf16.mxu1 %v3878_v51  ;;  %v5269_v51 = vld [vmem:[#allocation43_spill] sm:$0xff] }
 0x2d4   :  { %1567 = vmatpush2.bf16.msra.mxu0 %v4139_v39 }
 0x2d5   :  { %1568 = vmatprep.subr.bf16.mxu0 %v4142_v41  ;;  %1668 = vmatpush2.bf16.msra.mxu1 %v3884_v53  ;;  %v5270_v53 = vld [vmem:[#allocation45_spill] sm:$0xff] }
 0x2d6   :  { %1669 = vmatprep.subr.bf16.mxu1 %v3890_v55  ;;  %v5271_v55 = vld [vmem:[#allocation59_spill] sm:$0xff] }
 0x2d8   :  { %1569 = vmatpush2.bf16.msra.mxu0 %v4147_v26 }
 0x2d9   :  { %1570 = vmatprep.subr.bf16.mxu0 %v4150_v28  ;;  %1670 = vmatpush2.bf16.msra.mxu1 %v3896_v57  ;;  %v4330_v57 = vld [vmem:[#allocation10 + $0x15c] ss:$24 sps:$4 sm:$0xff]  }
 0x2da   :  { %1671 = vmatprep.subr.bf16.mxu1 %v3902_v59  ;;  %5272 = vst [vmem:[#allocation21_spill] sm:$0xff] %v4330_v57  ;;  %v5273_v59 = vld [vmem:[#allocation47_spill] sm:$0xff] }
 0x2dc   :  { %1571 = vmatpush2.bf16.msra.mxu0 %v4155_v62 }
 0x2dd   :  { %1572 = vmatprep.subr.bf16.mxu0 %v4158_v40  ;;  %1672 = vmatpush2.bf16.msra.mxu1 %v3908_v61  ;;  %v5274_v61 = vld [vmem:[#allocation49_spill] sm:$0xff] }
 0x2de   :  { %1673 = vmatprep.subr.bf16.mxu1 %v3914_v63  ;;  %v4336_v63 = vld [vmem:[#allocation10 + $0x158] ss:$24 sps:$4 sm:$0xff]  }
 0x2df   :  { %5275 = vst [vmem:[#allocation22_spill] sm:$0xff] %v4336_v63 }
 0x2e0   :  { %1573 = vmatpush2.bf16.msra.mxu0 %v4163_v50 }
 0x2e1   :  { %1574 = vmatprep.subr.bf16.mxu0 %v4166_v48  ;;  %1674 = vmatpush2.bf16.msra.mxu1 %v5265_v43  ;;  %v4348_v43 = vld [vmem:[#allocation10 + $0xf8] ss:$24 sps:$4 sm:$0xff]  }
 0x2e2   :  { %1675 = vmatprep.subr.bf16.mxu1 %v5266_v45  ;;  %5279 = vst [vmem:[#allocation26_spill] sm:$0xff] %v4348_v43  ;;  %v4354_v45 = vld [vmem:[#allocation10 + $0xc8] ss:$24 sps:$4 sm:$0xff]  }
 0x2e3   :  { %5281 = vst [vmem:[#allocation28_spill] sm:$0xff] %v4354_v45 }
 0x2e4   :  { %1575 = vmatpush2.bf16.msra.mxu0 %v5267_v47 }
 0x2e5   :  { %1576 = vmatprep.subr.bf16.mxu0 %v5268_v49  ;;  %1676 = vmatpush2.bf16.msra.mxu1 %v5269_v51  ;;  %v4357_v51 = vld [vmem:[#allocation10 + $0x9c] ss:$24 sps:$4 sm:$0xff]  }
 0x2e6   :  { %1677 = vmatprep.subr.bf16.mxu1 %v5270_v53  ;;  %5282 = vst [vmem:[#allocation29_spill] sm:$0xff] %v4357_v51  ;;  %v4360_v53 = vld [vmem:[#allocation10 + $0x98] ss:$24 sps:$4 sm:$0xff]  }
 0x2e7   :  { %5283 = vst [vmem:[#allocation30_spill] sm:$0xff] %v4360_v53 }
 0x2e8   :  { %1577 = vmatpush2.bf16.msra.mxu0 %v5271_v55 }
 0x2e9   :  { %1688 = vmatprep.subr.bf16.mxu0 %v4330_v57  ;;  %1678 = vmatpush2.bf16.msra.mxu1 %v5273_v59  ;;  %v4363_v59 = vld [vmem:[#allocation10 + $0x6c] ss:$24 sps:$4 sm:$0xff]  }
 0x2ea   :  { %1729 = vmatprep.subr.bf16.mxu1 %v5274_v61  ;;  %5284 = vst [vmem:[#allocation31_spill] sm:$0xff] %v4363_v59  ;;  %v4366_v61 = vld [vmem:[#allocation10 + $0x68] ss:$24 sps:$4 sm:$0xff]  }
 0x2eb   :  { %1579 = vmatmul.mubr.bf16.vlgmr.msra.gmra.mxu0 %v4235_v0  ;;  %v4351_v0 = vld [vmem:[#allocation10 + $0xcc] ss:$24 sps:$4 sm:$0xff]   ;;  %5285 = vst [vmem:[#allocation32_spill] sm:$0xff] %v4366_v61 }
 0x2ec   :  { %1689 = vmatpush1.bf16.msra.mxu0 %v4336_v63  ;;  %5280 = vst [vmem:[#allocation27_spill] sm:$0xff] %v4351_v0 }
 0x2ed   :  { %1690 = vmatprep.subr.bf16.mxu0 %v4339_v6  ;;  %v1588_v6 = vld [vmem:[#allocation2 + $0x30] sm:$0xff] }
 0x2ee   :  { %v1590_v63 = vunpack.c.l.bf16 %v1588_v6  ;;  %v1591_v40 = vunpack.c.h.bf16 %v1588_v6 }
 0x2f0   :  { %1691 = vmatpush1.bf16.msra.mxu0 %v4342_v24 }
 0x2f1   :  { %1692 = vmatprep.subr.bf16.mxu0 %v4345_v14 }
 0x2f4   :  { %1693 = vmatpush1.bf16.msra.mxu0 %v4348_v43 }
 0x2f5   :  { %1694 = vmatprep.subr.bf16.mxu0 %v4351_v0 }
 0x2f8   :  { %1695 = vmatpush1.bf16.msra.mxu0 %v4354_v45 }
 0x2f9   :  { %1696 = vmatprep.subr.bf16.mxu0 %v4357_v51  ;;  %v4375_v51 = vld [vmem:[#allocation10 + $0xc] ss:$24 sps:$4 sm:$0xff]  }
 0x2fa   :  { %5288 = vst [vmem:[#allocation35_spill] sm:$0xff] %v4375_v51 }
 0x2fc   :  { %1697 = vmatpush1.bf16.msra.mxu0 %v4360_v53  ;;  %v4378_v53 = vld [vmem:[#allocation10 + $0x8] ss:$24 sps:$4 sm:$0xff]  }
 0x2fd   :  { %1698 = vmatprep.subr.bf16.mxu0 %v4363_v59  ;;  %5289 = vst [vmem:[#allocation36_spill] sm:$0xff] %v4378_v53  ;;  %v4381_v59 = vld [vmem:[#allocation10 + $0x2dc] ss:$24 sps:$4 sm:$0xff]  }
 0x2fe   :  { %5290 = vst [vmem:[#allocation37_spill] sm:$0xff] %v4381_v59 }
 0x300   :  { %1699 = vmatpush1.bf16.msra.mxu0 %v4366_v61  ;;  %v4384_v61 = vld [vmem:[#allocation10 + $0x2d8] ss:$24 sps:$4 sm:$0xff]  }
 0x301   :  { %1700 = vmatprep.subr.bf16.mxu0 %v4369_v58  ;;  %5291 = vst [vmem:[#allocation38_spill] sm:$0xff] %v4384_v61  ;;  %v4387_v58 = vld [vmem:[#allocation10 + $0x2ac] ss:$24 sps:$4 sm:$0xff]  }
 0x302   :  { %5292 = vst [vmem:[#allocation40_spill] sm:$0xff] %v4387_v58 }
 0x304   :  { %1701 = vmatpush1.bf16.msra.mxu0 %v4372_v38  ;;  %v4390_v38 = vld [vmem:[#allocation10 + $0x2a8] ss:$24 sps:$4 sm:$0xff]  }
 0x305   :  { %1702 = vmatprep.subr.bf16.mxu0 %v4375_v51  ;;  %5293 = vst [vmem:[#allocation42_spill] sm:$0xff] %v4390_v38  ;;  %v4393_v51 = vld [vmem:[#allocation10 + $0x27c] ss:$24 sps:$4 sm:$0xff]  }
 0x306   :  { %5294 = vst [vmem:[#allocation44_spill] sm:$0xff] %v4393_v51 }
 0x308   :  { %1703 = vmatpush1.bf16.msra.mxu0 %v4378_v53  ;;  %v4396_v53 = vld [vmem:[#allocation10 + $0x278] ss:$24 sps:$4 sm:$0xff]  }
 0x309   :  { %1704 = vmatprep.subr.bf16.mxu0 %v4381_v59  ;;  %5295 = vst [vmem:[#allocation46_spill] sm:$0xff] %v4396_v53  ;;  %v4399_v59 = vld [vmem:[#allocation10 + $0x24c] ss:$24 sps:$4 sm:$0xff]  }
 0x30a   :  { %5296 = vst [vmem:[#allocation48_spill] sm:$0xff] %v4399_v59 }
 0x30c   :  { %1705 = vmatpush2.bf16.msra.mxu0 %v4384_v61  ;;  %v4402_v61 = vld [vmem:[#allocation10 + $0x248] ss:$24 sps:$4 sm:$0xff]  }
 0x30d   :  { %1706 = vmatprep.subr.bf16.mxu0 %v4387_v58  ;;  %5297 = vst [vmem:[#allocation18_spill] sm:$0xff] %v4402_v61  ;;  %v4405_v58 = vld [vmem:[#allocation10 + $0x21c] ss:$24 sps:$4 sm:$0xff]  }
 0x30e   :  { %5298 = vst [vmem:[#allocation50_spill] sm:$0xff] %v4405_v58 }
 0x310   :  { %1707 = vmatpush2.bf16.msra.mxu0 %v4390_v38  ;;  %v4408_v38 = vld [vmem:[#allocation10 + $0x218] ss:$24 sps:$4 sm:$0xff]  }
 0x311   :  { %1708 = vmatprep.subr.bf16.mxu0 %v4393_v51  ;;  %5299 = vst [vmem:[#allocation39_spill] sm:$0xff] %v4408_v38  ;;  %v4411_v51 = vld [vmem:[#allocation10 + $0x1ec] ss:$24 sps:$4 sm:$0xff]  }
 0x312   :  { %5300 = vst [vmem:[#allocation41_spill] sm:$0xff] %v4411_v51 }
 0x314   :  { %1709 = vmatpush2.bf16.msra.mxu0 %v4396_v53  ;;  %v4414_v53 = vld [vmem:[#allocation10 + $0x1e8] ss:$24 sps:$4 sm:$0xff]  }
 0x315   :  { %1710 = vmatprep.subr.bf16.mxu0 %v4399_v59  ;;  %5301 = vst [vmem:[#allocation43_spill] sm:$0xff] %v4414_v53  ;;  %v4417_v59 = vld [vmem:[#allocation10 + $0x1bc] ss:$24 sps:$4 sm:$0xff]  }
 0x316   :  { %5302 = vst [vmem:[#allocation45_spill] sm:$0xff] %v4417_v59 }
 0x318   :  { %1711 = vmatpush2.bf16.msra.mxu0 %v4402_v61  ;;  %v4420_v61 = vld [vmem:[#allocation10 + $0x1b8] ss:$24 sps:$4 sm:$0xff]  }
 0x319   :  { %1712 = vmatprep.subr.bf16.mxu0 %v4405_v58  ;;  %5303 = vst [vmem:[#allocation47_spill] sm:$0xff] %v4420_v61  ;;  %v4423_v58 = vld [vmem:[#allocation10 + $0x18c] ss:$24 sps:$4 sm:$0xff]  }
 0x31a   :  { %5304 = vst [vmem:[#allocation49_spill] sm:$0xff] %v4423_v58 }
 0x31c   :  { %1713 = vmatpush2.bf16.msra.mxu0 %v4408_v38  ;;  %v4426_v38 = vld [vmem:[#allocation10 + $0x188] ss:$24 sps:$4 sm:$0xff]  }
 0x31d   :  { %1714 = vmatprep.subr.bf16.mxu0 %v4411_v51  ;;  %5305 = vst [vmem:[#allocation60_spill] sm:$0xff] %v4426_v38  ;;  %v4429_v51 = vld [vmem:[#allocation10 + $0x154] ss:$24 sps:$4 sm:$0xff]  }
 0x31e   :  { %5306 = vst [vmem:[#allocation61_spill] sm:$0xff] %v4429_v51 }
 0x320   :  { %1715 = vmatpush2.bf16.msra.mxu0 %v4414_v53 }
 0x321   :  { %1716 = vmatprep.subr.bf16.mxu0 %v4417_v59 }
 0x324   :  { %1717 = vmatpush2.bf16.msra.mxu0 %v4420_v61 }
 0x325   :  { %1718 = vmatprep.subr.bf16.mxu0 %v4423_v58  ;;  %v1615_v58 = vld [vmem:[#allocation2 + $0x84] sm:$0xff] }
 0x326   :  { %v1617_v49 = vunpack.c.l.bf16 %v1615_v58 }
 0x328   :  { %1719 = vmatpush2.bf16.msra.mxu0 %v4426_v38 }
 0x329   :  { %1830 = vmatprep.subr.bf16.mxu0 %v4429_v51 }
 0x36b   :  { %v1498_v53 = vpop.f32.mrf.mxu0  ;;  %v1539_v45 = vpop.f32.mrf.mxu1 }
 0x36c   :  { %v1593_v57 = vadd.f32 %v1590_v63, %v1498_v53 }
 0x36d   :  { %v1500_v0 = vpop.f32.mrf.mxu0  ;;  %v1541_v59 = vpop.f32.mrf.mxu1 }
 0x36e   :  { %v2947_v55 = vmul.f32 -1.442695, %v1593_v57  ;;  %v1620_v47 = vadd.f32 %v1617_v49, %v1541_v59  ;;  %v1600_v62 = vadd.f32 %v1591_v40, %v1500_v0  ;;  %v1607_v57 = vadd.f32 %v4041_v52, %v1539_v45 }
 0x36f   :  { %v1502_v43 = vpop.f32.mrf.mxu0  ;;  %v1543_v14 = vpop.f32.mrf.mxu1 }
 0x370   :  { %3280 = vpow2.f32 %v2947_v55  ;;  %v2949_v38 = vmul.f32 -1.442695, %v1620_v47  ;;  %v2948_v14 = vmul.f32 -1.442695, %v1600_v62  ;;  %v1589_v55 = vld [vmem:[#allocation2 + $0x38] ss:$84 sps:$4 sm:$0xff]  }
 0x371   :  { %v1503_v24 = vpop.f32.mrf.mxu0  ;;  %v1544_v61 = vpop.f32.mrf.mxu1  ;;  %v1592_v6 = vunpack.c.l.bf16 %v1589_v55 }
 0x372   :  { %3282 = vpow2.f32 %v2949_v38  ;;  %v1618_v24 = vunpack.c.h.bf16 %v1615_v58  ;;  %v1619_v58 = vunpack.c.h.bf16 %v1589_v55 }
 0x37d   :  { %v3281_v48 = vpop.eup %3280 }
 0x37e   :  { %v1597_v51 = vadd.f32 1.0, %v3281_v48 }
 0x37f   :  { %v3283_v50 = vpop.eup %3282 }
 0x380   :  { %3284 = vrcp.f32 %v1597_v51  ;;  %v1624_v43 = vadd.f32 1.0, %v3283_v50 }
 0x382   :  { %3286 = vrcp.f32 %v1624_v43 }
 0x383   :  { %3288 = vpow2.f32 %v2948_v14 }
 0x38d   :  { %v3285_v63 = vpop.eup %3284 }
 0x38e   :  { %v1608_v38 = vmul.f32 %v3285_v63, %v1607_v57 }
 0x38f   :  { %v3287_v50 = vpop.eup %3286 }
 0x390   :  { %v1609_v62 = vadd.f32 %v1608_v38, %v1592_v6  ;;  %v3289_v51 = vpop.eup %3288  ;;  %v4543_v6 = vld [vmem:[#allocation10 + $0x164] ss:$24 sps:$4 sm:$0xff]  }
 0x391   :  { %v1604_v14 = vadd.f32 1.0, %v3289_v51  ;;  %5324 = vst [vmem:[#allocation64_spill] sm:$0xff] %v4543_v6  ;;  %v5329_v51 = vld [vmem:[#allocation26_spill] sm:$0xff] }
 0x3ab   :  { %v1580_v61 = vpop.f32.mrf.mxu0 }
 0x3ac   :  { %v1627_v53 = vadd.f32 %v1618_v24, %v1580_v61 }
 0x3ad   :  { %v1582_v49 = vpop.f32.mrf.mxu0 }
 0x3ae   :  { %v2950_v47 = vmul.f32 -1.442695, %v1627_v53  ;;  %v1634_v48 = vadd.f32 %v4047_v54, %v1582_v49 }
 0x3af   :  { %v1584_v59 = vpop.f32.mrf.mxu0 }
 0x3b0   :  { %3290 = vpow2.f32 %v2950_v47  ;;  %v1635_v0 = vmul.f32 %v3287_v50, %v1634_v48  ;;  %v5326_v50 = vld [vmem:[#allocation23_spill] sm:$0xff] }
 0x3b1   :  { %v1585_v40 = vpop.f32.mrf.mxu0  ;;  %3292 = vtanh.f32 %v1609_v62  ;;  %v5327_v62 = vld [vmem:[#allocation24_spill] sm:$0xff] }
 0x3b2   :  { %v1636_v43 = vadd.f32 %v1635_v0, %v1619_v58  ;;  %v5325_v40 = vld [vmem:[#allocation22_spill] sm:$0xff]  ;;  %v5328_v0 = vld [vmem:[#allocation25_spill] sm:$0xff]  ;;  %v5330_v58 = vld [vmem:[#allocation27_spill] sm:$0xff] }
 0x3b4   :  { %3294 = vtanh.f32 %v1636_v43  ;;  %v5331_v43 = vld [vmem:[#allocation28_spill] sm:$0xff] }
 0x3b5   :  { %3296 = vrcp.f32 %v1604_v14  ;;  %v5332_v14 = vld [vmem:[#allocation29_spill] sm:$0xff] }
 0x3bd   :  { %v3291_v52 = vpop.eup %3290 }
 0x3be   :  { %v1631_v45 = vadd.f32 1.0, %v3291_v52  ;;  %v3293_v24 = vpop.eup %3292  ;;  %v5333_v52 = vld [vmem:[#allocation30_spill] sm:$0xff] }
 0x3bf   :  { %v1611_v61 = vsub.f32 %v4225_v32, %v3293_v24  ;;  %v5351_v32 = vld [vmem:[#allocation43_spill] sm:$0xff] }
 0x3c0   :  { %3298 = vrcp.f32 %v1631_v45  ;;  %v5334_v45 = vld [vmem:[#allocation31_spill] sm:$0xff] }
 0x3c1   :  { %v3295_v63 = vpop.eup %3294 }
 0x3c2   :  { %v3297_v54 = vpop.eup %3296  ;;  %v1638_v57 = vsub.f32 %v4229_v10, %v3295_v63  ;;  %v5350_v10 = vld [vmem:[#allocation41_spill] sm:$0xff] }
 0x3c3   :  { %v1612_v53 = vmul.f32 %v3297_v54, %v1611_v61  ;;  %v5336_v61 = vld [vmem:[#allocation33_spill] sm:$0xff]  ;;  %v5338_v54 = vld [vmem:[#allocation35_spill] sm:$0xff] }
 0x3c5   :  { %v4436_v38 = vadd.f32 %v3293_v24, %v1612_v53  ;;  %v5335_v24 = vld [vmem:[#allocation32_spill] sm:$0xff] }
 0x3c6   :  { %v5339_v53 = vld [vmem:[#allocation36_spill] sm:$0xff] }
 0x3c7   :  { %5307 = vst [vmem:[#allocation62_spill] sm:$0xff] %v4436_v38  ;;  %v4444_v48 = vpack.c.bf16 %v4436_v38, %v4436_v38 }
 0x3cd   :  { %v3299_v49 = vpop.eup %3298 }
 0x3ce   :  { %v1639_v47 = vmul.f32 %v3299_v49, %v1638_v57  ;;  %v5340_v57 = vld [vmem:[#allocation37_spill] sm:$0xff]  ;;  %v5341_v49 = vld [vmem:[#allocation38_spill] sm:$0xff] }
 0x3d0   :  { %v4438_v55 = vadd.f32 %v3295_v63, %v1639_v47  ;;  %v5337_v63 = vld [vmem:[#allocation34_spill] sm:$0xff]  ;;  %v5342_v47 = vld [vmem:[#allocation40_spill] sm:$0xff] }
 0x3d2   :  { %5308 = vst [vmem:[#allocation63_spill] sm:$0xff] %v4438_v55  ;;  %v1646_v59 = vpack.c.bf16 %v4438_v55, %v4438_v55 }
 0x3d4   :  { %1679 = vmatprep.mubr.bf16.mxu1 %v1646_v59  ;;  %1720 = vmatprep.mubr.bf16.mxu0 %v1646_v59 }
 0x3d5   :  { %1680 = vmatmul.mubr.bf16.vlgmr.msra.gmra.mxu1 %v4444_v48  ;;  %1721 = vmatmul.mubr.bf16.vlgmr.msra.gmra.mxu0 %v4444_v48 }
 0x3d6   :  { %1730 = vmatpush1.bf16.msra.mxu1 %v4056_v56  ;;  %1761 = vmatprep.mubr.bf16.mxu1 %v1646_v59  ;;  %v4479_v56 = vld [vmem:[#allocation10 + $0x2d4] ss:$24 sps:$4 sm:$0xff]   ;;  %v5343_v59 = vld [vmem:[#allocation42_spill] sm:$0xff] }
 0x3d7   :  { %1731 = vmatprep.subr.bf16.mxu1 %v4062_v11  ;;  %1831 = vmatpush1.bf16.msra.mxu0 %v4241_v7  ;;  %v4484_v11 = vld [vmem:[#allocation10 + $0x2d0] ss:$24 sps:$4 sm:$0xff]  }
 0x3d8   :  { %1832 = vmatprep.subr.bf16.mxu0 %v4244_v3 }
 0x3da   :  { %1732 = vmatpush1.bf16.msra.mxu1 %v4067_v2  ;;  %v4487_v2 = vld [vmem:[#allocation10 + $0x2a4] ss:$24 sps:$4 sm:$0xff]  }
 0x3db   :  { %1733 = vmatprep.subr.bf16.mxu1 %v4070_v46  ;;  %1833 = vmatpush1.bf16.msra.mxu0 %v4249_v44  ;;  %v4492_v46 = vld [vmem:[#allocation10 + $0x2a0] ss:$24 sps:$4 sm:$0xff]  }
 0x3dc   :  { %1834 = vmatprep.subr.bf16.mxu0 %v4252_v60 }
 0x3de   :  { %1734 = vmatpush1.bf16.msra.mxu1 %v4075_v4  ;;  %v4495_v4 = vld [vmem:[#allocation10 + $0x274] ss:$24 sps:$4 sm:$0xff]  }
 0x3df   :  { %1735 = vmatprep.subr.bf16.mxu1 %v4078_v30  ;;  %1835 = vmatpush1.bf16.msra.mxu0 %v4257_v42  ;;  %v4500_v30 = vld [vmem:[#allocation10 + $0x270] ss:$24 sps:$4 sm:$0xff]  }
 0x3e0   :  { %1836 = vmatprep.subr.bf16.mxu0 %v4260_v9 }
 0x3e2   :  { %1736 = vmatpush1.bf16.msra.mxu1 %v4083_v34  ;;  %v4503_v34 = vld [vmem:[#allocation10 + $0x244] ss:$24 sps:$4 sm:$0xff]  }
 0x3e3   :  { %1737 = vmatprep.subr.bf16.mxu1 %v4086_v12  ;;  %1837 = vmatpush1.bf16.msra.mxu0 %v4265_v1  ;;  %v4508_v12 = vld [vmem:[#allocation10 + $0x240] ss:$24 sps:$4 sm:$0xff]  }
 0x3e4   :  { %1838 = vmatprep.subr.bf16.mxu0 %v4268_v20 }
 0x3e6   :  { %1738 = vmatpush1.bf16.msra.mxu1 %v4091_v15  ;;  %v4511_v15 = vld [vmem:[#allocation10 + $0x214] ss:$24 sps:$4 sm:$0xff]  }
 0x3e7   :  { %1739 = vmatprep.subr.bf16.mxu1 %v4094_v17  ;;  %1839 = vmatpush1.bf16.msra.mxu0 %v4273_v18  ;;  %v5309_v17 = vld [vmem:[#allocation53_spill] sm:$0xff] }
 0x3e8   :  { %1840 = vmatprep.subr.bf16.mxu0 %v4276_v22 }
 0x3ea   :  { %1740 = vmatpush1.bf16.msra.mxu1 %v4099_v19  ;;  %v5310_v19 = vld [vmem:[#allocation54_spill] sm:$0xff] }
 0x3eb   :  { %1741 = vmatprep.subr.bf16.mxu1 %v4102_v21  ;;  %1841 = vmatpush1.bf16.msra.mxu0 %v4281_v8  ;;  %v4516_v21 = vld [vmem:[#allocation10 + $0x210] ss:$24 sps:$4 sm:$0xff]  }
 0x3ec   :  { %1842 = vmatprep.subr.bf16.mxu0 %v4284_v36  ;;  %5311 = vst [vmem:[#allocation53_spill] sm:$0xff] %v4516_v21 }
 0x3ee   :  { %1742 = vmatpush1.bf16.msra.mxu1 %v4107_v23  ;;  %v4519_v23 = vld [vmem:[#allocation10 + $0x1e4] ss:$24 sps:$4 sm:$0xff]  }
 0x3ef   :  { %1743 = vmatprep.subr.bf16.mxu1 %v4110_v25  ;;  %1843 = vmatpush1.bf16.msra.mxu0 %v4289_v5  ;;  %5312 = vst [vmem:[#allocation54_spill] sm:$0xff] %v4519_v23  ;;  %v5313_v25 = vld [vmem:[#allocation55_spill] sm:$0xff] }
 0x3f0   :  { %1844 = vmatprep.subr.bf16.mxu0 %v4292_v16 }
 0x3f2   :  { %1744 = vmatpush1.bf16.msra.mxu1 %v4115_v27  ;;  %v5314_v27 = vld [vmem:[#allocation56_spill] sm:$0xff] }
 0x3f3   :  { %1745 = vmatprep.subr.bf16.mxu1 %v4118_v29  ;;  %1845 = vmatpush1.bf16.msra.mxu0 %v4297_v13  ;;  %v4524_v29 = vld [vmem:[#allocation10 + $0x1e0] ss:$24 sps:$4 sm:$0xff]  }
 0x3f4   :  { %1846 = vmatprep.subr.bf16.mxu0 %v4479_v56  ;;  %5315 = vst [vmem:[#allocation55_spill] sm:$0xff] %v4524_v29 }
 0x3f6   :  { %1746 = vmatpush2.bf16.msra.mxu1 %v4123_v31  ;;  %v4527_v31 = vld [vmem:[#allocation10 + $0x1b4] ss:$24 sps:$4 sm:$0xff]  }
 0x3f7   :  { %1747 = vmatprep.subr.bf16.mxu1 %v4126_v33  ;;  %1847 = vmatpush2.bf16.msra.mxu0 %v4484_v11  ;;  %5316 = vst [vmem:[#allocation56_spill] sm:$0xff] %v4527_v31  ;;  %v5317_v33 = vld [vmem:[#allocation57_spill] sm:$0xff] }
 0x3f8   :  { %1848 = vmatprep.subr.bf16.mxu0 %v4487_v2 }
 0x3fa   :  { %1748 = vmatpush2.bf16.msra.mxu1 %v4131_v35  ;;  %v5318_v35 = vld [vmem:[#allocation58_spill] sm:$0xff] }
 0x3fb   :  { %1749 = vmatprep.subr.bf16.mxu1 %v4134_v37  ;;  %1849 = vmatpush2.bf16.msra.mxu0 %v4492_v46  ;;  %v4532_v37 = vld [vmem:[#allocation10 + $0x1b0] ss:$24 sps:$4 sm:$0xff]  }
 0x3fc   :  { %1850 = vmatprep.subr.bf16.mxu0 %v4495_v4  ;;  %5319 = vst [vmem:[#allocation57_spill] sm:$0xff] %v4532_v37 }
 0x3fe   :  { %1750 = vmatpush2.bf16.msra.mxu1 %v4139_v39  ;;  %v4535_v39 = vld [vmem:[#allocation10 + $0x184] ss:$24 sps:$4 sm:$0xff]  }
 0x3ff   :  { %1751 = vmatprep.subr.bf16.mxu1 %v4142_v41  ;;  %1851 = vmatpush2.bf16.msra.mxu0 %v4500_v30  ;;  %5320 = vst [vmem:[#allocation58_spill] sm:$0xff] %v4535_v39  ;;  %v5321_v41 = vld [vmem:[#allocation59_spill] sm:$0xff] }
 0x400   :  { %1852 = vmatprep.subr.bf16.mxu0 %v4503_v34 }
 0x402   :  { %1752 = vmatpush2.bf16.msra.mxu1 %v4147_v26  ;;  %v5322_v26 = vld [vmem:[#allocation21_spill] sm:$0xff] }
 0x403   :  { %1753 = vmatprep.subr.bf16.mxu1 %v4150_v28  ;;  %1853 = vmatpush2.bf16.msra.mxu0 %v4508_v12  ;;  %v4540_v28 = vld [vmem:[#allocation10 + $0x180] ss:$24 sps:$4 sm:$0xff]  }
 0x404   :  { %1854 = vmatprep.subr.bf16.mxu0 %v4511_v15  ;;  %5323 = vst [vmem:[#allocation59_spill] sm:$0xff] %v4540_v28 }
 0x406   :  { %1754 = vmatpush2.bf16.msra.mxu1 %v5309_v17  ;;  %v5345_v17 = vld [vmem:[#allocation46_spill] sm:$0xff] }
 0x407   :  { %1755 = vmatprep.subr.bf16.mxu1 %v5310_v19  ;;  %1855 = vmatpush2.bf16.msra.mxu0 %v4516_v21  ;;  %v5346_v19 = vld [vmem:[#allocation48_spill] sm:$0xff] }
 0x408   :  { %1856 = vmatprep.subr.bf16.mxu0 %v4519_v23 }
 0x40a   :  { %1756 = vmatpush2.bf16.msra.mxu1 %v5313_v25  ;;  %v5347_v25 = vld [vmem:[#allocation18_spill] sm:$0xff] }
 0x40b   :  { %1757 = vmatprep.subr.bf16.mxu1 %v5314_v27  ;;  %1857 = vmatpush2.bf16.msra.mxu0 %v4524_v29  ;;  %v5348_v27 = vld [vmem:[#allocation50_spill] sm:$0xff] }
 0x40c   :  { %1858 = vmatprep.subr.bf16.mxu0 %v4527_v31 }
 0x40e   :  { %1758 = vmatpush2.bf16.msra.mxu1 %v5317_v33  ;;  %v5349_v33 = vld [vmem:[#allocation39_spill] sm:$0xff] }
 0x40f   :  { %1759 = vmatprep.subr.bf16.mxu1 %v5318_v35  ;;  %1859 = vmatpush2.bf16.msra.mxu0 %v4532_v37 }
 0x410   :  { %1860 = vmatprep.subr.bf16.mxu0 %v4535_v39 }
 0x412   :  { %1760 = vmatpush2.bf16.msra.mxu1 %v5321_v41 }
 0x413   :  { %1871 = vmatprep.subr.bf16.mxu1 %v5322_v26  ;;  %1861 = vmatpush2.bf16.msra.mxu0 %v4540_v28 }
 0x414   :  { %1912 = vmatprep.subr.bf16.mxu0 %v4543_v6 }
 0x415   :  { %1762 = vmatmul.mubr.bf16.vlgmr.msra.gmra.mxu1 %v4444_v48  ;;  %v5344_v48 = vld [vmem:[#allocation44_spill] sm:$0xff] }
 0x416   :  { %1872 = vmatpush1.bf16.msra.mxu1 %v5325_v40 }
 0x417   :  { %1873 = vmatprep.subr.bf16.mxu1 %v5326_v50 }
 0x41a   :  { %1874 = vmatpush1.bf16.msra.mxu1 %v5327_v62 }
 0x41b   :  { %1875 = vmatprep.subr.bf16.mxu1 %v5328_v0 }
 0x41e   :  { %1876 = vmatpush1.bf16.msra.mxu1 %v5329_v51 }
 0x41f   :  { %1877 = vmatprep.subr.bf16.mxu1 %v5330_v58 }
 0x422   :  { %1878 = vmatpush1.bf16.msra.mxu1 %v5331_v43 }
 0x423   :  { %1879 = vmatprep.subr.bf16.mxu1 %v5332_v14 }
 0x426   :  { %1880 = vmatpush1.bf16.msra.mxu1 %v5333_v52 }
 0x427   :  { %1881 = vmatprep.subr.bf16.mxu1 %v5334_v45 }
 0x42a   :  { %1882 = vmatpush1.bf16.msra.mxu1 %v5335_v24 }
 0x42b   :  { %1883 = vmatprep.subr.bf16.mxu1 %v5336_v61 }
 0x42e   :  { %1884 = vmatpush1.bf16.msra.mxu1 %v5337_v63  ;;  %v1771_v63 = vld [vmem:[#allocation2 + $0x48] sm:$0xff] }
 0x42f   :  { %1885 = vmatprep.subr.bf16.mxu1 %v5338_v54  ;;  %v1774_v14 = vunpack.c.h.bf16 %v1771_v63 }
 0x432   :  { %1886 = vmatpush1.bf16.msra.mxu1 %v5339_v53 }
 0x433   :  { %1887 = vmatprep.subr.bf16.mxu1 %v5340_v57 }
 0x436   :  { %1888 = vmatpush2.bf16.msra.mxu1 %v5341_v49  ;;  %v5352_v49 = vld [vmem:[#allocation45_spill] sm:$0xff] }
 0x437   :  { %1889 = vmatprep.subr.bf16.mxu1 %v5342_v47  ;;  %v5353_v47 = vld [vmem:[#allocation47_spill] sm:$0xff] }
 0x43a   :  { %1890 = vmatpush2.bf16.msra.mxu1 %v5343_v59  ;;  %v5354_v59 = vld [vmem:[#allocation49_spill] sm:$0xff] }
 0x43b   :  { %1891 = vmatprep.subr.bf16.mxu1 %v5344_v48  ;;  %v5355_v48 = vld [vmem:[#allocation60_spill] sm:$0xff] }
 0x43e   :  { %1892 = vmatpush2.bf16.msra.mxu1 %v5345_v17  ;;  %v5356_v17 = vld [vmem:[#allocation61_spill] sm:$0xff] }
 0x43f   :  { %1893 = vmatprep.subr.bf16.mxu1 %v5346_v19 }
 0x442   :  { %1894 = vmatpush2.bf16.msra.mxu1 %v5347_v25 }
 0x443   :  { %1895 = vmatprep.subr.bf16.mxu1 %v5348_v27 }
 0x446   :  { %1896 = vmatpush2.bf16.msra.mxu1 %v5349_v33 }
 0x447   :  { %1897 = vmatprep.subr.bf16.mxu1 %v5350_v10 }
 0x44a   :  { %1898 = vmatpush2.bf16.msra.mxu1 %v5351_v32  ;;  %v1773_v32 = vunpack.c.l.bf16 %v1771_v63 }
 0x44b   :  { %1899 = vmatprep.subr.bf16.mxu1 %v5352_v49  ;;  %v1798_v49 = vld [vmem:[#allocation2 + $0x6c] sm:$0xff] }
 0x44e   :  { %1900 = vmatpush2.bf16.msra.mxu1 %v5353_v47  ;;  %v1800_v47 = vunpack.c.l.bf16 %v1798_v49 }
 0x44f   :  { %1901 = vmatprep.subr.bf16.mxu1 %v5354_v59 }
 0x452   :  { %1902 = vmatpush2.bf16.msra.mxu1 %v5355_v48 }
 0x453   :  { %2009 = vmatprep.subr.bf16.mxu1 %v5356_v17 }
 0x495   :  { %v1681_v19 = vpop.f32.mrf.mxu1  ;;  %v1722_v25 = vpop.f32.mrf.mxu0 }
 0x496   :  { %v1776_v61 = vadd.f32 %v1773_v32, %v1681_v19 }
 0x497   :  { %v1683_v57 = vpop.f32.mrf.mxu1  ;;  %v1724_v27 = vpop.f32.mrf.mxu0 }
 0x498   :  { %v2951_v24 = vmul.f32 -1.442695, %v1776_v61  ;;  %v1803_v45 = vadd.f32 %v1800_v47, %v1724_v27  ;;  %v1783_v43 = vadd.f32 %v1774_v14, %v1683_v57  ;;  %v1772_v47 = vld [vmem:[#allocation2 + $0x50] ss:$36 sps:$4 sm:$0xff]  }
 0x499   :  { %v1685_v53 = vpop.f32.mrf.mxu1  ;;  %v1726_v33 = vpop.f32.mrf.mxu0  ;;  %v1775_v57 = vunpack.c.l.bf16 %v1772_v47 }
 0x49a   :  { %3300 = vpow2.f32 %v2951_v24  ;;  %v2953_v59 = vmul.f32 -1.442695, %v1803_v45  ;;  %v2952_v33 = vmul.f32 -1.442695, %v1783_v43  ;;  %v4582_v24 = vld [vmem:[%s5017_s4] ss:$0 sm:$0xff] }
 0x49b   :  { %v1686_v54 = vpop.f32.mrf.mxu1  ;;  %v1727_v10 = vpop.f32.mrf.mxu0  ;;  %v1790_v45 = vadd.f32 %v4582_v24, %v1722_v25  ;;  %v4588_v43 = vld [vmem:[%s5018_s5] ss:$0 sm:$0xff]  ;;  %v1802_v25 = vunpack.c.h.bf16 %v1772_v47 }
 0x49c   :  { %3302 = vpow2.f32 %v2953_v59  ;;  %v1801_v10 = vunpack.c.h.bf16 %v1798_v49 }
 0x4a7   :  { %v3301_v48 = vpop.eup %3300 }
 0x4a8   :  { %v1780_v17 = vadd.f32 1.0, %v3301_v48 }
 0x4a9   :  { %v3303_v52 = vpop.eup %3302 }
 0x4aa   :  { %3304 = vrcp.f32 %v1780_v17  ;;  %v1807_v53 = vadd.f32 1.0, %v3303_v52 }
 0x4ac   :  { %3306 = vrcp.f32 %v1807_v53 }
 0x4ad   :  { %3308 = vpow2.f32 %v2952_v33 }
 0x4b7   :  { %v3305_v32 = vpop.eup %3304 }
 0x4b8   :  { %v1791_v63 = vmul.f32 %v3305_v32, %v1790_v45 }
 0x4b9   :  { %v3307_v48 = vpop.eup %3306 }
 0x4ba   :  { %v1792_v17 = vadd.f32 %v1791_v63, %v1775_v57  ;;  %v3309_v53 = vpop.eup %3308 }
 0x4d5   :  { %v1763_v54 = vpop.f32.mrf.mxu1 }
 0x4d6   :  { %v1810_v19 = vadd.f32 %v1801_v10, %v1763_v54  ;;  %v1787_v10 = vadd.f32 1.0, %v3309_v53  ;;  %v4608_v53 = vld [vmem:[#allocation10 + $0x134] ss:$24 sps:$4 sm:$0xff]  }
 0x4d7   :  { %v1765_v61 = vpop.f32.mrf.mxu1 }
 0x4d8   :  { %v2954_v59 = vmul.f32 -1.442695, %v1810_v19  ;;  %v1817_v52 = vadd.f32 %v4588_v43, %v1765_v61 }
 0x4d9   :  { %v1767_v14 = vpop.f32.mrf.mxu1 }
 0x4da   :  { %3310 = vpow2.f32 %v2954_v59  ;;  %v1818_v27 = vmul.f32 %v3307_v48, %v1817_v52 }
 0x4db   :  { %v1768_v49 = vpop.f32.mrf.mxu1  ;;  %3312 = vtanh.f32 %v1792_v17 }
 0x4dc   :  { %v1819_v33 = vadd.f32 %v1818_v27, %v1802_v25  ;;  %v4605_v27 = vld [vmem:[#allocation10 + $0x160] ss:$24 sps:$4 sm:$0xff]   ;;  %v4613_v25 = vld [vmem:[#allocation10 + $0x130] ss:$24 sps:$4 sm:$0xff]  }
 0x4de   :  { %3314 = vtanh.f32 %v1819_v33  ;;  %v4616_v33 = vld [vmem:[#allocation10 + $0x104] ss:$24 sps:$4 sm:$0xff]  }
 0x4df   :  { %3316 = vrcp.f32 %v1787_v10  ;;  %v4621_v10 = vld [vmem:[#allocation10 + $0x100] ss:$24 sps:$4 sm:$0xff]  }
 0x4e7   :  { %v3311_v54 = vpop.eup %3310 }
 0x4e8   :  { %v1814_v32 = vadd.f32 1.0, %v3311_v54  ;;  %v3313_v19 = vpop.eup %3312  ;;  %v4624_v54 = vld [vmem:[#allocation10 + $0xd4] ss:$24 sps:$4 sm:$0xff]  }
 0x4e9   :  { %v1794_v45 = vsub.f32 %v4436_v38, %v3313_v19  ;;  %v4672_v38 = vld [vmem:[#allocation10 + $0x2b4] ss:$24 sps:$4 sm:$0xff]  }
 0x4ea   :  { %3318 = vrcp.f32 %v1814_v32  ;;  %v4629_v32 = vld [vmem:[#allocation10 + $0xd0] ss:$24 sps:$4 sm:$0xff]   ;;  %5362 = vst [vmem:[#allocation70_spill] sm:$0xff] %v4672_v38 }
 0x4eb   :  { %v3315_v59 = vpop.eup %3314 }
 0x4ec   :  { %v3317_v61 = vpop.eup %3316  ;;  %v1821_v49 = vsub.f32 %v4438_v55, %v3315_v59  ;;  %v4669_v55 = vld [vmem:[#allocation10 + $0x2e0] ss:$24 sps:$4 sm:$0xff]  }
 0x4ed   :  { %v1795_v14 = vmul.f32 %v3317_v61, %v1794_v45  ;;  %v4637_v45 = vld [vmem:[#allocation10 + $0xa0] ss:$24 sps:$4 sm:$0xff]   ;;  %v4645_v61 = vld [vmem:[#allocation10 + $0x70] ss:$24 sps:$4 sm:$0xff]   ;;  %5361 = vst [vmem:[#allocation69_spill] sm:$0xff] %v4669_v55 }
 0x4ef   :  { %v4593_v57 = vadd.f32 %v3313_v19, %v1795_v14  ;;  %v4632_v19 = vld [vmem:[#allocation10 + $0xa4] ss:$24 sps:$4 sm:$0xff]  }
 0x4f0   :  { %v4648_v14 = vld [vmem:[#allocation10 + $0x44] ss:$24 sps:$4 sm:$0xff]  }
 0x4f1   :  { %5357 = vst [vmem:[#allocation65_spill] sm:$0xff] %v4593_v57  ;;  %v4601_v17 = vpack.c.bf16 %v4593_v57, %v4593_v57 }
 0x4f7   :  { %v3319_v63 = vpop.eup %3318 }
 0x4f8   :  { %v1822_v52 = vmul.f32 %v3319_v63, %v1821_v49  ;;  %v4653_v49 = vld [vmem:[#allocation10 + $0x40] ss:$24 sps:$4 sm:$0xff]   ;;  %v4656_v63 = vld [vmem:[#allocation10 + $0x14] ss:$24 sps:$4 sm:$0xff]  }
 0x4fa   :  { %v4595_v47 = vadd.f32 %v3315_v59, %v1822_v52  ;;  %v4640_v59 = vld [vmem:[#allocation10 + $0x74] ss:$24 sps:$4 sm:$0xff]   ;;  %v4661_v52 = vld [vmem:[#allocation10 + $0x10] ss:$24 sps:$4 sm:$0xff]  }
 0x4fb   :  { %5359 = vst [vmem:[#allocation67_spill] sm:$0xff] %v4661_v52 }
 0x4fc   :  { %5358 = vst [vmem:[#allocation66_spill] sm:$0xff] %v4595_v47  ;;  %v1829_v48 = vpack.c.bf16 %v4595_v47, %v4595_v47 }
 0x4fe   :  { %1862 = vmatprep.mubr.bf16.mxu0 %v1829_v48  ;;  %1903 = vmatprep.mubr.bf16.mxu1 %v1829_v48 }
 0x4ff   :  { %1863 = vmatmul.mubr.bf16.vlgmr.msra.gmra.mxu0 %v4601_v17  ;;  %1904 = vmatmul.mubr.bf16.vlgmr.msra.gmra.mxu1 %v4601_v17 }
 0x500   :  { %1913 = vmatpush1.bf16.msra.mxu0 %v4605_v27  ;;  %1944 = vmatprep.mubr.bf16.mxu0 %v1829_v48  ;;  %v4664_v48 = vld [vmem:[#allocation10 + $0x2e4] ss:$24 sps:$4 sm:$0xff]  }
 0x501   :  { %1914 = vmatprep.subr.bf16.mxu0 %v4608_v53  ;;  %2010 = vmatpush1.bf16.msra.mxu1 %v4241_v7  ;;  %5360 = vst [vmem:[#allocation68_spill] sm:$0xff] %v4664_v48 }
 0x502   :  { %2011 = vmatprep.subr.bf16.mxu1 %v4244_v3 }
 0x504   :  { %1915 = vmatpush1.bf16.msra.mxu0 %v4613_v25 }
 0x505   :  { %1916 = vmatprep.subr.bf16.mxu0 %v4616_v33  ;;  %2012 = vmatpush1.bf16.msra.mxu1 %v4249_v44 }
 0x506   :  { %2013 = vmatprep.subr.bf16.mxu1 %v4252_v60 }
 0x508   :  { %1917 = vmatpush1.bf16.msra.mxu0 %v4621_v10 }
 0x509   :  { %1918 = vmatprep.subr.bf16.mxu0 %v4624_v54  ;;  %2014 = vmatpush1.bf16.msra.mxu1 %v4257_v42 }
 0x50a   :  { %2015 = vmatprep.subr.bf16.mxu1 %v4260_v9 }
 0x50c   :  { %1919 = vmatpush1.bf16.msra.mxu0 %v4629_v32 }
 0x50d   :  { %1920 = vmatprep.subr.bf16.mxu0 %v4632_v19  ;;  %2016 = vmatpush1.bf16.msra.mxu1 %v4265_v1 }
 0x50e   :  { %2017 = vmatprep.subr.bf16.mxu1 %v4268_v20 }
 0x510   :  { %1921 = vmatpush1.bf16.msra.mxu0 %v4637_v45 }
 0x511   :  { %1922 = vmatprep.subr.bf16.mxu0 %v4640_v59  ;;  %2018 = vmatpush1.bf16.msra.mxu1 %v4273_v18 }
 0x512   :  { %2019 = vmatprep.subr.bf16.mxu1 %v4276_v22 }
 0x514   :  { %1923 = vmatpush1.bf16.msra.mxu0 %v4645_v61 }
 0x515   :  { %1924 = vmatprep.subr.bf16.mxu0 %v4648_v14  ;;  %2020 = vmatpush1.bf16.msra.mxu1 %v4281_v8 }
 0x516   :  { %2021 = vmatprep.subr.bf16.mxu1 %v4284_v36 }
 0x518   :  { %1925 = vmatpush1.bf16.msra.mxu0 %v4653_v49 }
 0x519   :  { %1926 = vmatprep.subr.bf16.mxu0 %v4656_v63  ;;  %2022 = vmatpush1.bf16.msra.mxu1 %v4289_v5 }
 0x51a   :  { %2023 = vmatprep.subr.bf16.mxu1 %v4292_v16 }
 0x51c   :  { %1927 = vmatpush1.bf16.msra.mxu0 %v4661_v52  ;;  %v4677_v52 = vld [vmem:[#allocation10 + $0x2b0] ss:$24 sps:$4 sm:$0xff]  }
 0x51d   :  { %1928 = vmatprep.subr.bf16.mxu0 %v4664_v48  ;;  %2024 = vmatpush1.bf16.msra.mxu1 %v4297_v13  ;;  %5363 = vst [vmem:[#allocation71_spill] sm:$0xff] %v4677_v52  ;;  %v4680_v48 = vld [vmem:[#allocation10 + $0x284] ss:$24 sps:$4 sm:$0xff]  }
 0x51e   :  { %2025 = vmatprep.subr.bf16.mxu1 %v4479_v56  ;;  %5364 = vst [vmem:[#allocation72_spill] sm:$0xff] %v4680_v48 }
 0x520   :  { %1929 = vmatpush2.bf16.msra.mxu0 %v4669_v55  ;;  %v4685_v55 = vld [vmem:[#allocation10 + $0x280] ss:$24 sps:$4 sm:$0xff]  }
 0x521   :  { %1930 = vmatprep.subr.bf16.mxu0 %v4672_v38  ;;  %2026 = vmatpush2.bf16.msra.mxu1 %v4484_v11  ;;  %5365 = vst [vmem:[#allocation73_spill] sm:$0xff] %v4685_v55  ;;  %v4688_v38 = vld [vmem:[#allocation10 + $0x254] ss:$24 sps:$4 sm:$0xff]  }
 0x522   :  { %2027 = vmatprep.subr.bf16.mxu1 %v4487_v2  ;;  %5366 = vst [vmem:[#allocation74_spill] sm:$0xff] %v4688_v38 }
 0x524   :  { %1931 = vmatpush2.bf16.msra.mxu0 %v4677_v52  ;;  %v4693_v52 = vld [vmem:[#allocation10 + $0x250] ss:$24 sps:$4 sm:$0xff]  }
 0x525   :  { %1932 = vmatprep.subr.bf16.mxu0 %v4680_v48  ;;  %2028 = vmatpush2.bf16.msra.mxu1 %v4492_v46  ;;  %5367 = vst [vmem:[#allocation75_spill] sm:$0xff] %v4693_v52  ;;  %v4696_v48 = vld [vmem:[#allocation10 + $0x224] ss:$24 sps:$4 sm:$0xff]  }
 0x526   :  { %2029 = vmatprep.subr.bf16.mxu1 %v4495_v4  ;;  %5368 = vst [vmem:[#allocation76_spill] sm:$0xff] %v4696_v48 }
 0x528   :  { %1933 = vmatpush2.bf16.msra.mxu0 %v4685_v55  ;;  %v4701_v55 = vld [vmem:[#allocation10 + $0x220] ss:$24 sps:$4 sm:$0xff]  }
 0x529   :  { %1934 = vmatprep.subr.bf16.mxu0 %v4688_v38  ;;  %2030 = vmatpush2.bf16.msra.mxu1 %v4500_v30  ;;  %5369 = vst [vmem:[#allocation77_spill] sm:$0xff] %v4701_v55  ;;  %v4704_v38 = vld [vmem:[#allocation10 + $0x1f4] ss:$24 sps:$4 sm:$0xff]  }
 0x52a   :  { %2031 = vmatprep.subr.bf16.mxu1 %v4503_v34 }
 0x52c   :  { %1935 = vmatpush2.bf16.msra.mxu0 %v4693_v52  ;;  %v4709_v52 = vld [vmem:[#allocation10 + $0x1f0] ss:$24 sps:$4 sm:$0xff]  }
 0x52d   :  { %1936 = vmatprep.subr.bf16.mxu0 %v4696_v48  ;;  %2032 = vmatpush2.bf16.msra.mxu1 %v4508_v12  ;;  %5370 = vst [vmem:[#allocation78_spill] sm:$0xff] %v4709_v52  ;;  %v4712_v48 = vld [vmem:[#allocation10 + $0x1c4] ss:$24 sps:$4 sm:$0xff]  }
 0x52e   :  { %2033 = vmatprep.subr.bf16.mxu1 %v4511_v15  ;;  %5371 = vst [vmem:[#allocation79_spill] sm:$0xff] %v4712_v48 }
 0x530   :  { %1937 = vmatpush2.bf16.msra.mxu0 %v4701_v55  ;;  %v4717_v55 = vld [vmem:[#allocation10 + $0x1c0] ss:$24 sps:$4 sm:$0xff]  }
 0x531   :  { %1938 = vmatprep.subr.bf16.mxu0 %v4704_v38  ;;  %2034 = vmatpush2.bf16.msra.mxu1 %v4516_v21  ;;  %5372 = vst [vmem:[#allocation80_spill] sm:$0xff] %v4717_v55 }
 0x532   :  { %2035 = vmatprep.subr.bf16.mxu1 %v4519_v23 }
 0x534   :  { %1939 = vmatpush2.bf16.msra.mxu0 %v4709_v52 }
 0x535   :  { %1940 = vmatprep.subr.bf16.mxu0 %v4712_v48  ;;  %2036 = vmatpush2.bf16.msra.mxu1 %v4524_v29 }
 0x536   :  { %2037 = vmatprep.subr.bf16.mxu1 %v4527_v31 }
 0x538   :  { %1941 = vmatpush2.bf16.msra.mxu0 %v4717_v55  ;;  %v1953_v55 = vld [vmem:[#allocation2 + $0x60] sm:$0xff] }
 0x539   :  { %1942 = vmatprep.subr.bf16.mxu0 %v5318_v35  ;;  %2038 = vmatpush2.bf16.msra.mxu1 %v4532_v37  ;;  %v5373_v35 = vld [vmem:[#allocation28_spill] sm:$0xff]  ;;  %v1956_v23 = vunpack.c.h.bf16 %v1953_v55 }
 0x53a   :  { %2039 = vmatprep.subr.bf16.mxu1 %v4535_v39 }
 0x53c   :  { %1943 = vmatpush2.bf16.msra.mxu0 %v5321_v41  ;;  %v5374_v41 = vld [vmem:[#allocation29_spill] sm:$0xff] }
 0x53d   :  { %2050 = vmatprep.subr.bf16.mxu0 %v5322_v26  ;;  %2040 = vmatpush2.bf16.msra.mxu1 %v4540_v28  ;;  %v5375_v28 = vld [vmem:[#allocation30_spill] sm:$0xff] }
 0x53e   :  { %2091 = vmatprep.subr.bf16.mxu1 %v4543_v6  ;;  %v5376_v6 = vld [vmem:[#allocation31_spill] sm:$0xff] }
 0x53f   :  { %1945 = vmatmul.mubr.bf16.vlgmr.msra.gmra.mxu0 %v4601_v17  ;;  %v5377_v17 = vld [vmem:[#allocation32_spill] sm:$0xff] }
 0x540   :  { %2051 = vmatpush1.bf16.msra.mxu0 %v5325_v40  ;;  %v5378_v40 = vld [vmem:[#allocation33_spill] sm:$0xff] }
 0x541   :  { %2052 = vmatprep.subr.bf16.mxu0 %v5326_v50  ;;  %v5379_v50 = vld [vmem:[#allocation34_spill] sm:$0xff] }
 0x544   :  { %2053 = vmatpush1.bf16.msra.mxu0 %v5327_v62  ;;  %v5380_v62 = vld [vmem:[#allocation35_spill] sm:$0xff] }
 0x545   :  { %2054 = vmatprep.subr.bf16.mxu0 %v5328_v0  ;;  %v5381_v0 = vld [vmem:[#allocation36_spill] sm:$0xff] }
 0x548   :  { %2055 = vmatpush1.bf16.msra.mxu0 %v5329_v51  ;;  %v5382_v51 = vld [vmem:[#allocation37_spill] sm:$0xff] }
 0x549   :  { %2056 = vmatprep.subr.bf16.mxu0 %v5330_v58  ;;  %v5383_v58 = vld [vmem:[#allocation38_spill] sm:$0xff] }
 0x54c   :  { %2057 = vmatpush1.bf16.msra.mxu0 %v5373_v35  ;;  %v5384_v35 = vld [vmem:[#allocation40_spill] sm:$0xff] }
 0x54d   :  { %2058 = vmatprep.subr.bf16.mxu0 %v5374_v41  ;;  %v5385_v41 = vld [vmem:[#allocation42_spill] sm:$0xff] }
 0x550   :  { %2059 = vmatpush1.bf16.msra.mxu0 %v5375_v28  ;;  %v5386_v28 = vld [vmem:[#allocation44_spill] sm:$0xff] }
 0x551   :  { %2060 = vmatprep.subr.bf16.mxu0 %v5376_v6  ;;  %v5387_v6 = vld [vmem:[#allocation46_spill] sm:$0xff] }
 0x554   :  { %2061 = vmatpush1.bf16.msra.mxu0 %v5377_v17  ;;  %v5388_v17 = vld [vmem:[#allocation48_spill] sm:$0xff] }
 0x555   :  { %2062 = vmatprep.subr.bf16.mxu0 %v5378_v40  ;;  %v5389_v40 = vld [vmem:[#allocation18_spill] sm:$0xff] }
 0x558   :  { %2063 = vmatpush1.bf16.msra.mxu0 %v5379_v50  ;;  %v5390_v50 = vld [vmem:[#allocation50_spill] sm:$0xff] }
 0x559   :  { %2064 = vmatprep.subr.bf16.mxu0 %v5380_v62  ;;  %v5391_v62 = vld [vmem:[#allocation39_spill] sm:$0xff] }
 0x55c   :  { %2065 = vmatpush1.bf16.msra.mxu0 %v5381_v0  ;;  %v5392_v0 = vld [vmem:[#allocation41_spill] sm:$0xff] }
 0x55d   :  { %2066 = vmatprep.subr.bf16.mxu0 %v5382_v51  ;;  %v5393_v51 = vld [vmem:[#allocation43_spill] sm:$0xff] }
 0x560   :  { %2067 = vmatpush2.bf16.msra.mxu0 %v5383_v58  ;;  %v5394_v58 = vld [vmem:[#allocation45_spill] sm:$0xff] }
 0x561   :  { %2068 = vmatprep.subr.bf16.mxu0 %v5384_v35  ;;  %v5395_v35 = vld [vmem:[#allocation47_spill] sm:$0xff] }
 0x564   :  { %2069 = vmatpush2.bf16.msra.mxu0 %v5385_v41  ;;  %v5396_v41 = vld [vmem:[#allocation49_spill] sm:$0xff] }
 0x565   :  { %2070 = vmatprep.subr.bf16.mxu0 %v5386_v28  ;;  %v5397_v28 = vld [vmem:[#allocation60_spill] sm:$0xff] }
 0x568   :  { %2071 = vmatpush2.bf16.msra.mxu0 %v5387_v6  ;;  %v5398_v6 = vld [vmem:[#allocation61_spill] sm:$0xff] }
 0x569   :  { %2072 = vmatprep.subr.bf16.mxu0 %v5388_v17 }
 0x56c   :  { %2073 = vmatpush2.bf16.msra.mxu0 %v5389_v40 }
 0x56d   :  { %2074 = vmatprep.subr.bf16.mxu0 %v5390_v50 }
 0x570   :  { %2075 = vmatpush2.bf16.msra.mxu0 %v5391_v62 }
 0x571   :  { %2076 = vmatprep.subr.bf16.mxu0 %v5392_v0 }
 0x574   :  { %2077 = vmatpush2.bf16.msra.mxu0 %v5393_v51  ;;  %v1955_v51 = vunpack.c.l.bf16 %v1953_v55 }
 0x575   :  { %2078 = vmatprep.subr.bf16.mxu0 %v5394_v58  ;;  %v1979_v58 = vld [vmem:[#allocation2 + $0x54] sm:$0xff] }
 0x578   :  { %2079 = vmatpush2.bf16.msra.mxu0 %v5395_v35  ;;  %v1981_v35 = vunpack.c.l.bf16 %v1979_v58 }
 0x579   :  { %2080 = vmatprep.subr.bf16.mxu0 %v5396_v41 }
 0x57c   :  { %2081 = vmatpush2.bf16.msra.mxu0 %v5397_v28 }
 0x57d   :  { %2188 = vmatprep.subr.bf16.mxu0 %v5398_v6 }
 0x5bf   :  { %v1864_v17 = vpop.f32.mrf.mxu0  ;;  %v1905_v40 = vpop.f32.mrf.mxu1 }
 0x5c0   :  { %v1958_v31 = vadd.f32 %v1955_v51, %v1864_v17 }
 0x5c1   :  { %v1866_v26 = vpop.f32.mrf.mxu0  ;;  %v1907_v50 = vpop.f32.mrf.mxu1 }
 0x5c2   :  { %v2955_v29 = vmul.f32 -1.442695, %v1958_v31  ;;  %v1984_v48 = vadd.f32 %v1981_v35, %v1907_v50  ;;  %v1965_v21 = vadd.f32 %v1956_v23, %v1866_v26  ;;  %v1972_v31 = vadd.f32 %v4582_v24, %v1905_v40 }
 0x5c3   :  { %v1868_v39 = vpop.f32.mrf.mxu0  ;;  %v1909_v62 = vpop.f32.mrf.mxu1 }
 0x5c4   :  { %3320 = vpow2.f32 %v2955_v29  ;;  %v2957_v41 = vmul.f32 -1.442695, %v1984_v48  ;;  %v2956_v62 = vmul.f32 -1.442695, %v1965_v21  ;;  %v1954_v29 = vld [vmem:[#allocation2 + $0x5c] ss:$12 sps:$4 sm:$0xff]  }
 0x5c5   :  { %v1869_v37 = vpop.f32.mrf.mxu0  ;;  %v1910_v0 = vpop.f32.mrf.mxu1  ;;  %v1957_v55 = vunpack.c.h.bf16 %v1954_v29 }
 0x5c6   :  { %3322 = vpow2.f32 %v2957_v41  ;;  %v1982_v37 = vunpack.c.h.bf16 %v1979_v58  ;;  %v1983_v58 = vunpack.c.l.bf16 %v1954_v29 }
 0x5d1   :  { %v3321_v28 = vpop.eup %3320 }
 0x5d2   :  { %v1962_v6 = vadd.f32 1.0, %v3321_v28 }
 0x5d3   :  { %v3323_v52 = vpop.eup %3322 }
 0x5d4   :  { %3324 = vrcp.f32 %v1962_v6  ;;  %v1988_v39 = vadd.f32 1.0, %v3323_v52 }
 0x5d6   :  { %3326 = vrcp.f32 %v1988_v39 }
 0x5d7   :  { %3328 = vpow2.f32 %v2956_v62 }
 0x5e1   :  { %v3325_v51 = vpop.eup %3324 }
 0x5e2   :  { %v1973_v35 = vmul.f32 %v3325_v51, %v1972_v31 }
 0x5e3   :  { %v3327_v26 = vpop.eup %3326 }
 0x5e4   :  { %v1974_v21 = vadd.f32 %v1973_v35, %v1957_v55  ;;  %v3329_v52 = vpop.eup %3328 }
 0x5e5   :  { %v1969_v62 = vadd.f32 1.0, %v3329_v52  ;;  %v4833_v52 = vld [vmem:[#allocation10 + $0x194] ss:$24 sps:$4 sm:$0xff]  }
 0x5ff   :  { %v1946_v0 = vpop.f32.mrf.mxu0 }
 0x600   :  { %v1991_v17 = vadd.f32 %v1982_v37, %v1946_v0 }
 0x601   :  { %v1948_v50 = vpop.f32.mrf.mxu0 }
 0x602   :  { %v2958_v48 = vmul.f32 -1.442695, %v1991_v17  ;;  %v1998_v28 = vadd.f32 %v4588_v43, %v1948_v50 }
 0x603   :  { %v1950_v41 = vpop.f32.mrf.mxu0 }
 0x604   :  { %3330 = vpow2.f32 %v2958_v48  ;;  %v1999_v6 = vmul.f32 %v3327_v26, %v1998_v28  ;;  %v5414_v26 = vld [vmem:[#allocation55_spill] sm:$0xff] }
 0x605   :  { %v1951_v23 = vpop.f32.mrf.mxu0  ;;  %3332 = vtanh.f32 %v1974_v21  ;;  %v5415_v21 = vld [vmem:[#allocation56_spill] sm:$0xff] }
 0x606   :  { %v2000_v39 = vadd.f32 %v1999_v6, %v1983_v58  ;;  %v5416_v6 = vld [vmem:[#allocation80_spill] sm:$0xff]  ;;  %v5418_v58 = vld [vmem:[#allocation57_spill] sm:$0xff] }
 0x608   :  { %3334 = vtanh.f32 %v2000_v39  ;;  %v5419_v39 = vld [vmem:[#allocation58_spill] sm:$0xff] }
 0x609   :  { %3336 = vrcp.f32 %v1969_v62  ;;  %v4838_v62 = vld [vmem:[#allocation10 + $0x190] ss:$24 sps:$4 sm:$0xff]  }
 0x611   :  { %v3331_v40 = vpop.eup %3330 }
 0x612   :  { %v1995_v37 = vadd.f32 1.0, %v3331_v40  ;;  %v3333_v0 = vpop.eup %3332  ;;  %v5421_v40 = vld [vmem:[#allocation21_spill] sm:$0xff] }
 0x613   :  { %v1976_v51 = vsub.f32 %v4593_v57, %v3333_v0 }
 0x614   :  { %3338 = vrcp.f32 %v1995_v37  ;;  %v5422_v37 = vld [vmem:[#allocation59_spill] sm:$0xff] }
 0x615   :  { %v3335_v17 = vpop.eup %3334 }
 0x616   :  { %v3337_v31 = vpop.eup %3336  ;;  %v2002_v48 = vsub.f32 %v4595_v47, %v3335_v17  ;;  %v5433_v47 = vld [vmem:[#allocation31_spill] sm:$0xff] }
 0x617   :  { %v1977_v50 = vmul.f32 %v3337_v31, %v1976_v51  ;;  %v5424_v51 = vld [vmem:[#allocation22_spill] sm:$0xff]  ;;  %v5426_v31 = vld [vmem:[#allocation24_spill] sm:$0xff] }
 0x619   :  { %v4764_v28 = vadd.f32 %v3333_v0, %v1977_v50  ;;  %v5423_v0 = vld [vmem:[#allocation64_spill] sm:$0xff]  ;;  %v5427_v50 = vld [vmem:[#allocation25_spill] sm:$0xff] }
 0x61b   :  { %v4772_v23 = vpack.c.bf16 %v4764_v28, %v4764_v28 }
 0x621   :  { %v3339_v35 = vpop.eup %3338 }
 0x622   :  { %v2003_v41 = vmul.f32 %v3339_v35, %v2002_v48  ;;  %v5428_v48 = vld [vmem:[#allocation26_spill] sm:$0xff]  ;;  %v5429_v35 = vld [vmem:[#allocation27_spill] sm:$0xff] }
 0x624   :  { %v4766_v29 = vadd.f32 %v3335_v17, %v2003_v41  ;;  %v5425_v17 = vld [vmem:[#allocation23_spill] sm:$0xff]  ;;  %v5430_v41 = vld [vmem:[#allocation28_spill] sm:$0xff] }
 0x626   :  { %v2008_v55 = vpack.c.bf16 %v4766_v29, %v4766_v29 }
 0x628   :  { %2041 = vmatprep.mubr.bf16.mxu1 %v2008_v55  ;;  %2082 = vmatprep.mubr.bf16.mxu0 %v2008_v55 }
 0x629   :  { %2042 = vmatmul.mubr.bf16.vlgmr.msra.gmra.mxu1 %v4772_v23  ;;  %2083 = vmatmul.mubr.bf16.vlgmr.msra.gmra.mxu0 %v4772_v23 }
 0x62a   :  { %2092 = vmatpush1.bf16.msra.mxu1 %v4605_v27  ;;  %2123 = vmatprep.mubr.bf16.mxu1 %v2008_v55  ;;  %v5431_v55 = vld [vmem:[#allocation29_spill] sm:$0xff] }
 0x62b   :  { %2093 = vmatprep.subr.bf16.mxu1 %v4608_v53  ;;  %2189 = vmatpush1.bf16.msra.mxu0 %v4241_v7  ;;  %v5399_v7 = vld [vmem:[#allocation67_spill] sm:$0xff] }
 0x62c   :  { %2190 = vmatprep.subr.bf16.mxu0 %v4244_v3  ;;  %v5400_v3 = vld [vmem:[#allocation68_spill] sm:$0xff]  ;;  %5417 = vst [vmem:[#allocation67_spill] sm:$0xff] %v4833_v52 }
 0x62d   :  { %5420 = vst [vmem:[#allocation68_spill] sm:$0xff] %v4838_v62 }
 0x62e   :  { %2094 = vmatpush1.bf16.msra.mxu1 %v4613_v25 }
 0x62f   :  { %2095 = vmatprep.subr.bf16.mxu1 %v4616_v33  ;;  %2191 = vmatpush1.bf16.msra.mxu0 %v4249_v44  ;;  %v5401_v44 = vld [vmem:[#allocation69_spill] sm:$0xff] }
 0x630   :  { %2192 = vmatprep.subr.bf16.mxu0 %v4252_v60  ;;  %v5402_v60 = vld [vmem:[#allocation70_spill] sm:$0xff] }
 0x632   :  { %2096 = vmatpush1.bf16.msra.mxu1 %v4621_v10 }
 0x633   :  { %2097 = vmatprep.subr.bf16.mxu1 %v4624_v54  ;;  %2193 = vmatpush1.bf16.msra.mxu0 %v4257_v42  ;;  %v5403_v42 = vld [vmem:[#allocation71_spill] sm:$0xff] }
 0x634   :  { %2194 = vmatprep.subr.bf16.mxu0 %v4260_v9  ;;  %v5404_v9 = vld [vmem:[#allocation72_spill] sm:$0xff] }
 0x636   :  { %2098 = vmatpush1.bf16.msra.mxu1 %v4629_v32 }
 0x637   :  { %2099 = vmatprep.subr.bf16.mxu1 %v4632_v19  ;;  %2195 = vmatpush1.bf16.msra.mxu0 %v4265_v1  ;;  %v5405_v1 = vld [vmem:[#allocation73_spill] sm:$0xff] }
 0x638   :  { %2196 = vmatprep.subr.bf16.mxu0 %v4268_v20  ;;  %v5406_v20 = vld [vmem:[#allocation74_spill] sm:$0xff] }
 0x63a   :  { %2100 = vmatpush1.bf16.msra.mxu1 %v4637_v45 }
 0x63b   :  { %2101 = vmatprep.subr.bf16.mxu1 %v4640_v59  ;;  %2197 = vmatpush1.bf16.msra.mxu0 %v4273_v18  ;;  %v5407_v18 = vld [vmem:[#allocation75_spill] sm:$0xff] }
 0x63c   :  { %2198 = vmatprep.subr.bf16.mxu0 %v4276_v22  ;;  %v5408_v22 = vld [vmem:[#allocation76_spill] sm:$0xff] }
 0x63e   :  { %2102 = vmatpush1.bf16.msra.mxu1 %v4645_v61 }
 0x63f   :  { %2103 = vmatprep.subr.bf16.mxu1 %v4648_v14  ;;  %2199 = vmatpush1.bf16.msra.mxu0 %v4281_v8  ;;  %v5409_v8 = vld [vmem:[#allocation77_spill] sm:$0xff] }
 0x640   :  { %2200 = vmatprep.subr.bf16.mxu0 %v4284_v36  ;;  %v5410_v36 = vld [vmem:[#allocation53_spill] sm:$0xff] }
 0x642   :  { %2104 = vmatpush1.bf16.msra.mxu1 %v4653_v49 }
 0x643   :  { %2105 = vmatprep.subr.bf16.mxu1 %v4656_v63  ;;  %2201 = vmatpush1.bf16.msra.mxu0 %v4289_v5  ;;  %v5411_v5 = vld [vmem:[#allocation54_spill] sm:$0xff] }
 0x644   :  { %2202 = vmatprep.subr.bf16.mxu0 %v4292_v16  ;;  %v5412_v16 = vld [vmem:[#allocation78_spill] sm:$0xff] }
 0x646   :  { %2106 = vmatpush1.bf16.msra.mxu1 %v5399_v7 }
 0x647   :  { %2107 = vmatprep.subr.bf16.mxu1 %v5400_v3  ;;  %2203 = vmatpush1.bf16.msra.mxu0 %v4297_v13  ;;  %v5413_v13 = vld [vmem:[#allocation79_spill] sm:$0xff] }
 0x648   :  { %2204 = vmatprep.subr.bf16.mxu0 %v4479_v56 }
 0x64a   :  { %2108 = vmatpush2.bf16.msra.mxu1 %v5401_v44 }
 0x64b   :  { %2109 = vmatprep.subr.bf16.mxu1 %v5402_v60  ;;  %2205 = vmatpush2.bf16.msra.mxu0 %v4484_v11 }
 0x64c   :  { %2206 = vmatprep.subr.bf16.mxu0 %v4487_v2 }
 0x64e   :  { %2110 = vmatpush2.bf16.msra.mxu1 %v5403_v42 }
 0x64f   :  { %2111 = vmatprep.subr.bf16.mxu1 %v5404_v9  ;;  %2207 = vmatpush2.bf16.msra.mxu0 %v4492_v46 }
 0x650   :  { %2208 = vmatprep.subr.bf16.mxu0 %v4495_v4 }
 0x652   :  { %2112 = vmatpush2.bf16.msra.mxu1 %v5405_v1 }
 0x653   :  { %2113 = vmatprep.subr.bf16.mxu1 %v5406_v20  ;;  %2209 = vmatpush2.bf16.msra.mxu0 %v4500_v30 }
 0x654   :  { %2210 = vmatprep.subr.bf16.mxu0 %v4503_v34 }
 0x656   :  { %2114 = vmatpush2.bf16.msra.mxu1 %v5407_v18 }
 0x657   :  { %2115 = vmatprep.subr.bf16.mxu1 %v5408_v22  ;;  %2211 = vmatpush2.bf16.msra.mxu0 %v4508_v12 }
 0x658   :  { %2212 = vmatprep.subr.bf16.mxu0 %v4511_v15 }
 0x65a   :  { %2116 = vmatpush2.bf16.msra.mxu1 %v5409_v8 }
 0x65b   :  { %2117 = vmatprep.subr.bf16.mxu1 %v4704_v38  ;;  %2213 = vmatpush2.bf16.msra.mxu0 %v5410_v36 }
 0x65c   :  { %2214 = vmatprep.subr.bf16.mxu0 %v5411_v5 }
 0x65e   :  { %2118 = vmatpush2.bf16.msra.mxu1 %v5412_v16 }
 0x65f   :  { %2119 = vmatprep.subr.bf16.mxu1 %v5413_v13  ;;  %2215 = vmatpush2.bf16.msra.mxu0 %v5414_v26 }
 0x660   :  { %2216 = vmatprep.subr.bf16.mxu0 %v5415_v21 }
 0x662   :  { %2120 = vmatpush2.bf16.msra.mxu1 %v5416_v6 }
 0x663   :  { %2121 = vmatprep.subr.bf16.mxu1 %v4833_v52  ;;  %2217 = vmatpush2.bf16.msra.mxu0 %v5418_v58 }
 0x664   :  { %2218 = vmatprep.subr.bf16.mxu0 %v5419_v39 }
 0x666   :  { %2122 = vmatpush2.bf16.msra.mxu1 %v4838_v62  ;;  %v2132_v62 = vld [vmem:[#allocation2 + $0x78] sm:$0xff] }
 0x667   :  { %2229 = vmatprep.subr.bf16.mxu1 %v5421_v40  ;;  %2219 = vmatpush2.bf16.msra.mxu0 %v5422_v37  ;;  %v5432_v40 = vld [vmem:[#allocation30_spill] sm:$0xff]  ;;  %v2135_v21 = vunpack.c.h.bf16 %v2132_v62 }
 0x668   :  { %2270 = vmatprep.subr.bf16.mxu0 %v5423_v0 }
 0x669   :  { %2124 = vmatmul.mubr.bf16.vlgmr.msra.gmra.mxu1 %v4772_v23  ;;  %v5434_v23 = vld [vmem:[#allocation32_spill] sm:$0xff] }
 0x66a   :  { %2230 = vmatpush1.bf16.msra.mxu1 %v5424_v51  ;;  %v5435_v51 = vld [vmem:[#allocation33_spill] sm:$0xff] }
 0x66b   :  { %2231 = vmatprep.subr.bf16.mxu1 %v5425_v17  ;;  %v5436_v17 = vld [vmem:[#allocation34_spill] sm:$0xff] }
 0x66e   :  { %2232 = vmatpush1.bf16.msra.mxu1 %v5426_v31  ;;  %v5437_v31 = vld [vmem:[#allocation35_spill] sm:$0xff] }
 0x66f   :  { %2233 = vmatprep.subr.bf16.mxu1 %v5427_v50  ;;  %v5438_v50 = vld [vmem:[#allocation36_spill] sm:$0xff] }
 0x672   :  { %2234 = vmatpush1.bf16.msra.mxu1 %v5428_v48  ;;  %v5439_v48 = vld [vmem:[#allocation37_spill] sm:$0xff] }
 0x673   :  { %2235 = vmatprep.subr.bf16.mxu1 %v5429_v35  ;;  %v5440_v35 = vld [vmem:[#allocation38_spill] sm:$0xff] }
 0x676   :  { %2236 = vmatpush1.bf16.msra.mxu1 %v5430_v41  ;;  %v5441_v41 = vld [vmem:[#allocation40_spill] sm:$0xff] }
 0x677   :  { %2237 = vmatprep.subr.bf16.mxu1 %v5431_v55  ;;  %v5442_v55 = vld [vmem:[#allocation42_spill] sm:$0xff] }
 0x67a   :  { %2238 = vmatpush1.bf16.msra.mxu1 %v5432_v40  ;;  %v5443_v40 = vld [vmem:[#allocation44_spill] sm:$0xff] }
 0x67b   :  { %2239 = vmatprep.subr.bf16.mxu1 %v5433_v47  ;;  %v5444_v47 = vld [vmem:[#allocation46_spill] sm:$0xff] }
 0x67e   :  { %2240 = vmatpush1.bf16.msra.mxu1 %v5434_v23  ;;  %v5445_v23 = vld [vmem:[#allocation48_spill] sm:$0xff] }
 0x67f   :  { %2241 = vmatprep.subr.bf16.mxu1 %v5435_v51  ;;  %v5446_v51 = vld [vmem:[#allocation18_spill] sm:$0xff] }
 0x682   :  { %2242 = vmatpush1.bf16.msra.mxu1 %v5436_v17  ;;  %v5447_v17 = vld [vmem:[#allocation50_spill] sm:$0xff] }
 0x683   :  { %2243 = vmatprep.subr.bf16.mxu1 %v5437_v31  ;;  %v5448_v31 = vld [vmem:[#allocation39_spill] sm:$0xff] }
 0x686   :  { %2244 = vmatpush1.bf16.msra.mxu1 %v5438_v50  ;;  %v5449_v50 = vld [vmem:[#allocation41_spill] sm:$0xff] }
 0x687   :  { %2245 = vmatprep.subr.bf16.mxu1 %v5439_v48  ;;  %v5450_v48 = vld [vmem:[#allocation43_spill] sm:$0xff] }
 0x68a   :  { %2246 = vmatpush2.bf16.msra.mxu1 %v5440_v35  ;;  %v5451_v35 = vld [vmem:[#allocation45_spill] sm:$0xff] }
 0x68b   :  { %2247 = vmatprep.subr.bf16.mxu1 %v5441_v41  ;;  %v5452_v41 = vld [vmem:[#allocation47_spill] sm:$0xff] }
 0x68e   :  { %2248 = vmatpush2.bf16.msra.mxu1 %v5442_v55  ;;  %v5453_v55 = vld [vmem:[#allocation49_spill] sm:$0xff] }
 0x68f   :  { %2249 = vmatprep.subr.bf16.mxu1 %v5443_v40  ;;  %v5454_v40 = vld [vmem:[#allocation60_spill] sm:$0xff] }
 0x692   :  { %2250 = vmatpush2.bf16.msra.mxu1 %v5444_v47  ;;  %v5455_v47 = vld [vmem:[#allocation61_spill] sm:$0xff] }
 0x693   :  { %2251 = vmatprep.subr.bf16.mxu1 %v5445_v23 }
 0x696   :  { %2252 = vmatpush2.bf16.msra.mxu1 %v5446_v51 }
 0x697   :  { %2253 = vmatprep.subr.bf16.mxu1 %v5447_v17 }
 0x69a   :  { %2254 = vmatpush2.bf16.msra.mxu1 %v5448_v31 }
 0x69b   :  { %2255 = vmatprep.subr.bf16.mxu1 %v5449_v50 }
 0x69e   :  { %2256 = vmatpush2.bf16.msra.mxu1 %v5450_v48  ;;  %v2134_v48 = vunpack.c.l.bf16 %v2132_v62 }
 0x69f   :  { %2257 = vmatprep.subr.bf16.mxu1 %v5451_v35  ;;  %v2158_v35 = vld [vmem:[#allocation2 + $0x3c] sm:$0xff] }
 0x6a2   :  { %2258 = vmatpush2.bf16.msra.mxu1 %v5452_v41  ;;  %v2160_v41 = vunpack.c.l.bf16 %v2158_v35 }
 0x6a3   :  { %2259 = vmatprep.subr.bf16.mxu1 %v5453_v55 }
 0x6a6   :  { %2260 = vmatpush2.bf16.msra.mxu1 %v5454_v40 }
 0x6a7   :  { %2367 = vmatprep.subr.bf16.mxu1 %v5455_v47 }
 0x6e9   :  { %v2043_v23 = vpop.f32.mrf.mxu1  ;;  %v2084_v51 = vpop.f32.mrf.mxu0 }
 0x6ea   :  { %v2137_v39 = vadd.f32 %v2134_v48, %v2043_v23 }
 0x6eb   :  { %v2045_v57 = vpop.f32.mrf.mxu1  ;;  %v2086_v17 = vpop.f32.mrf.mxu0 }
 0x6ec   :  { %v2959_v58 = vmul.f32 -1.442695, %v2137_v39  ;;  %v2163_v52 = vadd.f32 %v2160_v41, %v2086_v17  ;;  %v2144_v26 = vadd.f32 %v2135_v21, %v2045_v57  ;;  %v2151_v39 = vadd.f32 %v4582_v24, %v2084_v51 }
 0x6ed   :  { %v2047_v0 = vpop.f32.mrf.mxu1  ;;  %v2088_v31 = vpop.f32.mrf.mxu0 }
 0x6ee   :  { %3340 = vpow2.f32 %v2959_v58  ;;  %v2961_v55 = vmul.f32 -1.442695, %v2163_v52  ;;  %v2960_v31 = vmul.f32 -1.442695, %v2144_v26  ;;  %v2133_v58 = vld [vmem:[#allocation2 + $0x44] ss:$60 sps:$4 sm:$0xff]  }
 0x6ef   :  { %v2048_v37 = vpop.f32.mrf.mxu1  ;;  %v2089_v50 = vpop.f32.mrf.mxu0  ;;  %v2136_v62 = vunpack.c.h.bf16 %v2133_v58 }
 0x6f0   :  { %3342 = vpow2.f32 %v2961_v55  ;;  %v2161_v37 = vunpack.c.h.bf16 %v2158_v35  ;;  %v2162_v35 = vunpack.c.l.bf16 %v2133_v58 }
 0x6fb   :  { %v3341_v40 = vpop.eup %3340 }
 0x6fc   :  { %v2141_v47 = vadd.f32 1.0, %v3341_v40 }
 0x6fd   :  { %v3343_v6 = vpop.eup %3342 }
 0x6fe   :  { %3344 = vrcp.f32 %v2141_v47  ;;  %v2167_v0 = vadd.f32 1.0, %v3343_v6 }
 0x700   :  { %3346 = vrcp.f32 %v2167_v0 }
 0x701   :  { %3348 = vpow2.f32 %v2960_v31 }
 0x70b   :  { %v3345_v23 = vpop.eup %3344 }
 0x70c   :  { %v2152_v41 = vmul.f32 %v3345_v23, %v2151_v39 }
 0x70d   :  { %v3347_v21 = vpop.eup %3346 }
 0x70e   :  { %v2153_v26 = vadd.f32 %v2152_v41, %v2136_v62  ;;  %v3349_v47 = vpop.eup %3348 }
 0x70f   :  { %v2148_v31 = vadd.f32 1.0, %v3349_v47  ;;  %v3501_v47 = vld [vmem:[#allocation10 + $0xf4] ss:$24 sps:$4 sm:$0xff]  }
 0x729   :  { %v2125_v50 = vpop.f32.mrf.mxu1 }
 0x72a   :  { %v2170_v48 = vadd.f32 %v2161_v37, %v2125_v50 }
 0x72b   :  { %v2127_v17 = vpop.f32.mrf.mxu1 }
 0x72c   :  { %v2962_v52 = vmul.f32 -1.442695, %v2170_v48  ;;  %v2177_v40 = vadd.f32 %v4588_v43, %v2127_v17 }
 0x72d   :  { %v2129_v55 = vpop.f32.mrf.mxu1 }
 0x72e   :  { %3350 = vpow2.f32 %v2962_v52  ;;  %v2178_v6 = vmul.f32 %v3347_v21, %v2177_v40  ;;  %v3498_v21 = vld [vmem:[#allocation10 + $0x150] ss:$24 sps:$4 sm:$0xff]  }
 0x72f   :  { %v2130_v57 = vpop.f32.mrf.mxu1  ;;  %3352 = vtanh.f32 %v2153_v26  ;;  %v3499_v26 = vld [vmem:[#allocation10 + $0x124] ss:$24 sps:$4 sm:$0xff]  }
 0x730   :  { %v2179_v0 = vadd.f32 %v2178_v6, %v2162_v35  ;;  %v3500_v6 = vld [vmem:[#allocation10 + $0x120] ss:$24 sps:$4 sm:$0xff]   ;;  %v3502_v35 = vld [vmem:[#allocation10 + $0xf0] ss:$24 sps:$4 sm:$0xff]  }
 0x732   :  { %3354 = vtanh.f32 %v2179_v0  ;;  %v3503_v0 = vld [vmem:[#allocation10 + $0xc4] ss:$24 sps:$4 sm:$0xff]  }
 0x733   :  { %3356 = vrcp.f32 %v2148_v31  ;;  %v3504_v31 = vld [vmem:[#allocation10 + $0xc0] ss:$24 sps:$4 sm:$0xff]  }
 0x73b   :  { %v3351_v51 = vpop.eup %3350 }
 0x73c   :  { %v2174_v37 = vadd.f32 1.0, %v3351_v51  ;;  %v3353_v50 = vpop.eup %3352  ;;  %v3505_v51 = vld [vmem:[#allocation10 + $0x94] ss:$24 sps:$4 sm:$0xff]  }
 0x73d   :  { %v2155_v23 = vsub.f32 %v4764_v28, %v3353_v50 }
 0x73e   :  { %3358 = vrcp.f32 %v2174_v37  ;;  %v3506_v37 = vld [vmem:[#allocation10 + $0x90] ss:$24 sps:$4 sm:$0xff]  }
 0x73f   :  { %v3355_v48 = vpop.eup %3354 }
 0x740   :  { %v3357_v39 = vpop.eup %3356  ;;  %v2181_v52 = vsub.f32 %v4766_v29, %v3355_v48 }
 0x741   :  { %v2156_v17 = vmul.f32 %v3357_v39, %v2155_v23  ;;  %v3508_v23 = vld [vmem:[#allocation10 + $0x60] ss:$24 sps:$4 sm:$0xff]   ;;  %v3510_v39 = vld [vmem:[#allocation10 + $0x30] ss:$24 sps:$4 sm:$0xff]  }
 0x743   :  { %v4881_v40 = vadd.f32 %v3353_v50, %v2156_v17  ;;  %v3507_v50 = vld [vmem:[#allocation10 + $0x64] ss:$24 sps:$4 sm:$0xff]  }
 0x744   :  { %v3511_v17 = vld [vmem:[#allocation10 + $0x4] ss:$24 sps:$4 sm:$0xff]  }
 0x745   :  { %v4889_v57 = vpack.c.bf16 %v4881_v40, %v4881_v40 }
 0x74b   :  { %v3359_v41 = vpop.eup %3358 }
 0x74c   :  { %v2182_v55 = vmul.f32 %v3359_v41, %v2181_v52  ;;  %v3512_v52 = vld [vmem:[#allocation10] ss:$24 sps:$4 sm:$0xff]   ;;  %v3515_v41 = vld [vmem:[#allocation10 + $0x12c] ss:$24 sps:$4 sm:$0xff]  }
 0x74e   :  { %v4883_v58 = vadd.f32 %v3355_v48, %v2182_v55  ;;  %v3509_v48 = vld [vmem:[#allocation10 + $0x34] ss:$24 sps:$4 sm:$0xff]   ;;  %v3516_v55 = vld [vmem:[#allocation10 + $0x128] ss:$24 sps:$4 sm:$0xff]  }
 0x750   :  { %v2187_v62 = vpack.c.bf16 %v4883_v58, %v4883_v58 }
 0x752   :  { %2220 = vmatprep.mubr.bf16.mxu0 %v2187_v62  ;;  %2261 = vmatprep.mubr.bf16.mxu1 %v2187_v62 }
 0x753   :  { %2221 = vmatmul.mubr.bf16.vlgmr.msra.gmra.mxu0 %v4889_v57  ;;  %2262 = vmatmul.mubr.bf16.vlgmr.msra.gmra.mxu1 %v4889_v57 }
 0x754   :  { %2271 = vmatpush1.bf16.msra.mxu0 %v4605_v27  ;;  %2302 = vmatprep.mubr.bf16.mxu0 %v2187_v62  ;;  %v3517_v62 = vld [vmem:[#allocation10 + $0xfc] ss:$24 sps:$4 sm:$0xff]  }
 0x755   :  { %2272 = vmatprep.subr.bf16.mxu0 %v4608_v53  ;;  %2368 = vmatpush1.bf16.msra.mxu1 %v3498_v21  ;;  %v3518_v21 = vld [vmem:[#allocation10 + $0xf8] ss:$24 sps:$4 sm:$0xff]  }
 0x756   :  { %2369 = vmatprep.subr.bf16.mxu1 %v3499_v26  ;;  %v3519_v26 = vld [vmem:[#allocation10 + $0xcc] ss:$24 sps:$4 sm:$0xff]  }
 0x758   :  { %2273 = vmatpush1.bf16.msra.mxu0 %v4613_v25 }
 0x759   :  { %2274 = vmatprep.subr.bf16.mxu0 %v4616_v33  ;;  %2370 = vmatpush1.bf16.msra.mxu1 %v3500_v6  ;;  %v3520_v6 = vld [vmem:[#allocation10 + $0xc8] ss:$24 sps:$4 sm:$0xff]  }
 0x75a   :  { %2371 = vmatprep.subr.bf16.mxu1 %v3501_v47  ;;  %v3521_v47 = vld [vmem:[#allocation10 + $0x9c] ss:$24 sps:$4 sm:$0xff]  }
 0x75c   :  { %2275 = vmatpush1.bf16.msra.mxu0 %v4621_v10 }
 0x75d   :  { %2276 = vmatprep.subr.bf16.mxu0 %v4624_v54  ;;  %2372 = vmatpush1.bf16.msra.mxu1 %v3502_v35  ;;  %v3522_v35 = vld [vmem:[#allocation10 + $0x98] ss:$24 sps:$4 sm:$0xff]  }
 0x75e   :  { %2373 = vmatprep.subr.bf16.mxu1 %v3503_v0  ;;  %v3523_v0 = vld [vmem:[#allocation10 + $0x6c] ss:$24 sps:$4 sm:$0xff]  }
 0x760   :  { %2277 = vmatpush1.bf16.msra.mxu0 %v4629_v32 }
 0x761   :  { %2278 = vmatprep.subr.bf16.mxu0 %v4632_v19  ;;  %2374 = vmatpush1.bf16.msra.mxu1 %v3504_v31  ;;  %v3525_v31 = vld [vmem:[#allocation10 + $0x3c] ss:$24 sps:$4 sm:$0xff]  }
 0x762   :  { %2375 = vmatprep.subr.bf16.mxu1 %v3505_v51  ;;  %v3526_v51 = vld [vmem:[#allocation10 + $0x38] ss:$24 sps:$4 sm:$0xff]  }
 0x764   :  { %2279 = vmatpush1.bf16.msra.mxu0 %v4637_v45 }
 0x765   :  { %2280 = vmatprep.subr.bf16.mxu0 %v4640_v59  ;;  %2376 = vmatpush1.bf16.msra.mxu1 %v3506_v37  ;;  %v3527_v37 = vld [vmem:[#allocation10 + $0xc] ss:$24 sps:$4 sm:$0xff]  }
 0x766   :  { %2377 = vmatprep.subr.bf16.mxu1 %v3507_v50  ;;  %v3528_v50 = vld [vmem:[#allocation10 + $0x8] ss:$24 sps:$4 sm:$0xff]  }
 0x768   :  { %2281 = vmatpush1.bf16.msra.mxu0 %v4645_v61 }
 0x769   :  { %2282 = vmatprep.subr.bf16.mxu0 %v4648_v14  ;;  %2378 = vmatpush1.bf16.msra.mxu1 %v3508_v23  ;;  %v3529_v23 = vld [vmem:[#allocation10 + $0x2dc] ss:$24 sps:$4 sm:$0xff]  }
 0x76a   :  { %2379 = vmatprep.subr.bf16.mxu1 %v3509_v48  ;;  %v3530_v48 = vld [vmem:[#allocation10 + $0x2d8] ss:$24 sps:$4 sm:$0xff]  }
 0x76c   :  { %2283 = vmatpush1.bf16.msra.mxu0 %v4653_v49 }
 0x76d   :  { %2284 = vmatprep.subr.bf16.mxu0 %v4656_v63  ;;  %2380 = vmatpush1.bf16.msra.mxu1 %v3510_v39  ;;  %v3531_v39 = vld [vmem:[#allocation10 + $0x2ac] ss:$24 sps:$4 sm:$0xff]  }
 0x76e   :  { %2381 = vmatprep.subr.bf16.mxu1 %v3511_v17  ;;  %v3532_v17 = vld [vmem:[#allocation10 + $0x2a8] ss:$24 sps:$4 sm:$0xff]  }
 0x770   :  { %2285 = vmatpush1.bf16.msra.mxu0 %v5399_v7 }
 0x771   :  { %2286 = vmatprep.subr.bf16.mxu0 %v5400_v3  ;;  %2382 = vmatpush1.bf16.msra.mxu1 %v3512_v52  ;;  %v3533_v52 = vld [vmem:[#allocation10 + $0x27c] ss:$24 sps:$4 sm:$0xff]  }
 0x772   :  { %2383 = vmatprep.subr.bf16.mxu1 %v4479_v56  ;;  %v5456_v56 = vld [vmem:[#allocation55_spill] sm:$0xff] }
 0x774   :  { %2287 = vmatpush2.bf16.msra.mxu0 %v5401_v44 }
 0x775   :  { %2288 = vmatprep.subr.bf16.mxu0 %v5402_v60  ;;  %2384 = vmatpush2.bf16.msra.mxu1 %v4484_v11  ;;  %v5457_v11 = vld [vmem:[#allocation56_spill] sm:$0xff] }
 0x776   :  { %2385 = vmatprep.subr.bf16.mxu1 %v4487_v2  ;;  %v5458_v2 = vld [vmem:[#allocation80_spill] sm:$0xff] }
 0x778   :  { %2289 = vmatpush2.bf16.msra.mxu0 %v5403_v42 }
 0x779   :  { %2290 = vmatprep.subr.bf16.mxu0 %v5404_v9  ;;  %2386 = vmatpush2.bf16.msra.mxu1 %v4492_v46  ;;  %v5459_v46 = vld [vmem:[#allocation67_spill] sm:$0xff] }
 0x77a   :  { %2387 = vmatprep.subr.bf16.mxu1 %v4495_v4  ;;  %v5460_v4 = vld [vmem:[#allocation57_spill] sm:$0xff] }
 0x77c   :  { %2291 = vmatpush2.bf16.msra.mxu0 %v5405_v1 }
 0x77d   :  { %2292 = vmatprep.subr.bf16.mxu0 %v5406_v20  ;;  %2388 = vmatpush2.bf16.msra.mxu1 %v4500_v30  ;;  %v5461_v30 = vld [vmem:[#allocation58_spill] sm:$0xff] }
 0x77e   :  { %2389 = vmatprep.subr.bf16.mxu1 %v4503_v34  ;;  %v5462_v34 = vld [vmem:[#allocation68_spill] sm:$0xff] }
 0x780   :  { %2293 = vmatpush2.bf16.msra.mxu0 %v5407_v18 }
 0x781   :  { %2294 = vmatprep.subr.bf16.mxu0 %v5408_v22  ;;  %2390 = vmatpush2.bf16.msra.mxu1 %v4508_v12  ;;  %v3513_v12 = vld [vmem:[#allocation10 + $0x15c] ss:$24 sps:$4 sm:$0xff]  }
 0x782   :  { %2391 = vmatprep.subr.bf16.mxu1 %v4511_v15  ;;  %v5463_v15 = vld [vmem:[#allocation59_spill] sm:$0xff] }
 0x784   :  { %2295 = vmatpush2.bf16.msra.mxu0 %v5409_v8 }
 0x785   :  { %2296 = vmatprep.subr.bf16.mxu0 %v4704_v38  ;;  %2392 = vmatpush2.bf16.msra.mxu1 %v5410_v36  ;;  %v5464_v36 = vld [vmem:[#allocation64_spill] sm:$0xff] }
 0x786   :  { %2393 = vmatprep.subr.bf16.mxu1 %v5411_v5  ;;  %v3514_v5 = vld [vmem:[#allocation10 + $0x158] ss:$24 sps:$4 sm:$0xff]  }
 0x788   :  { %2297 = vmatpush2.bf16.msra.mxu0 %v5412_v16 }
 0x789   :  { %2298 = vmatprep.subr.bf16.mxu0 %v5413_v13  ;;  %2394 = vmatpush2.bf16.msra.mxu1 %v5456_v56  ;;  %v3534_v56 = vld [vmem:[#allocation10 + $0x278] ss:$24 sps:$4 sm:$0xff]  }
 0x78a   :  { %2395 = vmatprep.subr.bf16.mxu1 %v5457_v11  ;;  %v3535_v11 = vld [vmem:[#allocation10 + $0x24c] ss:$24 sps:$4 sm:$0xff]  }
 0x78c   :  { %2299 = vmatpush2.bf16.msra.mxu0 %v5458_v2 }
 0x78d   :  { %2300 = vmatprep.subr.bf16.mxu0 %v5459_v46  ;;  %2396 = vmatpush2.bf16.msra.mxu1 %v5460_v4  ;;  %v3536_v4 = vld [vmem:[#allocation10 + $0x248] ss:$24 sps:$4 sm:$0xff]  }
 0x78e   :  { %2397 = vmatprep.subr.bf16.mxu1 %v5461_v30  ;;  %v3537_v30 = vld [vmem:[#allocation10 + $0x21c] ss:$24 sps:$4 sm:$0xff]  }
 0x790   :  { %2301 = vmatpush2.bf16.msra.mxu0 %v5462_v34 }
 0x791   :  { %2408 = vmatprep.subr.bf16.mxu0 %v3513_v12  ;;  %2398 = vmatpush2.bf16.msra.mxu1 %v5463_v15  ;;  %v3538_v12 = vld [vmem:[#allocation10 + $0x218] ss:$24 sps:$4 sm:$0xff]   ;;  %v3539_v15 = vld [vmem:[#allocation10 + $0x1ec] ss:$24 sps:$4 sm:$0xff]  }
 0x792   :  { %2449 = vmatprep.subr.bf16.mxu1 %v5464_v36  ;;  %v3540_v36 = vld [vmem:[#allocation10 + $0x1e8] ss:$24 sps:$4 sm:$0xff]  }
 0x793   :  { %2303 = vmatmul.mubr.bf16.vlgmr.msra.gmra.mxu0 %v4889_v57  ;;  %v3524_v57 = vld [vmem:[#allocation10 + $0x68] ss:$24 sps:$4 sm:$0xff]  }
 0x794   :  { %2409 = vmatpush1.bf16.msra.mxu0 %v3514_v5  ;;  %v3541_v5 = vld [vmem:[#allocation10 + $0x1bc] ss:$24 sps:$4 sm:$0xff]  }
 0x795   :  { %2410 = vmatprep.subr.bf16.mxu0 %v3515_v41  ;;  %v3542_v41 = vld [vmem:[#allocation10 + $0x1b8] ss:$24 sps:$4 sm:$0xff]  }
 0x798   :  { %2411 = vmatpush1.bf16.msra.mxu0 %v3516_v55  ;;  %v3543_v55 = vld [vmem:[#allocation10 + $0x18c] ss:$24 sps:$4 sm:$0xff]  }
 0x799   :  { %2412 = vmatprep.subr.bf16.mxu0 %v3517_v62  ;;  %v3544_v62 = vld [vmem:[#allocation10 + $0x188] ss:$24 sps:$4 sm:$0xff]  }
 0x79c   :  { %2413 = vmatpush1.bf16.msra.mxu0 %v3518_v21 }
 0x79d   :  { %2414 = vmatprep.subr.bf16.mxu0 %v3519_v26 }
 0x7a0   :  { %2415 = vmatpush1.bf16.msra.mxu0 %v3520_v6 }
 0x7a1   :  { %2416 = vmatprep.subr.bf16.mxu0 %v3521_v47 }
 0x7a4   :  { %2417 = vmatpush1.bf16.msra.mxu0 %v3522_v35 }
 0x7a5   :  { %2418 = vmatprep.subr.bf16.mxu0 %v3523_v0 }
 0x7a8   :  { %2419 = vmatpush1.bf16.msra.mxu0 %v3524_v57 }
 0x7a9   :  { %2420 = vmatprep.subr.bf16.mxu0 %v3525_v31 }
 0x7ac   :  { %2421 = vmatpush1.bf16.msra.mxu0 %v3526_v51  ;;  %v2311_v51 = vld [vmem:[#allocation2 + $0x90] sm:$0xff] }
 0x7ad   :  { %2422 = vmatprep.subr.bf16.mxu0 %v3527_v37  ;;  %v2313_v37 = vunpack.c.l.bf16 %v2311_v51 }
 0x7b0   :  { %2423 = vmatpush1.bf16.msra.mxu0 %v3528_v50 }
 0x7b1   :  { %2424 = vmatprep.subr.bf16.mxu0 %v3529_v23  ;;  %v2337_v23 = vld [vmem:[#allocation2 + $0x24] sm:$0xff] }
 0x7b4   :  { %2425 = vmatpush2.bf16.msra.mxu0 %v3530_v48 }
 0x7b5   :  { %2426 = vmatprep.subr.bf16.mxu0 %v3531_v39  ;;  %v2339_v39 = vunpack.c.l.bf16 %v2337_v23 }
 0x7b8   :  { %2427 = vmatpush2.bf16.msra.mxu0 %v3532_v17 }
 0x7b9   :  { %2428 = vmatprep.subr.bf16.mxu0 %v3533_v52 }
 0x7bc   :  { %2429 = vmatpush2.bf16.msra.mxu0 %v3534_v56 }
 0x7bd   :  { %2430 = vmatprep.subr.bf16.mxu0 %v3535_v11 }
 0x7c0   :  { %2431 = vmatpush2.bf16.msra.mxu0 %v3536_v4 }
 0x7c1   :  { %2432 = vmatprep.subr.bf16.mxu0 %v3537_v30  ;;  %v2314_v30 = vunpack.c.h.bf16 %v2311_v51 }
 0x7c4   :  { %2433 = vmatpush2.bf16.msra.mxu0 %v3538_v12 }
 0x7c5   :  { %2434 = vmatprep.subr.bf16.mxu0 %v3539_v15 }
 0x7c8   :  { %2435 = vmatpush2.bf16.msra.mxu0 %v3540_v36 }
 0x7c9   :  { %2436 = vmatprep.subr.bf16.mxu0 %v3541_v5  ;;  %v2340_v5 = vunpack.c.h.bf16 %v2337_v23 }
 0x7cc   :  { %2437 = vmatpush2.bf16.msra.mxu0 %v3542_v41 }
 0x7cd   :  { %2438 = vmatprep.subr.bf16.mxu0 %v3543_v55 }
 0x7d0   :  { %2439 = vmatpush2.bf16.msra.mxu0 %v3544_v62 }
 0x813   :  { %v2222_v21 = vpop.f32.mrf.mxu0  ;;  %v2263_v26 = vpop.f32.mrf.mxu1 }
 0x814   :  { %v2316_v50 = vadd.f32 %v2313_v37, %v2222_v21  ;;  %v2330_v21 = vadd.f32 %v4582_v24, %v2263_v26 }
 0x815   :  { %v2224_v6 = vpop.f32.mrf.mxu0  ;;  %v2265_v47 = vpop.f32.mrf.mxu1 }
 0x816   :  { %v2963_v48 = vmul.f32 -1.442695, %v2316_v50  ;;  %v2342_v17 = vadd.f32 %v2339_v39, %v2265_v47  ;;  %v2323_v12 = vadd.f32 %v2314_v30, %v2224_v6 }
 0x817   :  { %v2226_v35 = vpop.f32.mrf.mxu0  ;;  %v2267_v0 = vpop.f32.mrf.mxu1 }
 0x818   :  { %3360 = vpow2.f32 %v2963_v48  ;;  %v2965_v52 = vmul.f32 -1.442695, %v2342_v17  ;;  %v2964_v36 = vmul.f32 -1.442695, %v2323_v12  ;;  %v2312_v35 = vld [vmem:[#allocation2 + $0x2c] ss:$108 sps:$4 sm:$0xff]  }
 0x819   :  { %v2227_v57 = vpop.f32.mrf.mxu0  ;;  %v2268_v31 = vpop.f32.mrf.mxu1  ;;  %v2315_v51 = vunpack.c.h.bf16 %v2312_v35  ;;  %v2341_v23 = vunpack.c.l.bf16 %v2312_v35 }
 0x81a   :  { %3362 = vpow2.f32 %v2965_v52 }
 0x825   :  { %v3361_v56 = vpop.eup %3360 }
 0x826   :  { %v2320_v11 = vadd.f32 1.0, %v3361_v56 }
 0x827   :  { %v3363_v4 = vpop.eup %3362 }
 0x828   :  { %3364 = vrcp.f32 %v2320_v11  ;;  %v2346_v15 = vadd.f32 1.0, %v3363_v4 }
 0x82a   :  { %3366 = vrcp.f32 %v2346_v15 }
 0x82b   :  { %3368 = vpow2.f32 %v2964_v36 }
 0x835   :  { %v3365_v55 = vpop.eup %3364 }
 0x836   :  { %v2331_v57 = vmul.f32 %v3365_v55, %v2330_v21 }
 0x837   :  { %v3367_v50 = vpop.eup %3366 }
 0x838   :  { %v2332_v48 = vadd.f32 %v2331_v57, %v2315_v51  ;;  %v3369_v17 = vpop.eup %3368 }
 0x839   :  { %v2327_v56 = vadd.f32 1.0, %v3369_v17 }
 0x853   :  { %v2304_v41 = vpop.f32.mrf.mxu0 }
 0x854   :  { %v2349_v62 = vadd.f32 %v2340_v5, %v2304_v41 }
 0x855   :  { %v2306_v47 = vpop.f32.mrf.mxu0 }
 0x856   :  { %v2966_v0 = vmul.f32 -1.442695, %v2349_v62  ;;  %v2356_v37 = vadd.f32 %v4588_v43, %v2306_v47 }
 0x857   :  { %v2308_v31 = vpop.f32.mrf.mxu0 }
 0x858   :  { %3370 = vpow2.f32 %v2966_v0  ;;  %v2357_v39 = vmul.f32 %v3367_v50, %v2356_v37  ;;  %v2516_v0 = vld [vmem:[#allocation2 + $0xc] sm:$0xff] }
 0x859   :  { %v2309_v6 = vpop.f32.mrf.mxu0  ;;  %3372 = vtanh.f32 %v2332_v48  ;;  %v2518_v57 = vunpack.c.l.bf16 %v2516_v0  ;;  %v2491_v37 = vld [vmem:[#allocation2 + $0x14] ss:$156 sps:$4 sm:$0xff]  }
 0x85a   :  { %v2358_v52 = vadd.f32 %v2357_v39, %v2341_v23  ;;  %v3545_v6 = vld [vmem:[%s5017_s4] ss:$0 sm:$0xff]  ;;  %v2494_v17 = vunpack.c.h.bf16 %v2491_v37 }
 0x85c   :  { %3374 = vtanh.f32 %v2358_v52 }
 0x85d   :  { %3376 = vrcp.f32 %v2327_v56 }
 0x865   :  { %v3371_v24 = vpop.eup %3370 }
 0x866   :  { %v2353_v26 = vadd.f32 1.0, %v3371_v24  ;;  %v3373_v11 = vpop.eup %3372 }
 0x867   :  { %v2334_v4 = vsub.f32 %v4881_v40, %v3373_v11 }
 0x868   :  { %3378 = vrcp.f32 %v2353_v26 }
 0x869   :  { %v3375_v30 = vpop.eup %3374 }
 0x86a   :  { %v3377_v43 = vpop.eup %3376  ;;  %v2360_v15 = vsub.f32 %v4883_v58, %v3375_v30 }
 0x86b   :  { %v2335_v12 = vmul.f32 %v3377_v43, %v2334_v4 }
 0x86d   :  { %v4946_v41 = vadd.f32 %v3373_v11, %v2335_v12 }
 0x86f   :  { %v2365_v21 = vpack.c.bf16 %v4946_v41, %v4946_v41 }
 0x875   :  { %v3379_v36 = vpop.eup %3378 }
 0x876   :  { %v2361_v5 = vmul.f32 %v3379_v36, %v2360_v15  ;;  %v2519_v15 = vunpack.c.h.bf16 %v2516_v0 }
 0x878   :  { %v4948_v55 = vadd.f32 %v3375_v30, %v2361_v5 }
 0x87a   :  { %v2366_v62 = vpack.c.bf16 %v4948_v55, %v4948_v55 }
 0x87c   :  { %2399 = vmatprep.mubr.bf16.mxu1 %v2366_v62  ;;  %2440 = vmatprep.mubr.bf16.mxu0 %v2366_v62 }
 0x87d   :  { %2400 = vmatmul.mubr.bf16.vlgmr.msra.gmra.mxu1 %v2365_v21  ;;  %2441 = vmatmul.mubr.bf16.vlgmr.msra.gmra.mxu0 %v2365_v21 }
 0x87e   :  { %2450 = vmatpush1.bf16.msra.mxu1 %v4605_v27  ;;  %2481 = vmatprep.mubr.bf16.mxu1 %v2366_v62  ;;  %v3224_v27 = vld [vmem:[#allocation12 + $0x78] sm:$0xff]  }
 0x87f   :  { %2451 = vmatprep.subr.bf16.mxu1 %v4608_v53  ;;  %v3225_v53 = vld [vmem:[#allocation12 + $0x38] sm:$0xff]   ;;  %3012 = vmatprep.subr.bf16.mxu0 %v3224_v27 }
 0x880   :  { %3013 = vmatpush3.bf16.msra.mxu0 %v3225_v53  ;;  %v3546_v53 = vld [vmem:[%s5018_s5] ss:$0 sm:$0xff] }
 0x882   :  { %2452 = vmatpush1.bf16.msra.mxu1 %v4613_v25  ;;  %v3226_v25 = vld [vmem:[#allocation12 + $0x70] sm:$0xff]  }
 0x883   :  { %2453 = vmatprep.subr.bf16.mxu1 %v4616_v33  ;;  %v3227_v33 = vld [vmem:[#allocation12 + $0x30] sm:$0xff]   ;;  %3014 = vmatprep.subr.bf16.mxu0 %v3226_v25 }
 0x884   :  { %3015 = vmatpush3.bf16.msra.mxu0 %v3227_v33 }
 0x886   :  { %2454 = vmatpush1.bf16.msra.mxu1 %v4621_v10  ;;  %v3229_v10 = vld [vmem:[#allocation12 + $0x28] sm:$0xff]  }
 0x887   :  { %2455 = vmatprep.subr.bf16.mxu1 %v4624_v54  ;;  %v3230_v54 = vld [vmem:[#allocation12 + $0x60] sm:$0xff]  }
 0x88a   :  { %2456 = vmatpush1.bf16.msra.mxu1 %v4629_v32  ;;  %v3231_v32 = vld [vmem:[#allocation12 + $0x20] sm:$0xff]  }
 0x88b   :  { %2457 = vmatprep.subr.bf16.mxu1 %v4632_v19  ;;  %v3232_v19 = vld [vmem:[#allocation12 + $0x58] sm:$0xff]  }
 0x88e   :  { %2458 = vmatpush1.bf16.msra.mxu1 %v4637_v45  ;;  %v3233_v45 = vld [vmem:[#allocation12 + $0x18] sm:$0xff]  }
 0x88f   :  { %2459 = vmatprep.subr.bf16.mxu1 %v4640_v59  ;;  %v3234_v59 = vld [vmem:[#allocation12 + $0x50] sm:$0xff]  }
 0x892   :  { %2460 = vmatpush1.bf16.msra.mxu1 %v4645_v61  ;;  %v3235_v61 = vld [vmem:[#allocation12 + $0x10] sm:$0xff]  }
 0x893   :  { %2461 = vmatprep.subr.bf16.mxu1 %v4648_v14  ;;  %v3236_v14 = vld [vmem:[#allocation12 + $0x48] sm:$0xff]  }
 0x896   :  { %2462 = vmatpush1.bf16.msra.mxu1 %v4653_v49  ;;  %v3237_v49 = vld [vmem:[#allocation12 + $0x8] sm:$0xff]  }
 0x897   :  { %2463 = vmatprep.subr.bf16.mxu1 %v4656_v63  ;;  %v3238_v63 = vld [vmem:[#allocation12 + $0x40] sm:$0xff]  }
 0x89a   :  { %2464 = vmatpush1.bf16.msra.mxu1 %v5399_v7  ;;  %v3239_v7 = vld [vmem:[#allocation12] sm:$0xff]  }
 0x89b   :  { %2465 = vmatprep.subr.bf16.mxu1 %v5400_v3  ;;  %v2490_v3 = vld [vmem:[#allocation2 + $0xa8] sm:$0xff] }
 0x89e   :  { %2466 = vmatpush2.bf16.msra.mxu1 %v5401_v44  ;;  %v2492_v44 = vunpack.c.l.bf16 %v2490_v3 }
 0x89f   :  { %2467 = vmatprep.subr.bf16.mxu1 %v5402_v60 }
 0x8a2   :  { %2468 = vmatpush2.bf16.msra.mxu1 %v5403_v42 }
 0x8a3   :  { %2469 = vmatprep.subr.bf16.mxu1 %v5404_v9 }
 0x8a6   :  { %2470 = vmatpush2.bf16.msra.mxu1 %v5405_v1 }
 0x8a7   :  { %2471 = vmatprep.subr.bf16.mxu1 %v5406_v20 }
 0x8aa   :  { %2472 = vmatpush2.bf16.msra.mxu1 %v5407_v18 }
 0x8ab   :  { %2473 = vmatprep.subr.bf16.mxu1 %v5408_v22 }
 0x8ae   :  { %2474 = vmatpush2.bf16.msra.mxu1 %v5409_v8 }
 0x8af   :  { %2475 = vmatprep.subr.bf16.mxu1 %v4704_v38  ;;  %v3228_v38 = vld [vmem:[#allocation12 + $0x68] sm:$0xff]  }
 0x8b0   :  { %3016 = vmatprep.subr.bf16.mxu0 %v3228_v38 }
 0x8b1   :  { %3017 = vmatpush3.bf16.msra.mxu0 %v3229_v10 }
 0x8b2   :  { %2476 = vmatpush2.bf16.msra.mxu1 %v5412_v16  ;;  %3018 = vmatprep.subr.bf16.mxu0 %v3230_v54  ;;  %v2520_v54 = vunpack.c.l.bf16 %v2491_v37 }
 0x8b3   :  { %2477 = vmatprep.subr.bf16.mxu1 %v5413_v13 }
 0x8b5   :  { %3019 = vmatpush3.bf16.msra.mxu0 %v3231_v32 }
 0x8b6   :  { %2478 = vmatpush2.bf16.msra.mxu1 %v5458_v2  ;;  %3020 = vmatprep.subr.bf16.mxu0 %v3232_v19  ;;  %v2493_v2 = vunpack.c.h.bf16 %v2490_v3  ;;  %v5465_v3 = vld [vmem:[#allocation51_spill] sm:$0xff] }
 0x8b7   :  { %2479 = vmatprep.subr.bf16.mxu1 %v5459_v46 }
 0x8b9   :  { %3021 = vmatpush3.bf16.msra.mxu0 %v3233_v45 }
 0x8ba   :  { %2480 = vmatpush2.bf16.msra.mxu1 %v5462_v34  ;;  %3022 = vmatprep.subr.bf16.mxu0 %v3234_v59 }
 0x8bd   :  { %2482 = vmatmul.mubr.bf16.vlgmr.msra.gmra.mxu1 %v2365_v21  ;;  %3023 = vmatpush3.bf16.msra.mxu0 %v3235_v61 }
 0x8be   :  { %3024 = vmatprep.subr.bf16.mxu0 %v3236_v14 }
 0x8c1   :  { %3025 = vmatpush3.bf16.msra.mxu0 %v3237_v49 }
 0x8c2   :  { %3026 = vmatprep.subr.bf16.mxu0 %v3238_v63 }
 0x8c5   :  { %3027 = vmatpush3.bf16.msra.mxu0 %v3239_v7 }
 0x93d   :  { %v2401_v60 = vpop.f32.mrf.mxu1  ;;  %v2442_v42 = vpop.f32.mrf.mxu0 }
 0x93e   :  { %v2495_v9 = vadd.f32 %v2492_v44, %v2401_v60  ;;  %v2509_v50 = vadd.f32 %v3545_v6, %v2442_v42  ;;  %v5466_v44 = vld [vmem:[#allocation19_spill] sm:$0xff]  ;;  %v2563_v42 = vpack.c.bf16 %v4766_v29, %v4883_v58 }
 0x93f   :  { %v2403_v1 = vpop.f32.mrf.mxu1  ;;  %v2444_v20 = vpop.f32.mrf.mxu0  ;;  %v2560_v60 = vpack.c.bf16 %v5466_v44, %v5465_v3 }
 0x940   :  { %v2967_v18 = vmul.f32 -1.442695, %v2495_v9  ;;  %v2502_v46 = vadd.f32 %v2493_v2, %v2403_v1  ;;  %v2521_v31 = vadd.f32 %v2518_v57, %v2444_v20  ;;  %v5467_v9 = vld [vmem:[#allocation62_spill] sm:$0xff]  ;;  %v5468_v1 = vld [vmem:[#allocation65_spill] sm:$0xff] }
 0x941   :  { %v2405_v22 = vpop.f32.mrf.mxu1  ;;  %v2446_v8 = vpop.f32.mrf.mxu0  ;;  %v2562_v20 = vpack.c.bf16 %v5468_v1, %v5467_v9 }
 0x942   :  { %3380 = vpow2.f32 %v2967_v18  ;;  %v2968_v34 = vmul.f32 -1.442695, %v2502_v46  ;;  %v2969_v39 = vmul.f32 -1.442695, %v2521_v31  ;;  %v5469_v18 = vld [vmem:[#allocation66_spill] sm:$0xff]  ;;  %v5470_v22 = vld [vmem:[#allocation63_spill] sm:$0xff] }
 0x943   :  { %v2406_v16 = vpop.f32.mrf.mxu1  ;;  %v2447_v13 = vpop.f32.mrf.mxu0  ;;  %v2565_v8 = vpack.c.bf16 %v5470_v22, %v5469_v18  ;;  %v2971_v46 = vld [vmem:[%s5020_s7] ss:$0 sm:$0xff]  ;;  %s3685_s7 = smov [#allocation13]  }
 0x944   :  { %3382 = vpow2.f32 %v2968_v34  ;;  %v5471_v16 = vld [vmem:[#allocation20_spill] sm:$0xff]  ;;  %s2781_s19 = sshll.u32 %s3685_s7, 4  ;;  %s2782_s19 = int_to_ptr.vmem [resolvable:$true] %s2781_s19 }
 0x945   :  { %v5472_v13 = vld [vmem:[#allocation52_spill] sm:$0xff]  ;;  %s3647_s1 = scalar_lea.vmem %s2782_s19, 1024  ;;  %p3652_p12 = scmp.lt.s32.totalorder %s2782_s19, %s2782_s19 }
 0x946   :  { %v2567_v2 = vpack.c.bf16 %v5472_v13, %v5471_v16  ;;  %p3648_p11 = scmp.ne.s32.totalorder %s2782_s19, %s3647_s1  ;;  %p3653_p13 = scmp.lt.s32.totalorder %s3647_s1, %s3647_s1 }
 0x948   :  { %p3654_p0 = por %p3653_p13, %p3652_p12 }
 0x94a   :  { %p3655_p1 = pnand %p3654_p0, %p3648_p11 }
 0x94f   :  { %v3381_v47 = vpop.eup %3380 }
 0x950   :  { %v2499_v35 = vadd.f32 1.0, %v3381_v47 }
 0x951   :  { %v3383_v51 = vpop.eup %3382 }
 0x952   :  { %3384 = vrcp.f32 %v2499_v35  ;;  %v2506_v56 = vadd.f32 1.0, %v3383_v51 }
 0x953   :  { %3386 = vpow2.f32 %v2969_v39 }
 0x95f   :  { %v3385_v48 = vpop.eup %3384 }
 0x960   :  { %v2510_v23 = vmul.f32 %v3385_v48, %v2509_v50  ;;  %v3387_v24 = vpop.eup %3386 }
 0x961   :  { %v2525_v30 = vadd.f32 1.0, %v3387_v24 }
 0x962   :  { %v2511_v52 = vadd.f32 %v2510_v23, %v2494_v17 }
 0x964   :  { %3388 = vtanh.f32 %v2511_v52 }
 0x965   :  { %3390 = vrcp.f32 %v2506_v56 }
 0x966   :  { %3392 = vrcp.f32 %v2525_v30 }
 0x971   :  { %v3389_v26 = vpop.eup %3388 }
 0x972   :  { %v2513_v11 = vsub.f32 %v4946_v41, %v3389_v26  ;;  %v3391_v4 = vpop.eup %3390 }
 0x973   :  { %v3393_v38 = vpop.eup %3392 }
 0x974   :  { %v2514_v43 = vmul.f32 %v3391_v4, %v2513_v11 }
 0x976   :  { %v2515_v12 = vadd.f32 %v3389_v26, %v2514_v43 }
 0x978   :  { %v2566_v29 = vpack.c.bf16 %v2515_v12, %v4946_v41 }
 0x97d   :  { %v2483_v36 = vpop.f32.mrf.mxu1 }
 0x97e   :  { %v2528_v5 = vadd.f32 %v2519_v15, %v2483_v36 }
 0x97f   :  { %v2485_v62 = vpop.f32.mrf.mxu1 }
 0x980   :  { %v2970_v21 = vmul.f32 -1.442695, %v2528_v5  ;;  %v2535_v25 = vadd.f32 %v3546_v53, %v2485_v62 }
 0x981   :  { %v2487_v27 = vpop.f32.mrf.mxu1 }
 0x982   :  { %3394 = vpow2.f32 %v2970_v21  ;;  %v2536_v10 = vmul.f32 %v3393_v38, %v2535_v25 }
 0x983   :  { %v2488_v33 = vpop.f32.mrf.mxu1 }
 0x984   :  { %v2537_v32 = vadd.f32 %v2536_v10, %v2520_v54 }
 0x986   :  { %3396 = vtanh.f32 %v2537_v32 }
 0x98f   :  { %v3395_v19 = vpop.eup %3394 }
 0x990   :  { %v2532_v45 = vadd.f32 1.0, %v3395_v19 }
 0x992   :  { %3398 = vrcp.f32 %v2532_v45 }
 0x993   :  { %v3397_v59 = vpop.eup %3396 }
 0x994   :  { %v2539_v61 = vsub.f32 %v4948_v55, %v3397_v59 }
 0x99f   :  { %v3399_v14 = vpop.eup %3398 }
 0x9a0   :  { %v2540_v49 = vmul.f32 %v3399_v14, %v2539_v61 }
 0x9a2   :  { %v2541_v63 = vadd.f32 %v3397_v59, %v2540_v49 }
 0x9a4   :  { %v2561_v7 = vpack.c.bf16 %v4948_v55, %v2541_v63  ;;  %v2564_v55 = vpack.c.bf16 %v4881_v40, %v4764_v28 }
 0x9a6   :  { %2735 = vmatprep.mubr.bf16.mxu0 %v2561_v7 }
 0x9a7   :  { %2736 = vmatmul.mubr.bf16.vlgmr.msra.gmra.mxu0 %v2560_v60 }
 0x9a8   :  { %2743 = vmatprep.mubr.bf16.mxu0 %v2563_v42 }
 0x9af   :  { %2744 = vmatmul.mubr.bf16.gmra.mxu0 %v2562_v20 }
 0x9b0   :  { %2751 = vmatprep.mubr.bf16.mxu0 %v2565_v8 }
 0x9b7   :  { %2752 = vmatmul.mubr.bf16.gmra.mxu0 %v2564_v55 }
 0x9b8   :  { %2759 = vmatprep.mubr.bf16.mxu0 %v2567_v2 }
 0x9bf   :  { %2760 = vmatmul.mubr.bf16.gmra.mxu0 %v2566_v29 }
 0xa67   :  { %v3028_v58 = vpop.f32.mrf.mxu0 }
 0xa69   :  { %v3029_v34 = vpop.f32.mrf.mxu0 }
 0xa6a   :  { %v3030_v47 = vadd.f32 %v3029_v34, %v3028_v58 }
 0xa6b   :  { %v3031_v35 = vpop.f32.mrf.mxu0 }
 0xa6c   :  { %v2738_v0 = vadd.f32 %v3030_v47, %v2971_v46 }
 0xa6d   :  { %v3032_v57 = vpop.f32.mrf.mxu0 }
 0xa6e   :  { %2768 = vst [vmem:[#allocation13] sm:$0xff] %v2738_v0  ;;  %v3033_v28 = vadd.f32 %v3032_v57, %v3031_v35 }
 0xa6f   :  { %v3034_v40 = vpop.f32.mrf.mxu0 }
 0xa70   :  { %v2741_v31 = vadd.f32 %v3033_v28, %v2971_v46 }
 0xa71   :  { %v3035_v37 = vpop.f32.mrf.mxu0 }
 0xa72   :  { %2769 = vst [vmem:[#allocation13 + $0x8] sm:$0xff] %v2741_v31  ;;  %v3036_v51 = vadd.f32 %v3035_v37, %v3034_v40 }
 0xa73   :  { %v3037_v6 = vpop.f32.mrf.mxu0 }
 0xa74   :  { %v2746_v41 = vadd.f32 %v3036_v51, %v2971_v46 }
 0xa75   :  { %v3038_v50 = vpop.f32.mrf.mxu0 }
 0xa76   :  { %2770 = vst [vmem:[#allocation13 + $0x10] sm:$0xff] %v2746_v41  ;;  %v3039_v48 = vadd.f32 %v3038_v50, %v3037_v6 }
 0xa77   :  { %v3040_v39 = vpop.f32.mrf.mxu0 }
 0xa78   :  { %v2749_v17 = vadd.f32 %v3039_v48, %v2971_v46 }
 0xa79   :  { %v3041_v23 = vpop.f32.mrf.mxu0 }
 0xa7a   :  { %2771 = vst [vmem:[#allocation13 + $0x18] sm:$0xff] %v2749_v17  ;;  %v3042_v52 = vadd.f32 %v3041_v23, %v3040_v39 }
 0xa7b   :  { %v3043_v56 = vpop.f32.mrf.mxu0 }
 0xa7c   :  { %v2754_v24 = vadd.f32 %v3042_v52, %v2971_v46 }
 0xa7d   :  { %v3044_v26 = vpop.f32.mrf.mxu0 }
 0xa7e   :  { %2772 = vst [vmem:[#allocation13 + $0x20] sm:$0xff] %v2754_v24  ;;  %v3045_v11 = vadd.f32 %v3044_v26, %v3043_v56 }
 0xa7f   :  { %v3046_v4 = vpop.f32.mrf.mxu0 }
 0xa80   :  { %v2757_v30 = vadd.f32 %v3045_v11, %v2971_v46 }
 0xa81   :  { %v3047_v43 = vpop.f32.mrf.mxu0 }
 0xa82   :  { %2773 = vst [vmem:[#allocation13 + $0x28] sm:$0xff] %v2757_v30  ;;  %v3048_v12 = vadd.f32 %v3047_v43, %v3046_v4 }
 0xa83   :  { %v3049_v15 = vpop.f32.mrf.mxu0 }
 0xa84   :  { %v2762_v36 = vadd.f32 %v3048_v12, %v2971_v46 }
 0xa85   :  { %v3050_v5 = vpop.f32.mrf.mxu0 }
 0xa86   :  { %2774 = vst [vmem:[#allocation13 + $0x30] sm:$0xff] %v2762_v36  ;;  %v3051_v62 = vadd.f32 %v3050_v5, %v3049_v15 }
 0xa88   :  { %v2765_v21 = vadd.f32 %v3051_v62, %v2971_v46 }
 0xa8a   :  { %2775 = vst [vmem:[#allocation13 + $0x38] sm:$0xff] %v2765_v21 }
 0xa8b   :  { %3658 = shalt.err (!%p3655_p1)
}
 0xa8c   :  { %s3686_s20 = smov 128   ;;  %s3687_s21 = smov 8  }
 0xa8d   :  { %2787 = dma.vmem_to_hbm [thread:$0]  %s2782_s19, 1024, %s5021_s8, [#allocation6], %s3686_s20, %s3686_s20, %s3687_s21  }
 0xa8e   :  { %3673 = dma.done.wait [#allocation6], 1024  }
 0xa8f   :  { %3674 = vsyncadd [#allocation6], 4294966272 }
 0xa90   :  { %2791 = vsyncpa [#allocation5], 1 }
 0xa91   :  { %2792 = vsyncpa [#allocation8], 1 }
 0xa92   :  { %2793 = vsyncpa [#allocation11], 1 }
 0xa93   :  { %2794 = vsyncpa [#allocation6], 1 }

</bundles_post_ra>
